<compile_context>
chip_gen: v5e
topology: v5e:2x2
jax: 0.10.0
libtpu: 0.0.40
codegen_flags: <defaults>
</compile_context>

<pallas_src>
import math

import jax
import jax.numpy as jnp
from jax.experimental import pallas as pl
from jax.experimental.pallas import tpu as pltpu


# ============================================================================
# Fused Pallas kernel: biLSTM (2 layers, both directions) + Dense(2H -> 1) * 100
# ============================================================================
def _net_kernel(x_ref,                       # (T, B, 1)  time-major input
                w0a_ref, w0b_ref,            # (1, 8H)    layer-0 W_ih (fwd cols / bwd cols)
                b0_ref,                      # (1, 8H)    layer-0 combined bias (both dirs)
                whh0_ref,                    # (2H, 8H)   layer-0 block-diag W_hh (both dirs)
                m1s_ref, m1w_ref,            # (2H, 8H)   layer-1 W_ih ("same-step"/"swapped-step")
                b1_ref,                      # (1, 8H)    layer-1 combined bias
                whh1_ref,                    # (2H, 8H)   layer-1 block-diag W_hh
                wd_ref, bd_ref,              # (2H, 1), (1, 1)  Dense head
                out_ref,                     # (B, 1)
                gxa, gxb,                    # VMEM (T, B, 8H) precomputed input->gate slabs
                hist0, hist1):               # VMEM (T, B, 2H) per-step [h_fwd | h_bwd]
    T, B, _ = x_ref.shape
    G = w0a_ref.shape[1]                     # 8H
    H2 = G // 4                              # 2H (stacked fwd/bwd state width)
    H = H2 // 2

    def lstm_pass(whh, hist):
        """Fused fwd+bwd recurrence.  At loop step t the fwd half processes input
        time t and the bwd half processes input time T-1-t; gxa[t] + gxb[T-1-t]
        is the precomputed input->gate contribution for exactly that pairing.
        hist[t] therefore holds [h_fwd(time t) | h_bwd(time T-1-t)]."""
        h = jnp.zeros((B, H2), jnp.float32)
        c = jnp.zeros((B, H2), jnp.float32)
        for t in range(T):                   # static unroll: T is a small constant
            g = (gxa[t] + gxb[T - 1 - t]
                 + jnp.dot(h, whh, preferred_element_type=jnp.float32))   # (B, 8H)
            i = jax.nn.sigmoid(g[:, 0 * H2:1 * H2])
            f = jax.nn.sigmoid(g[:, 1 * H2:2 * H2])
            u = jnp.tanh(      g[:, 2 * H2:3 * H2])
            o = jax.nn.sigmoid(g[:, 3 * H2:4 * H2])
            c = f * c + i * u
            h = o * jnp.tanh(c)
            hist[t] = h

    # ---- layer 0: input projection for ALL timesteps (off the serial path) -----
    # Din == 1 -> a single broadcast multiply builds the whole (T, B, 8H) slab.
    x = x_ref[...]                                           # (T, B, 1)
    gxa[...] = x * w0a_ref[...] + b0_ref[...]                # fwd columns (+ full bias)
    gxb[...] = x * w0b_ref[...]                              # bwd columns
    lstm_pass(whh0_ref[...], hist0)

    # ---- layer 1: input projection from the layer-0 history (off the serial path)
    # gxa[t] = hist0[t] @ M_same + b1 ; gxb[t] = hist0[t] @ M_swap, so that
    # gxa[t] + gxb[T-1-t] reproduces [x1_fwd(t) | x1_bwd(T-1-t)] @ W_ih + b.
    m1s = m1s_ref[...]
    m1w = m1w_ref[...]
    b1 = b1_ref[...]
    for t in range(T):
        h0t = hist0[t]                                       # (B, 2H)
        gxa[t] = jnp.dot(h0t, m1s, preferred_element_type=jnp.float32) + b1
        gxb[t] = jnp.dot(h0t, m1w, preferred_element_type=jnp.float32)
    lstm_pass(whh1_ref[...], hist1)

    # ---- Dense head on output[:, -1, :] = [h1_fwd(T-1) | h1_bwd(T-1)], then *100
    wd = wd_ref[...]                                         # (2H, 1)
    last_f = hist1[T - 1][:, 0:H]                            # fwd output at time T-1
    last_b = hist1[0][:, H:H2]                               # bwd output at time T-1
    y = (jnp.dot(last_f, wd[0:H, :], preferred_element_type=jnp.float32)
         + jnp.dot(last_b, wd[H:H2, :], preferred_element_type=jnp.float32)
         + bd_ref[...]) * 100.0
    out_ref[...] = y


# ============================================================================
# Wrapper
# ============================================================================
def _vmem():
    return pl.BlockSpec(memory_space=pltpu.MemorySpace.VMEM)


@jax.jit
def net_forward(x, params):
    """x: (B, T) float32  ->  (B, 1) float32 (same semantics as Net.forward)."""
    B, T = x.shape
    H2, G = params["whh0"].shape             # (2H, 8H)
    xt = jnp.transpose(x)[:, :, None]        # time-major (T, B, 1)

    return pl.pallas_call(
        _net_kernel,
        out_shape=jax.ShapeDtypeStruct((B, 1), jnp.float32),
        in_specs=[_vmem()] * 11,
        out_specs=_vmem(),
        scratch_shapes=[
            pltpu.VMEM((T, B, G), jnp.float32),    # gxa
            pltpu.VMEM((T, B, G), jnp.float32),    # gxb
            pltpu.VMEM((T, B, H2), jnp.float32),   # hist0
            pltpu.VMEM((T, B, H2), jnp.float32),   # hist1
        ],
    )(xt,
      params["w0a"], params["w0b"], params["b0"], params["whh0"],
      params["m1s"], params["m1w"], params["b1"], params["whh1"],
      params["wd"], params["bd"])


# ============================================================================
# Parameters: raw PyTorch-layout weights + packing into the fused kernel layout
# ============================================================================
def init_raw_params(key, hidden_size):
    """PyTorch-layout LSTM/Linear weights, uniform(-1/sqrt(H), 1/sqrt(H))."""
    H = hidden_size
    k = 1.0 / math.sqrt(H)

    def uni(key, shape):
        return jax.random.uniform(key, shape, jnp.float32, minval=-k, maxval=k)

    keys = jax.random.split(key, 18)
    idx = 0
    raw = {}
    layer_din = {0: 1, 1: 2 * H}
    for layer in (0, 1):
        for d in ("f", "b"):
            din = layer_din[layer]
            raw[f"l{layer}{d}"] = dict(
                w_ih=uni(keys[idx + 0], (4 * H, din)),   # (4H, Din), gate order i,f,g,o
                w_hh=uni(keys[idx + 1], (4 * H, H)),
                b_ih=uni(keys[idx + 2], (4 * H,)),
                b_hh=uni(keys[idx + 3], (4 * H,)),
            )
            idx += 4
    kd = 1.0 / math.sqrt(2 * H)
    raw["dense_w"] = jax.random.uniform(keys[idx], (1, 2 * H), jnp.float32, -kd, kd)
    raw["dense_b"] = jax.random.uniform(keys[idx + 1], (1,), jnp.float32, -kd, kd)
    return raw


def _spread_gates(w_t, H, direction):
    """w_t: (R, 4H) gate-major (i,f,g,o) -> (R, 8H): gate k's H columns are placed
    in the fwd (offset 0) or bwd (offset H) half of its 2H-wide slot, rest zero."""
    R = w_t.shape[0]
    off = 0 if direction == "fwd" else H
    out = jnp.zeros((R, 8 * H), w_t.dtype)
    for g in range(4):
        out = out.at[:, g * 2 * H + off:g * 2 * H + off + H].set(
            w_t[:, g * H:(g + 1) * H])
    return out


def pack_params(raw, H):
    def lstm_bias(p):
        return (p["b_ih"] + p["b_hh"]).reshape(1, 4 * H)

    p0f, p0b = raw["l0f"], raw["l0b"]
    p1f, p1b = raw["l1f"], raw["l1b"]
    packed = {}

    # layer 0 (Din == 1)
    packed["w0a"] = _spread_gates(p0f["w_ih"].T, H, "fwd")              # (1, 8H)
    packed["w0b"] = _spread_gates(p0b["w_ih"].T, H, "bwd")              # (1, 8H)
    packed["b0"] = (_spread_gates(lstm_bias(p0f), H, "fwd")
                    + _spread_gates(lstm_bias(p0b), H, "bwd"))          # (1, 8H)
    packed["whh0"] = jnp.concatenate(
        [_spread_gates(p0f["w_hh"].T, H, "fwd"),
         _spread_gates(p0b["w_hh"].T, H, "bwd")], axis=0)               # (2H, 8H)

    # layer 1 (Din == 2H, input features ordered [h_fwd | h_bwd])
    w1f_t = p1f["w_ih"].T                                               # (2H, 4H)
    w1b_t = p1b["w_ih"].T                                               # (2H, 4H)
    # M_same multiplies hist0[t]   = [h0_f(t)     | h0_b(T-1-t)]
    # M_swap multiplies hist0[T-1-t] = [h0_f(T-1-t) | h0_b(t)]
    packed["m1s"] = jnp.concatenate(
        [_spread_gates(w1f_t[:H], H, "fwd"),
         _spread_gates(w1b_t[H:], H, "bwd")], axis=0)                   # (2H, 8H)
    packed["m1w"] = jnp.concatenate(
        [_spread_gates(w1b_t[:H], H, "bwd"),
         _spread_gates(w1f_t[H:], H, "fwd")], axis=0)                   # (2H, 8H)
    packed["b1"] = (_spread_gates(lstm_bias(p1f), H, "fwd")
                    + _spread_gates(lstm_bias(p1b), H, "bwd"))          # (1, 8H)
    packed["whh1"] = jnp.concatenate(
        [_spread_gates(p1f["w_hh"].T, H, "fwd"),
         _spread_gates(p1b["w_hh"].T, H, "bwd")], axis=0)               # (2H, 8H)

    # Dense head
    packed["wd"] = raw["dense_w"].T                                     # (2H, 1)
    packed["bd"] = raw["dense_b"].reshape(1, 1)                         # (1, 1)
    return packed


# ============================================================================
# Pure-JAX reference (mirror of the PyTorch module) for correctness checking
# ============================================================================
def reference_forward(x, raw):
    xt = jnp.transpose(x)[:, :, None]                        # (T, B, 1)

    def run_dir(seq, p, reverse):
        Hd = p["w_hh"].shape[1]
        Bn = seq.shape[1]
        inp = seq[::-1] if reverse else seq

        def step(carry, x_t):
            h, c = carry
            g = x_t @ p["w_ih"].T + h @ p["w_hh"].T + p["b_ih"] + p["b_hh"]
            i, f, u, o = jnp.split(g, 4, axis=-1)
            c = jax.nn.sigmoid(f) * c + jax.nn.sigmoid(i) * jnp.tanh(u)
            h = jax.nn.sigmoid(o) * jnp.tanh(c)
            return (h, c), h

        init = (jnp.zeros((Bn, Hd), jnp.float32), jnp.zeros((Bn, Hd), jnp.float32))
        _, hs = jax.lax.scan(step, init, inp)
        return hs[::-1] if reverse else hs                   # time-aligned (T, B, H)

    l0 = jnp.concatenate([run_dir(xt, raw["l0f"], False),
                          run_dir(xt, raw["l0b"], True)], axis=-1)
    l1 = jnp.concatenate([run_dir(l0, raw["l1f"], False),
                          run_dir(l0, raw["l1b"], True)], axis=-1)
    last = l1[-1]                                            # == output[:, -1, :]
    return (last @ raw["dense_w"].T + raw["dense_b"]) * 100.0


# ============================================================================
if __name__ == "__main__":
    B, T, H = 2, 8, 32

    key = jax.random.PRNGKey(0)
    key_x, key_p = jax.random.split(key)
    x = jax.random.normal(key_x, (B, T), dtype=jnp.float32)

    raw = init_raw_params(key_p, H)
    params = pack_params(raw, H)

    out = net_forward(x, params)
    jax.block_until_ready(out)
    assert out.shape == (B, 1) and out.dtype == jnp.float32

    # Correctness check vs. the pure-JAX mirror (loose tolerance to allow for
    # differing matmul-precision defaults between XLA and Mosaic).
    ref = reference_forward(x, raw)
    assert jnp.allclose(out, ref, rtol=2e-2, atol=2.0), (out, ref)

    print("KERNEL_OK")
</pallas_src>

<mosaic_0001>
module attributes {stable_mosaic.version = 11 : i64} {
  func.func @_net_kernel(%arg0: memref<8x2x1xf32, #tpu.memory_space<vmem>>, %arg1: memref<1x256xf32, #tpu.memory_space<vmem>>, %arg2: memref<1x256xf32, #tpu.memory_space<vmem>>, %arg3: memref<1x256xf32, #tpu.memory_space<vmem>>, %arg4: memref<64x256xf32, #tpu.memory_space<vmem>>, %arg5: memref<64x256xf32, #tpu.memory_space<vmem>>, %arg6: memref<64x256xf32, #tpu.memory_space<vmem>>, %arg7: memref<1x256xf32, #tpu.memory_space<vmem>>, %arg8: memref<64x256xf32, #tpu.memory_space<vmem>>, %arg9: memref<64x1xf32, #tpu.memory_space<vmem>>, %arg10: memref<1x1xf32, #tpu.memory_space<vmem>>, %arg11: memref<2x1xf32, #tpu.memory_space<vmem>>, %arg12: memref<8x2x256xf32, #tpu.memory_space<vmem>>, %arg13: memref<8x2x256xf32, #tpu.memory_space<vmem>>, %arg14: memref<8x2x64xf32, #tpu.memory_space<vmem>>, %arg15: memref<8x2x64xf32, #tpu.memory_space<vmem>>) attributes {dimension_semantics = [], scalar_prefetch = 0 : i64, scratch_operands = 4 : i64, tpu.core_type = #tpu.core_type<tc>} {
    %c0 = arith.constant 0 : index
    %c0_0 = arith.constant 0 : index
    %c0_1 = arith.constant 0 : index
    %0 = vector.load %arg0[%c0, %c0_0, %c0_1] : memref<8x2x1xf32, #tpu.memory_space<vmem>>, vector<8x2x1xf32>
    %c0_2 = arith.constant 0 : index
    %c0_3 = arith.constant 0 : index
    %1 = vector.load %arg1[%c0_2, %c0_3] : memref<1x256xf32, #tpu.memory_space<vmem>>, vector<1x256xf32>
    %2 = vector.shape_cast %1 : vector<1x256xf32> to vector<1x1x256xf32>
    %3 = vector.broadcast %0 : vector<8x2x1xf32> to vector<8x2x256xf32>
    %4 = vector.broadcast %2 : vector<1x1x256xf32> to vector<8x2x256xf32>
    %5 = arith.mulf %3, %4 : vector<8x2x256xf32>
    %c0_4 = arith.constant 0 : index
    %c0_5 = arith.constant 0 : index
    %6 = vector.load %arg3[%c0_4, %c0_5] : memref<1x256xf32, #tpu.memory_space<vmem>>, vector<1x256xf32>
    %7 = vector.shape_cast %6 : vector<1x256xf32> to vector<1x1x256xf32>
    %8 = vector.broadcast %7 : vector<1x1x256xf32> to vector<8x2x256xf32>
    %9 = arith.addf %5, %8 : vector<8x2x256xf32>
    %c0_6 = arith.constant 0 : index
    %c0_7 = arith.constant 0 : index
    %c0_8 = arith.constant 0 : index
    %10 = vector.load %arg12[%c0_6, %c0_7, %c0_8] : memref<8x2x256xf32, #tpu.memory_space<vmem>>, vector<8x2x256xf32>
    tpu.vector_store %arg12[%c0_6, %c0_7, %c0_8], %9 {strides = array<i32>} : memref<8x2x256xf32, #tpu.memory_space<vmem>>, vector<8x2x256xf32>,
    %c0_9 = arith.constant 0 : index
    %c0_10 = arith.constant 0 : index
    %11 = vector.load %arg2[%c0_9, %c0_10] : memref<1x256xf32, #tpu.memory_space<vmem>>, vector<1x256xf32>
    %12 = vector.shape_cast %11 : vector<1x256xf32> to vector<1x1x256xf32>
    %13 = vector.broadcast %0 : vector<8x2x1xf32> to vector<8x2x256xf32>
    %14 = vector.broadcast %12 : vector<1x1x256xf32> to vector<8x2x256xf32>
    %15 = arith.mulf %13, %14 : vector<8x2x256xf32>
    %c0_11 = arith.constant 0 : index
    %c0_12 = arith.constant 0 : index
    %c0_13 = arith.constant 0 : index
    %16 = vector.load %arg13[%c0_11, %c0_12, %c0_13] : memref<8x2x256xf32, #tpu.memory_space<vmem>>, vector<8x2x256xf32>
    tpu.vector_store %arg13[%c0_11, %c0_12, %c0_13], %15 {strides = array<i32>} : memref<8x2x256xf32, #tpu.memory_space<vmem>>, vector<8x2x256xf32>,
    %c0_14 = arith.constant 0 : index
    %c0_15 = arith.constant 0 : index
    %17 = vector.load %arg4[%c0_14, %c0_15] : memref<64x256xf32, #tpu.memory_space<vmem>>, vector<64x256xf32>
    %cst = arith.constant 0.000000e+00 : f32
    %18 = vector.broadcast %cst : f32 to vector<2x64xf32>
    %cst_16 = arith.constant 0.000000e+00 : f32
    %19 = vector.broadcast %cst_16 : f32 to vector<2x64xf32>
    %c0_17 = arith.constant 0 : index
    %c0_18 = arith.constant 0 : index
    %c0_19 = arith.constant 0 : index
    %20 = vector.load %arg12[%c0_17, %c0_18, %c0_19] : memref<8x2x256xf32, #tpu.memory_space<vmem>>, vector<1x2x256xf32>
    %21 = vector.shape_cast %20 : vector<1x2x256xf32> to vector<2x256xf32>
    %c7 = arith.constant 7 : index
    %c0_20 = arith.constant 0 : index
    %c0_21 = arith.constant 0 : index
    %22 = vector.load %arg13[%c7, %c0_20, %c0_21] : memref<8x2x256xf32, #tpu.memory_space<vmem>>, vector<1x2x256xf32>
    %23 = vector.shape_cast %22 : vector<1x2x256xf32> to vector<2x256xf32>
    %24 = arith.addf %21, %23 : vector<2x256xf32>
    %cst_22 = arith.constant dense<0.000000e+00> : vector<2x256xf32>
    %25 = tpu.matmul %18, %17, %cst_22 {dimension_numbers = #tpu.dot_dimension_numbers<[1], [0], [0], [1], [0, 0, 1, 1], [], []>} : vector<2x64xf32>, vector<64x256xf32>, vector<2x256xf32> -> vector<2x256xf32>
    %26 = arith.addf %24, %25 : vector<2x256xf32>
    %27 = vector.extract_strided_slice %26 {offsets = [0, 0], sizes = [2, 64], strides = [1, 1]} : vector<2x256xf32> to vector<2x64xf32>
    %28 = arith.negf %27 : vector<2x64xf32>
    %29 = math.exp %28 : vector<2x64xf32>
    %cst_23 = arith.constant 1.000000e+00 : f32
    %30 = vector.broadcast %cst_23 : f32 to vector<2x64xf32>
    %31 = arith.addf %30, %29 : vector<2x64xf32>
    %32 = arith.divf %30, %31 : vector<2x64xf32>
    %33 = vector.extract_strided_slice %26 {offsets = [0, 64], sizes = [2, 64], strides = [1, 1]} : vector<2x256xf32> to vector<2x64xf32>
    %34 = arith.negf %33 : vector<2x64xf32>
    %35 = math.exp %34 : vector<2x64xf32>
    %cst_24 = arith.constant 1.000000e+00 : f32
    %36 = vector.broadcast %cst_24 : f32 to vector<2x64xf32>
    %37 = arith.addf %36, %35 : vector<2x64xf32>
    %38 = arith.divf %36, %37 : vector<2x64xf32>
    %39 = vector.extract_strided_slice %26 {offsets = [0, 128], sizes = [2, 64], strides = [1, 1]} : vector<2x256xf32> to vector<2x64xf32>
    %40 = math.tanh %39 : vector<2x64xf32>
    %41 = vector.extract_strided_slice %26 {offsets = [0, 192], sizes = [2, 64], strides = [1, 1]} : vector<2x256xf32> to vector<2x64xf32>
    %42 = arith.negf %41 : vector<2x64xf32>
    %43 = math.exp %42 : vector<2x64xf32>
    %cst_25 = arith.constant 1.000000e+00 : f32
    %44 = vector.broadcast %cst_25 : f32 to vector<2x64xf32>
    %45 = arith.addf %44, %43 : vector<2x64xf32>
    %46 = arith.divf %44, %45 : vector<2x64xf32>
    %47 = arith.mulf %38, %19 : vector<2x64xf32>
    %48 = arith.mulf %32, %40 : vector<2x64xf32>
    %49 = arith.addf %47, %48 : vector<2x64xf32>
    %50 = math.tanh %49 : vector<2x64xf32>
    %51 = arith.mulf %46, %50 : vector<2x64xf32>
    %c0_26 = arith.constant 0 : index
    %c0_27 = arith.constant 0 : index
    %c0_28 = arith.constant 0 : index
    %52 = vector.load %arg14[%c0_26, %c0_27, %c0_28] : memref<8x2x64xf32, #tpu.memory_space<vmem>>, vector<1x2x64xf32>
    %53 = vector.shape_cast %52 : vector<1x2x64xf32> to vector<2x64xf32>
    %54 = vector.shape_cast %51 : vector<2x64xf32> to vector<1x2x64xf32>
    tpu.vector_store %arg14[%c0_26, %c0_27, %c0_28], %54 {strides = array<i32>} : memref<8x2x64xf32, #tpu.memory_space<vmem>>, vector<1x2x64xf32>,
    %c1 = arith.constant 1 : index
    %c0_29 = arith.constant 0 : index
    %c0_30 = arith.constant 0 : index
    %55 = vector.load %arg12[%c1, %c0_29, %c0_30] : memref<8x2x256xf32, #tpu.memory_space<vmem>>, vector<1x2x256xf32>
    %56 = vector.shape_cast %55 : vector<1x2x256xf32> to vector<2x256xf32>
    %c6 = arith.constant 6 : index
    %c0_31 = arith.constant 0 : index
    %c0_32 = arith.constant 0 : index
    %57 = vector.load %arg13[%c6, %c0_31, %c0_32] : memref<8x2x256xf32, #tpu.memory_space<vmem>>, vector<1x2x256xf32>
    %58 = vector.shape_cast %57 : vector<1x2x256xf32> to vector<2x256xf32>
    %59 = arith.addf %56, %58 : vector<2x256xf32>
    %cst_33 = arith.constant dense<0.000000e+00> : vector<2x256xf32>
    %60 = tpu.matmul %51, %17, %cst_33 {dimension_numbers = #tpu.dot_dimension_numbers<[1], [0], [0], [1], [0, 0, 1, 1], [], []>} : vector<2x64xf32>, vector<64x256xf32>, vector<2x256xf32> -> vector<2x256xf32>
    %61 = arith.addf %59, %60 : vector<2x256xf32>
    %62 = vector.extract_strided_slice %61 {offsets = [0, 0], sizes = [2, 64], strides = [1, 1]} : vector<2x256xf32> to vector<2x64xf32>
    %63 = arith.negf %62 : vector<2x64xf32>
    %64 = math.exp %63 : vector<2x64xf32>
    %cst_34 = arith.constant 1.000000e+00 : f32
    %65 = vector.broadcast %cst_34 : f32 to vector<2x64xf32>
    %66 = arith.addf %65, %64 : vector<2x64xf32>
    %67 = arith.divf %65, %66 : vector<2x64xf32>
    %68 = vector.extract_strided_slice %61 {offsets = [0, 64], sizes = [2, 64], strides = [1, 1]} : vector<2x256xf32> to vector<2x64xf32>
    %69 = arith.negf %68 : vector<2x64xf32>
    %70 = math.exp %69 : vector<2x64xf32>
    %cst_35 = arith.constant 1.000000e+00 : f32
    %71 = vector.broadcast %cst_35 : f32 to vector<2x64xf32>
    %72 = arith.addf %71, %70 : vector<2x64xf32>
    %73 = arith.divf %71, %72 : vector<2x64xf32>
    %74 = vector.extract_strided_slice %61 {offsets = [0, 128], sizes = [2, 64], strides = [1, 1]} : vector<2x256xf32> to vector<2x64xf32>
    %75 = math.tanh %74 : vector<2x64xf32>
    %76 = vector.extract_strided_slice %61 {offsets = [0, 192], sizes = [2, 64], strides = [1, 1]} : vector<2x256xf32> to vector<2x64xf32>
    %77 = arith.negf %76 : vector<2x64xf32>
    %78 = math.exp %77 : vector<2x64xf32>
    %cst_36 = arith.constant 1.000000e+00 : f32
    %79 = vector.broadcast %cst_36 : f32 to vector<2x64xf32>
    %80 = arith.addf %79, %78 : vector<2x64xf32>
    %81 = arith.divf %79, %80 : vector<2x64xf32>
    %82 = arith.mulf %73, %49 : vector<2x64xf32>
    %83 = arith.mulf %67, %75 : vector<2x64xf32>
    %84 = arith.addf %82, %83 : vector<2x64xf32>
    %85 = math.tanh %84 : vector<2x64xf32>
    %86 = arith.mulf %81, %85 : vector<2x64xf32>
    %c1_37 = arith.constant 1 : index
    %c0_38 = arith.constant 0 : index
    %c0_39 = arith.constant 0 : index
    %87 = vector.load %arg14[%c1_37, %c0_38, %c0_39] : memref<8x2x64xf32, #tpu.memory_space<vmem>>, vector<1x2x64xf32>
    %88 = vector.shape_cast %87 : vector<1x2x64xf32> to vector<2x64xf32>
    %89 = vector.shape_cast %86 : vector<2x64xf32> to vector<1x2x64xf32>
    tpu.vector_store %arg14[%c1_37, %c0_38, %c0_39], %89 {strides = array<i32>} : memref<8x2x64xf32, #tpu.memory_space<vmem>>, vector<1x2x64xf32>,
    %c2 = arith.constant 2 : index
    %c0_40 = arith.constant 0 : index
    %c0_41 = arith.constant 0 : index
    %90 = vector.load %arg12[%c2, %c0_40, %c0_41] : memref<8x2x256xf32, #tpu.memory_space<vmem>>, vector<1x2x256xf32>
    %91 = vector.shape_cast %90 : vector<1x2x256xf32> to vector<2x256xf32>
    %c5 = arith.constant 5 : index
    %c0_42 = arith.constant 0 : index
    %c0_43 = arith.constant 0 : index
    %92 = vector.load %arg13[%c5, %c0_42, %c0_43] : memref<8x2x256xf32, #tpu.memory_space<vmem>>, vector<1x2x256xf32>
    %93 = vector.shape_cast %92 : vector<1x2x256xf32> to vector<2x256xf32>
    %94 = arith.addf %91, %93 : vector<2x256xf32>
    %cst_44 = arith.constant dense<0.000000e+00> : vector<2x256xf32>
    %95 = tpu.matmul %86, %17, %cst_44 {dimension_numbers = #tpu.dot_dimension_numbers<[1], [0], [0], [1], [0, 0, 1, 1], [], []>} : vector<2x64xf32>, vector<64x256xf32>, vector<2x256xf32> -> vector<2x256xf32>
    %96 = arith.addf %94, %95 : vector<2x256xf32>
    %97 = vector.extract_strided_slice %96 {offsets = [0, 0], sizes = [2, 64], strides = [1, 1]} : vector<2x256xf32> to vector<2x64xf32>
    %98 = arith.negf %97 : vector<2x64xf32>
    %99 = math.exp %98 : vector<2x64xf32>
    %cst_45 = arith.constant 1.000000e+00 : f32
    %100 = vector.broadcast %cst_45 : f32 to vector<2x64xf32>
    %101 = arith.addf %100, %99 : vector<2x64xf32>
    %102 = arith.divf %100, %101 : vector<2x64xf32>
    %103 = vector.extract_strided_slice %96 {offsets = [0, 64], sizes = [2, 64], strides = [1, 1]} : vector<2x256xf32> to vector<2x64xf32>
    %104 = arith.negf %103 : vector<2x64xf32>
    %105 = math.exp %104 : vector<2x64xf32>
    %cst_46 = arith.constant 1.000000e+00 : f32
    %106 = vector.broadcast %cst_46 : f32 to vector<2x64xf32>
    %107 = arith.addf %106, %105 : vector<2x64xf32>
    %108 = arith.divf %106, %107 : vector<2x64xf32>
    %109 = vector.extract_strided_slice %96 {offsets = [0, 128], sizes = [2, 64], strides = [1, 1]} : vector<2x256xf32> to vector<2x64xf32>
    %110 = math.tanh %109 : vector<2x64xf32>
    %111 = vector.extract_strided_slice %96 {offsets = [0, 192], sizes = [2, 64], strides = [1, 1]} : vector<2x256xf32> to vector<2x64xf32>
    %112 = arith.negf %111 : vector<2x64xf32>
    %113 = math.exp %112 : vector<2x64xf32>
    %cst_47 = arith.constant 1.000000e+00 : f32
    %114 = vector.broadcast %cst_47 : f32 to vector<2x64xf32>
    %115 = arith.addf %114, %113 : vector<2x64xf32>
    %116 = arith.divf %114, %115 : vector<2x64xf32>
    %117 = arith.mulf %108, %84 : vector<2x64xf32>
    %118 = arith.mulf %102, %110 : vector<2x64xf32>
    %119 = arith.addf %117, %118 : vector<2x64xf32>
    %120 = math.tanh %119 : vector<2x64xf32>
    %121 = arith.mulf %116, %120 : vector<2x64xf32>
    %c2_48 = arith.constant 2 : index
    %c0_49 = arith.constant 0 : index
    %c0_50 = arith.constant 0 : index
    %122 = vector.load %arg14[%c2_48, %c0_49, %c0_50] : memref<8x2x64xf32, #tpu.memory_space<vmem>>, vector<1x2x64xf32>
    %123 = vector.shape_cast %122 : vector<1x2x64xf32> to vector<2x64xf32>
    %124 = vector.shape_cast %121 : vector<2x64xf32> to vector<1x2x64xf32>
    tpu.vector_store %arg14[%c2_48, %c0_49, %c0_50], %124 {strides = array<i32>} : memref<8x2x64xf32, #tpu.memory_space<vmem>>, vector<1x2x64xf32>,
    %c3 = arith.constant 3 : index
    %c0_51 = arith.constant 0 : index
    %c0_52 = arith.constant 0 : index
    %125 = vector.load %arg12[%c3, %c0_51, %c0_52] : memref<8x2x256xf32, #tpu.memory_space<vmem>>, vector<1x2x256xf32>
    %126 = vector.shape_cast %125 : vector<1x2x256xf32> to vector<2x256xf32>
    %c4 = arith.constant 4 : index
    %c0_53 = arith.constant 0 : index
    %c0_54 = arith.constant 0 : index
    %127 = vector.load %arg13[%c4, %c0_53, %c0_54] : memref<8x2x256xf32, #tpu.memory_space<vmem>>, vector<1x2x256xf32>
    %128 = vector.shape_cast %127 : vector<1x2x256xf32> to vector<2x256xf32>
    %129 = arith.addf %126, %128 : vector<2x256xf32>
    %cst_55 = arith.constant dense<0.000000e+00> : vector<2x256xf32>
    %130 = tpu.matmul %121, %17, %cst_55 {dimension_numbers = #tpu.dot_dimension_numbers<[1], [0], [0], [1], [0, 0, 1, 1], [], []>} : vector<2x64xf32>, vector<64x256xf32>, vector<2x256xf32> -> vector<2x256xf32>
    %131 = arith.addf %129, %130 : vector<2x256xf32>
    %132 = vector.extract_strided_slice %131 {offsets = [0, 0], sizes = [2, 64], strides = [1, 1]} : vector<2x256xf32> to vector<2x64xf32>
    %133 = arith.negf %132 : vector<2x64xf32>
    %134 = math.exp %133 : vector<2x64xf32>
    %cst_56 = arith.constant 1.000000e+00 : f32
    %135 = vector.broadcast %cst_56 : f32 to vector<2x64xf32>
    %136 = arith.addf %135, %134 : vector<2x64xf32>
    %137 = arith.divf %135, %136 : vector<2x64xf32>
    %138 = vector.extract_strided_slice %131 {offsets = [0, 64], sizes = [2, 64], strides = [1, 1]} : vector<2x256xf32> to vector<2x64xf32>
    %139 = arith.negf %138 : vector<2x64xf32>
    %140 = math.exp %139 : vector<2x64xf32>
    %cst_57 = arith.constant 1.000000e+00 : f32
    %141 = vector.broadcast %cst_57 : f32 to vector<2x64xf32>
    %142 = arith.addf %141, %140 : vector<2x64xf32>
    %143 = arith.divf %141, %142 : vector<2x64xf32>
    %144 = vector.extract_strided_slice %131 {offsets = [0, 128], sizes = [2, 64], strides = [1, 1]} : vector<2x256xf32> to vector<2x64xf32>
    %145 = math.tanh %144 : vector<2x64xf32>
    %146 = vector.extract_strided_slice %131 {offsets = [0, 192], sizes = [2, 64], strides = [1, 1]} : vector<2x256xf32> to vector<2x64xf32>
    %147 = arith.negf %146 : vector<2x64xf32>
    %148 = math.exp %147 : vector<2x64xf32>
    %cst_58 = arith.constant 1.000000e+00 : f32
    %149 = vector.broadcast %cst_58 : f32 to vector<2x64xf32>
    %150 = arith.addf %149, %148 : vector<2x64xf32>
    %151 = arith.divf %149, %150 : vector<2x64xf32>
    %152 = arith.mulf %143, %119 : vector<2x64xf32>
    %153 = arith.mulf %137, %145 : vector<2x64xf32>
    %154 = arith.addf %152, %153 : vector<2x64xf32>
    %155 = math.tanh %154 : vector<2x64xf32>
    %156 = arith.mulf %151, %155 : vector<2x64xf32>
    %c3_59 = arith.constant 3 : index
    %c0_60 = arith.constant 0 : index
    %c0_61 = arith.constant 0 : index
    %157 = vector.load %arg14[%c3_59, %c0_60, %c0_61] : memref<8x2x64xf32, #tpu.memory_space<vmem>>, vector<1x2x64xf32>
    %158 = vector.shape_cast %157 : vector<1x2x64xf32> to vector<2x64xf32>
    %159 = vector.shape_cast %156 : vector<2x64xf32> to vector<1x2x64xf32>
    tpu.vector_store %arg14[%c3_59, %c0_60, %c0_61], %159 {strides = array<i32>} : memref<8x2x64xf32, #tpu.memory_space<vmem>>, vector<1x2x64xf32>,
    %c4_62 = arith.constant 4 : index
    %c0_63 = arith.constant 0 : index
    %c0_64 = arith.constant 0 : index
    %160 = vector.load %arg12[%c4_62, %c0_63, %c0_64] : memref<8x2x256xf32, #tpu.memory_space<vmem>>, vector<1x2x256xf32>
    %161 = vector.shape_cast %160 : vector<1x2x256xf32> to vector<2x256xf32>
    %c3_65 = arith.constant 3 : index
    %c0_66 = arith.constant 0 : index
    %c0_67 = arith.constant 0 : index
    %162 = vector.load %arg13[%c3_65, %c0_66, %c0_67] : memref<8x2x256xf32, #tpu.memory_space<vmem>>, vector<1x2x256xf32>
    %163 = vector.shape_cast %162 : vector<1x2x256xf32> to vector<2x256xf32>
    %164 = arith.addf %161, %163 : vector<2x256xf32>
    %cst_68 = arith.constant dense<0.000000e+00> : vector<2x256xf32>
    %165 = tpu.matmul %156, %17, %cst_68 {dimension_numbers = #tpu.dot_dimension_numbers<[1], [0], [0], [1], [0, 0, 1, 1], [], []>} : vector<2x64xf32>, vector<64x256xf32>, vector<2x256xf32> -> vector<2x256xf32>
    %166 = arith.addf %164, %165 : vector<2x256xf32>
    %167 = vector.extract_strided_slice %166 {offsets = [0, 0], sizes = [2, 64], strides = [1, 1]} : vector<2x256xf32> to vector<2x64xf32>
    %168 = arith.negf %167 : vector<2x64xf32>
    %169 = math.exp %168 : vector<2x64xf32>
    %cst_69 = arith.constant 1.000000e+00 : f32
    %170 = vector.broadcast %cst_69 : f32 to vector<2x64xf32>
    %171 = arith.addf %170, %169 : vector<2x64xf32>
    %172 = arith.divf %170, %171 : vector<2x64xf32>
    %173 = vector.extract_strided_slice %166 {offsets = [0, 64], sizes = [2, 64], strides = [1, 1]} : vector<2x256xf32> to vector<2x64xf32>
    %174 = arith.negf %173 : vector<2x64xf32>
    %175 = math.exp %174 : vector<2x64xf32>
    %cst_70 = arith.constant 1.000000e+00 : f32
    %176 = vector.broadcast %cst_70 : f32 to vector<2x64xf32>
    %177 = arith.addf %176, %175 : vector<2x64xf32>
    %178 = arith.divf %176, %177 : vector<2x64xf32>
    %179 = vector.extract_strided_slice %166 {offsets = [0, 128], sizes = [2, 64], strides = [1, 1]} : vector<2x256xf32> to vector<2x64xf32>
    %180 = math.tanh %179 : vector<2x64xf32>
    %181 = vector.extract_strided_slice %166 {offsets = [0, 192], sizes = [2, 64], strides = [1, 1]} : vector<2x256xf32> to vector<2x64xf32>
    %182 = arith.negf %181 : vector<2x64xf32>
    %183 = math.exp %182 : vector<2x64xf32>
    %cst_71 = arith.constant 1.000000e+00 : f32
    %184 = vector.broadcast %cst_71 : f32 to vector<2x64xf32>
    %185 = arith.addf %184, %183 : vector<2x64xf32>
    %186 = arith.divf %184, %185 : vector<2x64xf32>
    %187 = arith.mulf %178, %154 : vector<2x64xf32>
    %188 = arith.mulf %172, %180 : vector<2x64xf32>
    %189 = arith.addf %187, %188 : vector<2x64xf32>
    %190 = math.tanh %189 : vector<2x64xf32>
    %191 = arith.mulf %186, %190 : vector<2x64xf32>
    %c4_72 = arith.constant 4 : index
    %c0_73 = arith.constant 0 : index
    %c0_74 = arith.constant 0 : index
    %192 = vector.load %arg14[%c4_72, %c0_73, %c0_74] : memref<8x2x64xf32, #tpu.memory_space<vmem>>, vector<1x2x64xf32>
    %193 = vector.shape_cast %192 : vector<1x2x64xf32> to vector<2x64xf32>
    %194 = vector.shape_cast %191 : vector<2x64xf32> to vector<1x2x64xf32>
    tpu.vector_store %arg14[%c4_72, %c0_73, %c0_74], %194 {strides = array<i32>} : memref<8x2x64xf32, #tpu.memory_space<vmem>>, vector<1x2x64xf32>,
    %c5_75 = arith.constant 5 : index
    %c0_76 = arith.constant 0 : index
    %c0_77 = arith.constant 0 : index
    %195 = vector.load %arg12[%c5_75, %c0_76, %c0_77] : memref<8x2x256xf32, #tpu.memory_space<vmem>>, vector<1x2x256xf32>
    %196 = vector.shape_cast %195 : vector<1x2x256xf32> to vector<2x256xf32>
    %c2_78 = arith.constant 2 : index
    %c0_79 = arith.constant 0 : index
    %c0_80 = arith.constant 0 : index
    %197 = vector.load %arg13[%c2_78, %c0_79, %c0_80] : memref<8x2x256xf32, #tpu.memory_space<vmem>>, vector<1x2x256xf32>
    %198 = vector.shape_cast %197 : vector<1x2x256xf32> to vector<2x256xf32>
    %199 = arith.addf %196, %198 : vector<2x256xf32>
    %cst_81 = arith.constant dense<0.000000e+00> : vector<2x256xf32>
    %200 = tpu.matmul %191, %17, %cst_81 {dimension_numbers = #tpu.dot_dimension_numbers<[1], [0], [0], [1], [0, 0, 1, 1], [], []>} : vector<2x64xf32>, vector<64x256xf32>, vector<2x256xf32> -> vector<2x256xf32>
    %201 = arith.addf %199, %200 : vector<2x256xf32>
    %202 = vector.extract_strided_slice %201 {offsets = [0, 0], sizes = [2, 64], strides = [1, 1]} : vector<2x256xf32> to vector<2x64xf32>
    %203 = arith.negf %202 : vector<2x64xf32>
    %204 = math.exp %203 : vector<2x64xf32>
    %cst_82 = arith.constant 1.000000e+00 : f32
    %205 = vector.broadcast %cst_82 : f32 to vector<2x64xf32>
    %206 = arith.addf %205, %204 : vector<2x64xf32>
    %207 = arith.divf %205, %206 : vector<2x64xf32>
    %208 = vector.extract_strided_slice %201 {offsets = [0, 64], sizes = [2, 64], strides = [1, 1]} : vector<2x256xf32> to vector<2x64xf32>
    %209 = arith.negf %208 : vector<2x64xf32>
    %210 = math.exp %209 : vector<2x64xf32>
    %cst_83 = arith.constant 1.000000e+00 : f32
    %211 = vector.broadcast %cst_83 : f32 to vector<2x64xf32>
    %212 = arith.addf %211, %210 : vector<2x64xf32>
    %213 = arith.divf %211, %212 : vector<2x64xf32>
    %214 = vector.extract_strided_slice %201 {offsets = [0, 128], sizes = [2, 64], strides = [1, 1]} : vector<2x256xf32> to vector<2x64xf32>
    %215 = math.tanh %214 : vector<2x64xf32>
    %216 = vector.extract_strided_slice %201 {offsets = [0, 192], sizes = [2, 64], strides = [1, 1]} : vector<2x256xf32> to vector<2x64xf32>
    %217 = arith.negf %216 : vector<2x64xf32>
    %218 = math.exp %217 : vector<2x64xf32>
    %cst_84 = arith.constant 1.000000e+00 : f32
    %219 = vector.broadcast %cst_84 : f32 to vector<2x64xf32>
    %220 = arith.addf %219, %218 : vector<2x64xf32>
    %221 = arith.divf %219, %220 : vector<2x64xf32>
    %222 = arith.mulf %213, %189 : vector<2x64xf32>
    %223 = arith.mulf %207, %215 : vector<2x64xf32>
    %224 = arith.addf %222, %223 : vector<2x64xf32>
    %225 = math.tanh %224 : vector<2x64xf32>
    %226 = arith.mulf %221, %225 : vector<2x64xf32>
    %c5_85 = arith.constant 5 : index
    %c0_86 = arith.constant 0 : index
    %c0_87 = arith.constant 0 : index
    %227 = vector.load %arg14[%c5_85, %c0_86, %c0_87] : memref<8x2x64xf32, #tpu.memory_space<vmem>>, vector<1x2x64xf32>
    %228 = vector.shape_cast %227 : vector<1x2x64xf32> to vector<2x64xf32>
    %229 = vector.shape_cast %226 : vector<2x64xf32> to vector<1x2x64xf32>
    tpu.vector_store %arg14[%c5_85, %c0_86, %c0_87], %229 {strides = array<i32>} : memref<8x2x64xf32, #tpu.memory_space<vmem>>, vector<1x2x64xf32>,
    %c6_88 = arith.constant 6 : index
    %c0_89 = arith.constant 0 : index
    %c0_90 = arith.constant 0 : index
    %230 = vector.load %arg12[%c6_88, %c0_89, %c0_90] : memref<8x2x256xf32, #tpu.memory_space<vmem>>, vector<1x2x256xf32>
    %231 = vector.shape_cast %230 : vector<1x2x256xf32> to vector<2x256xf32>
    %c1_91 = arith.constant 1 : index
    %c0_92 = arith.constant 0 : index
    %c0_93 = arith.constant 0 : index
    %232 = vector.load %arg13[%c1_91, %c0_92, %c0_93] : memref<8x2x256xf32, #tpu.memory_space<vmem>>, vector<1x2x256xf32>
    %233 = vector.shape_cast %232 : vector<1x2x256xf32> to vector<2x256xf32>
    %234 = arith.addf %231, %233 : vector<2x256xf32>
    %cst_94 = arith.constant dense<0.000000e+00> : vector<2x256xf32>
    %235 = tpu.matmul %226, %17, %cst_94 {dimension_numbers = #tpu.dot_dimension_numbers<[1], [0], [0], [1], [0, 0, 1, 1], [], []>} : vector<2x64xf32>, vector<64x256xf32>, vector<2x256xf32> -> vector<2x256xf32>
    %236 = arith.addf %234, %235 : vector<2x256xf32>
    %237 = vector.extract_strided_slice %236 {offsets = [0, 0], sizes = [2, 64], strides = [1, 1]} : vector<2x256xf32> to vector<2x64xf32>
    %238 = arith.negf %237 : vector<2x64xf32>
    %239 = math.exp %238 : vector<2x64xf32>
    %cst_95 = arith.constant 1.000000e+00 : f32
    %240 = vector.broadcast %cst_95 : f32 to vector<2x64xf32>
    %241 = arith.addf %240, %239 : vector<2x64xf32>
    %242 = arith.divf %240, %241 : vector<2x64xf32>
    %243 = vector.extract_strided_slice %236 {offsets = [0, 64], sizes = [2, 64], strides = [1, 1]} : vector<2x256xf32> to vector<2x64xf32>
    %244 = arith.negf %243 : vector<2x64xf32>
    %245 = math.exp %244 : vector<2x64xf32>
    %cst_96 = arith.constant 1.000000e+00 : f32
    %246 = vector.broadcast %cst_96 : f32 to vector<2x64xf32>
    %247 = arith.addf %246, %245 : vector<2x64xf32>
    %248 = arith.divf %246, %247 : vector<2x64xf32>
    %249 = vector.extract_strided_slice %236 {offsets = [0, 128], sizes = [2, 64], strides = [1, 1]} : vector<2x256xf32> to vector<2x64xf32>
    %250 = math.tanh %249 : vector<2x64xf32>
    %251 = vector.extract_strided_slice %236 {offsets = [0, 192], sizes = [2, 64], strides = [1, 1]} : vector<2x256xf32> to vector<2x64xf32>
    %252 = arith.negf %251 : vector<2x64xf32>
    %253 = math.exp %252 : vector<2x64xf32>
    %cst_97 = arith.constant 1.000000e+00 : f32
    %254 = vector.broadcast %cst_97 : f32 to vector<2x64xf32>
    %255 = arith.addf %254, %253 : vector<2x64xf32>
    %256 = arith.divf %254, %255 : vector<2x64xf32>
    %257 = arith.mulf %248, %224 : vector<2x64xf32>
    %258 = arith.mulf %242, %250 : vector<2x64xf32>
    %259 = arith.addf %257, %258 : vector<2x64xf32>
    %260 = math.tanh %259 : vector<2x64xf32>
    %261 = arith.mulf %256, %260 : vector<2x64xf32>
    %c6_98 = arith.constant 6 : index
    %c0_99 = arith.constant 0 : index
    %c0_100 = arith.constant 0 : index
    %262 = vector.load %arg14[%c6_98, %c0_99, %c0_100] : memref<8x2x64xf32, #tpu.memory_space<vmem>>, vector<1x2x64xf32>
    %263 = vector.shape_cast %262 : vector<1x2x64xf32> to vector<2x64xf32>
    %264 = vector.shape_cast %261 : vector<2x64xf32> to vector<1x2x64xf32>
    tpu.vector_store %arg14[%c6_98, %c0_99, %c0_100], %264 {strides = array<i32>} : memref<8x2x64xf32, #tpu.memory_space<vmem>>, vector<1x2x64xf32>,
    %c7_101 = arith.constant 7 : index
    %c0_102 = arith.constant 0 : index
    %c0_103 = arith.constant 0 : index
    %265 = vector.load %arg12[%c7_101, %c0_102, %c0_103] : memref<8x2x256xf32, #tpu.memory_space<vmem>>, vector<1x2x256xf32>
    %266 = vector.shape_cast %265 : vector<1x2x256xf32> to vector<2x256xf32>
    %c0_104 = arith.constant 0 : index
    %c0_105 = arith.constant 0 : index
    %c0_106 = arith.constant 0 : index
    %267 = vector.load %arg13[%c0_104, %c0_105, %c0_106] : memref<8x2x256xf32, #tpu.memory_space<vmem>>, vector<1x2x256xf32>
    %268 = vector.shape_cast %267 : vector<1x2x256xf32> to vector<2x256xf32>
    %269 = arith.addf %266, %268 : vector<2x256xf32>
    %cst_107 = arith.constant dense<0.000000e+00> : vector<2x256xf32>
    %270 = tpu.matmul %261, %17, %cst_107 {dimension_numbers = #tpu.dot_dimension_numbers<[1], [0], [0], [1], [0, 0, 1, 1], [], []>} : vector<2x64xf32>, vector<64x256xf32>, vector<2x256xf32> -> vector<2x256xf32>
    %271 = arith.addf %269, %270 : vector<2x256xf32>
    %272 = vector.extract_strided_slice %271 {offsets = [0, 0], sizes = [2, 64], strides = [1, 1]} : vector<2x256xf32> to vector<2x64xf32>
    %273 = arith.negf %272 : vector<2x64xf32>
    %274 = math.exp %273 : vector<2x64xf32>
    %cst_108 = arith.constant 1.000000e+00 : f32
    %275 = vector.broadcast %cst_108 : f32 to vector<2x64xf32>
    %276 = arith.addf %275, %274 : vector<2x64xf32>
    %277 = arith.divf %275, %276 : vector<2x64xf32>
    %278 = vector.extract_strided_slice %271 {offsets = [0, 64], sizes = [2, 64], strides = [1, 1]} : vector<2x256xf32> to vector<2x64xf32>
    %279 = arith.negf %278 : vector<2x64xf32>
    %280 = math.exp %279 : vector<2x64xf32>
    %cst_109 = arith.constant 1.000000e+00 : f32
    %281 = vector.broadcast %cst_109 : f32 to vector<2x64xf32>
    %282 = arith.addf %281, %280 : vector<2x64xf32>
    %283 = arith.divf %281, %282 : vector<2x64xf32>
    %284 = vector.extract_strided_slice %271 {offsets = [0, 128], sizes = [2, 64], strides = [1, 1]} : vector<2x256xf32> to vector<2x64xf32>
    %285 = math.tanh %284 : vector<2x64xf32>
    %286 = vector.extract_strided_slice %271 {offsets = [0, 192], sizes = [2, 64], strides = [1, 1]} : vector<2x256xf32> to vector<2x64xf32>
    %287 = arith.negf %286 : vector<2x64xf32>
    %288 = math.exp %287 : vector<2x64xf32>
    %cst_110 = arith.constant 1.000000e+00 : f32
    %289 = vector.broadcast %cst_110 : f32 to vector<2x64xf32>
    %290 = arith.addf %289, %288 : vector<2x64xf32>
    %291 = arith.divf %289, %290 : vector<2x64xf32>
    %292 = arith.mulf %283, %259 : vector<2x64xf32>
    %293 = arith.mulf %277, %285 : vector<2x64xf32>
    %294 = arith.addf %292, %293 : vector<2x64xf32>
    %295 = math.tanh %294 : vector<2x64xf32>
    %296 = arith.mulf %291, %295 : vector<2x64xf32>
    %c7_111 = arith.constant 7 : index
    %c0_112 = arith.constant 0 : index
    %c0_113 = arith.constant 0 : index
    %297 = vector.load %arg14[%c7_111, %c0_112, %c0_113] : memref<8x2x64xf32, #tpu.memory_space<vmem>>, vector<1x2x64xf32>
    %298 = vector.shape_cast %297 : vector<1x2x64xf32> to vector<2x64xf32>
    %299 = vector.shape_cast %296 : vector<2x64xf32> to vector<1x2x64xf32>
    tpu.vector_store %arg14[%c7_111, %c0_112, %c0_113], %299 {strides = array<i32>} : memref<8x2x64xf32, #tpu.memory_space<vmem>>, vector<1x2x64xf32>,
    %c0_114 = arith.constant 0 : index
    %c0_115 = arith.constant 0 : index
    %300 = vector.load %arg5[%c0_114, %c0_115] : memref<64x256xf32, #tpu.memory_space<vmem>>, vector<64x256xf32>
    %c0_116 = arith.constant 0 : index
    %c0_117 = arith.constant 0 : index
    %301 = vector.load %arg6[%c0_116, %c0_117] : memref<64x256xf32, #tpu.memory_space<vmem>>, vector<64x256xf32>
    %c0_118 = arith.constant 0 : index
    %c0_119 = arith.constant 0 : index
    %302 = vector.load %arg7[%c0_118, %c0_119] : memref<1x256xf32, #tpu.memory_space<vmem>>, vector<1x256xf32>
    %c0_120 = arith.constant 0 : index
    %c0_121 = arith.constant 0 : index
    %c0_122 = arith.constant 0 : index
    %303 = vector.load %arg14[%c0_120, %c0_121, %c0_122] : memref<8x2x64xf32, #tpu.memory_space<vmem>>, vector<1x2x64xf32>
    %304 = vector.shape_cast %303 : vector<1x2x64xf32> to vector<2x64xf32>
    %cst_123 = arith.constant dense<0.000000e+00> : vector<2x256xf32>
    %305 = tpu.matmul %304, %300, %cst_123 {dimension_numbers = #tpu.dot_dimension_numbers<[1], [0], [0], [1], [0, 0, 1, 1], [], []>} : vector<2x64xf32>, vector<64x256xf32>, vector<2x256xf32> -> vector<2x256xf32>
    %306 = vector.broadcast %302 : vector<1x256xf32> to vector<2x256xf32>
    %307 = arith.addf %305, %306 : vector<2x256xf32>
    %c0_124 = arith.constant 0 : index
    %c0_125 = arith.constant 0 : index
    %c0_126 = arith.constant 0 : index
    %308 = vector.load %arg12[%c0_124, %c0_125, %c0_126] : memref<8x2x256xf32, #tpu.memory_space<vmem>>, vector<1x2x256xf32>
    %309 = vector.shape_cast %308 : vector<1x2x256xf32> to vector<2x256xf32>
    %310 = vector.shape_cast %307 : vector<2x256xf32> to vector<1x2x256xf32>
    tpu.vector_store %arg12[%c0_124, %c0_125, %c0_126], %310 {strides = array<i32>} : memref<8x2x256xf32, #tpu.memory_space<vmem>>, vector<1x2x256xf32>,
    %cst_127 = arith.constant dense<0.000000e+00> : vector<2x256xf32>
    %311 = tpu.matmul %304, %301, %cst_127 {dimension_numbers = #tpu.dot_dimension_numbers<[1], [0], [0], [1], [0, 0, 1, 1], [], []>} : vector<2x64xf32>, vector<64x256xf32>, vector<2x256xf32> -> vector<2x256xf32>
    %c0_128 = arith.constant 0 : index
    %c0_129 = arith.constant 0 : index
    %c0_130 = arith.constant 0 : index
    %312 = vector.load %arg13[%c0_128, %c0_129, %c0_130] : memref<8x2x256xf32, #tpu.memory_space<vmem>>, vector<1x2x256xf32>
    %313 = vector.shape_cast %312 : vector<1x2x256xf32> to vector<2x256xf32>
    %314 = vector.shape_cast %311 : vector<2x256xf32> to vector<1x2x256xf32>
    tpu.vector_store %arg13[%c0_128, %c0_129, %c0_130], %314 {strides = array<i32>} : memref<8x2x256xf32, #tpu.memory_space<vmem>>, vector<1x2x256xf32>,
    %c1_131 = arith.constant 1 : index
    %c0_132 = arith.constant 0 : index
    %c0_133 = arith.constant 0 : index
    %315 = vector.load %arg14[%c1_131, %c0_132, %c0_133] : memref<8x2x64xf32, #tpu.memory_space<vmem>>, vector<1x2x64xf32>
    %316 = vector.shape_cast %315 : vector<1x2x64xf32> to vector<2x64xf32>
    %cst_134 = arith.constant dense<0.000000e+00> : vector<2x256xf32>
    %317 = tpu.matmul %316, %300, %cst_134 {dimension_numbers = #tpu.dot_dimension_numbers<[1], [0], [0], [1], [0, 0, 1, 1], [], []>} : vector<2x64xf32>, vector<64x256xf32>, vector<2x256xf32> -> vector<2x256xf32>
    %318 = vector.broadcast %302 : vector<1x256xf32> to vector<2x256xf32>
    %319 = arith.addf %317, %318 : vector<2x256xf32>
    %c1_135 = arith.constant 1 : index
    %c0_136 = arith.constant 0 : index
    %c0_137 = arith.constant 0 : index
    %320 = vector.load %arg12[%c1_135, %c0_136, %c0_137] : memref<8x2x256xf32, #tpu.memory_space<vmem>>, vector<1x2x256xf32>
    %321 = vector.shape_cast %320 : vector<1x2x256xf32> to vector<2x256xf32>
    %322 = vector.shape_cast %319 : vector<2x256xf32> to vector<1x2x256xf32>
    tpu.vector_store %arg12[%c1_135, %c0_136, %c0_137], %322 {strides = array<i32>} : memref<8x2x256xf32, #tpu.memory_space<vmem>>, vector<1x2x256xf32>,
    %cst_138 = arith.constant dense<0.000000e+00> : vector<2x256xf32>
    %323 = tpu.matmul %316, %301, %cst_138 {dimension_numbers = #tpu.dot_dimension_numbers<[1], [0], [0], [1], [0, 0, 1, 1], [], []>} : vector<2x64xf32>, vector<64x256xf32>, vector<2x256xf32> -> vector<2x256xf32>
    %c1_139 = arith.constant 1 : index
    %c0_140 = arith.constant 0 : index
    %c0_141 = arith.constant 0 : index
    %324 = vector.load %arg13[%c1_139, %c0_140, %c0_141] : memref<8x2x256xf32, #tpu.memory_space<vmem>>, vector<1x2x256xf32>
    %325 = vector.shape_cast %324 : vector<1x2x256xf32> to vector<2x256xf32>
    %326 = vector.shape_cast %323 : vector<2x256xf32> to vector<1x2x256xf32>
    tpu.vector_store %arg13[%c1_139, %c0_140, %c0_141], %326 {strides = array<i32>} : memref<8x2x256xf32, #tpu.memory_space<vmem>>, vector<1x2x256xf32>,
    %c2_142 = arith.constant 2 : index
    %c0_143 = arith.constant 0 : index
    %c0_144 = arith.constant 0 : index
    %327 = vector.load %arg14[%c2_142, %c0_143, %c0_144] : memref<8x2x64xf32, #tpu.memory_space<vmem>>, vector<1x2x64xf32>
    %328 = vector.shape_cast %327 : vector<1x2x64xf32> to vector<2x64xf32>
    %cst_145 = arith.constant dense<0.000000e+00> : vector<2x256xf32>
    %329 = tpu.matmul %328, %300, %cst_145 {dimension_numbers = #tpu.dot_dimension_numbers<[1], [0], [0], [1], [0, 0, 1, 1], [], []>} : vector<2x64xf32>, vector<64x256xf32>, vector<2x256xf32> -> vector<2x256xf32>
    %330 = vector.broadcast %302 : vector<1x256xf32> to vector<2x256xf32>
    %331 = arith.addf %329, %330 : vector<2x256xf32>
    %c2_146 = arith.constant 2 : index
    %c0_147 = arith.constant 0 : index
    %c0_148 = arith.constant 0 : index
    %332 = vector.load %arg12[%c2_146, %c0_147, %c0_148] : memref<8x2x256xf32, #tpu.memory_space<vmem>>, vector<1x2x256xf32>
    %333 = vector.shape_cast %332 : vector<1x2x256xf32> to vector<2x256xf32>
    %334 = vector.shape_cast %331 : vector<2x256xf32> to vector<1x2x256xf32>
    tpu.vector_store %arg12[%c2_146, %c0_147, %c0_148], %334 {strides = array<i32>} : memref<8x2x256xf32, #tpu.memory_space<vmem>>, vector<1x2x256xf32>,
    %cst_149 = arith.constant dense<0.000000e+00> : vector<2x256xf32>
    %335 = tpu.matmul %328, %301, %cst_149 {dimension_numbers = #tpu.dot_dimension_numbers<[1], [0], [0], [1], [0, 0, 1, 1], [], []>} : vector<2x64xf32>, vector<64x256xf32>, vector<2x256xf32> -> vector<2x256xf32>
    %c2_150 = arith.constant 2 : index
    %c0_151 = arith.constant 0 : index
    %c0_152 = arith.constant 0 : index
    %336 = vector.load %arg13[%c2_150, %c0_151, %c0_152] : memref<8x2x256xf32, #tpu.memory_space<vmem>>, vector<1x2x256xf32>
    %337 = vector.shape_cast %336 : vector<1x2x256xf32> to vector<2x256xf32>
    %338 = vector.shape_cast %335 : vector<2x256xf32> to vector<1x2x256xf32>
    tpu.vector_store %arg13[%c2_150, %c0_151, %c0_152], %338 {strides = array<i32>} : memref<8x2x256xf32, #tpu.memory_space<vmem>>, vector<1x2x256xf32>,
    %c3_153 = arith.constant 3 : index
    %c0_154 = arith.constant 0 : index
    %c0_155 = arith.constant 0 : index
    %339 = vector.load %arg14[%c3_153, %c0_154, %c0_155] : memref<8x2x64xf32, #tpu.memory_space<vmem>>, vector<1x2x64xf32>
    %340 = vector.shape_cast %339 : vector<1x2x64xf32> to vector<2x64xf32>
    %cst_156 = arith.constant dense<0.000000e+00> : vector<2x256xf32>
    %341 = tpu.matmul %340, %300, %cst_156 {dimension_numbers = #tpu.dot_dimension_numbers<[1], [0], [0], [1], [0, 0, 1, 1], [], []>} : vector<2x64xf32>, vector<64x256xf32>, vector<2x256xf32> -> vector<2x256xf32>
    %342 = vector.broadcast %302 : vector<1x256xf32> to vector<2x256xf32>
    %343 = arith.addf %341, %342 : vector<2x256xf32>
    %c3_157 = arith.constant 3 : index
    %c0_158 = arith.constant 0 : index
    %c0_159 = arith.constant 0 : index
    %344 = vector.load %arg12[%c3_157, %c0_158, %c0_159] : memref<8x2x256xf32, #tpu.memory_space<vmem>>, vector<1x2x256xf32>
    %345 = vector.shape_cast %344 : vector<1x2x256xf32> to vector<2x256xf32>
    %346 = vector.shape_cast %343 : vector<2x256xf32> to vector<1x2x256xf32>
    tpu.vector_store %arg12[%c3_157, %c0_158, %c0_159], %346 {strides = array<i32>} : memref<8x2x256xf32, #tpu.memory_space<vmem>>, vector<1x2x256xf32>,
    %cst_160 = arith.constant dense<0.000000e+00> : vector<2x256xf32>
    %347 = tpu.matmul %340, %301, %cst_160 {dimension_numbers = #tpu.dot_dimension_numbers<[1], [0], [0], [1], [0, 0, 1, 1], [], []>} : vector<2x64xf32>, vector<64x256xf32>, vector<2x256xf32> -> vector<2x256xf32>
    %c3_161 = arith.constant 3 : index
    %c0_162 = arith.constant 0 : index
    %c0_163 = arith.constant 0 : index
    %348 = vector.load %arg13[%c3_161, %c0_162, %c0_163] : memref<8x2x256xf32, #tpu.memory_space<vmem>>, vector<1x2x256xf32>
    %349 = vector.shape_cast %348 : vector<1x2x256xf32> to vector<2x256xf32>
    %350 = vector.shape_cast %347 : vector<2x256xf32> to vector<1x2x256xf32>
    tpu.vector_store %arg13[%c3_161, %c0_162, %c0_163], %350 {strides = array<i32>} : memref<8x2x256xf32, #tpu.memory_space<vmem>>, vector<1x2x256xf32>,
    %c4_164 = arith.constant 4 : index
    %c0_165 = arith.constant 0 : index
    %c0_166 = arith.constant 0 : index
    %351 = vector.load %arg14[%c4_164, %c0_165, %c0_166] : memref<8x2x64xf32, #tpu.memory_space<vmem>>, vector<1x2x64xf32>
    %352 = vector.shape_cast %351 : vector<1x2x64xf32> to vector<2x64xf32>
    %cst_167 = arith.constant dense<0.000000e+00> : vector<2x256xf32>
    %353 = tpu.matmul %352, %300, %cst_167 {dimension_numbers = #tpu.dot_dimension_numbers<[1], [0], [0], [1], [0, 0, 1, 1], [], []>} : vector<2x64xf32>, vector<64x256xf32>, vector<2x256xf32> -> vector<2x256xf32>
    %354 = vector.broadcast %302 : vector<1x256xf32> to vector<2x256xf32>
    %355 = arith.addf %353, %354 : vector<2x256xf32>
    %c4_168 = arith.constant 4 : index
    %c0_169 = arith.constant 0 : index
    %c0_170 = arith.constant 0 : index
    %356 = vector.load %arg12[%c4_168, %c0_169, %c0_170] : memref<8x2x256xf32, #tpu.memory_space<vmem>>, vector<1x2x256xf32>
    %357 = vector.shape_cast %356 : vector<1x2x256xf32> to vector<2x256xf32>
    %358 = vector.shape_cast %355 : vector<2x256xf32> to vector<1x2x256xf32>
    tpu.vector_store %arg12[%c4_168, %c0_169, %c0_170], %358 {strides = array<i32>} : memref<8x2x256xf32, #tpu.memory_space<vmem>>, vector<1x2x256xf32>,
    %cst_171 = arith.constant dense<0.000000e+00> : vector<2x256xf32>
    %359 = tpu.matmul %352, %301, %cst_171 {dimension_numbers = #tpu.dot_dimension_numbers<[1], [0], [0], [1], [0, 0, 1, 1], [], []>} : vector<2x64xf32>, vector<64x256xf32>, vector<2x256xf32> -> vector<2x256xf32>
    %c4_172 = arith.constant 4 : index
    %c0_173 = arith.constant 0 : index
    %c0_174 = arith.constant 0 : index
    %360 = vector.load %arg13[%c4_172, %c0_173, %c0_174] : memref<8x2x256xf32, #tpu.memory_space<vmem>>, vector<1x2x256xf32>
    %361 = vector.shape_cast %360 : vector<1x2x256xf32> to vector<2x256xf32>
    %362 = vector.shape_cast %359 : vector<2x256xf32> to vector<1x2x256xf32>
    tpu.vector_store %arg13[%c4_172, %c0_173, %c0_174], %362 {strides = array<i32>} : memref<8x2x256xf32, #tpu.memory_space<vmem>>, vector<1x2x256xf32>,
    %c5_175 = arith.constant 5 : index
    %c0_176 = arith.constant 0 : index
    %c0_177 = arith.constant 0 : index
    %363 = vector.load %arg14[%c5_175, %c0_176, %c0_177] : memref<8x2x64xf32, #tpu.memory_space<vmem>>, vector<1x2x64xf32>
    %364 = vector.shape_cast %363 : vector<1x2x64xf32> to vector<2x64xf32>
    %cst_178 = arith.constant dense<0.000000e+00> : vector<2x256xf32>
    %365 = tpu.matmul %364, %300, %cst_178 {dimension_numbers = #tpu.dot_dimension_numbers<[1], [0], [0], [1], [0, 0, 1, 1], [], []>} : vector<2x64xf32>, vector<64x256xf32>, vector<2x256xf32> -> vector<2x256xf32>
    %366 = vector.broadcast %302 : vector<1x256xf32> to vector<2x256xf32>
    %367 = arith.addf %365, %366 : vector<2x256xf32>
    %c5_179 = arith.constant 5 : index
    %c0_180 = arith.constant 0 : index
    %c0_181 = arith.constant 0 : index
    %368 = vector.load %arg12[%c5_179, %c0_180, %c0_181] : memref<8x2x256xf32, #tpu.memory_space<vmem>>, vector<1x2x256xf32>
    %369 = vector.shape_cast %368 : vector<1x2x256xf32> to vector<2x256xf32>
    %370 = vector.shape_cast %367 : vector<2x256xf32> to vector<1x2x256xf32>
    tpu.vector_store %arg12[%c5_179, %c0_180, %c0_181], %370 {strides = array<i32>} : memref<8x2x256xf32, #tpu.memory_space<vmem>>, vector<1x2x256xf32>,
    %cst_182 = arith.constant dense<0.000000e+00> : vector<2x256xf32>
    %371 = tpu.matmul %364, %301, %cst_182 {dimension_numbers = #tpu.dot_dimension_numbers<[1], [0], [0], [1], [0, 0, 1, 1], [], []>} : vector<2x64xf32>, vector<64x256xf32>, vector<2x256xf32> -> vector<2x256xf32>
    %c5_183 = arith.constant 5 : index
    %c0_184 = arith.constant 0 : index
    %c0_185 = arith.constant 0 : index
    %372 = vector.load %arg13[%c5_183, %c0_184, %c0_185] : memref<8x2x256xf32, #tpu.memory_space<vmem>>, vector<1x2x256xf32>
    %373 = vector.shape_cast %372 : vector<1x2x256xf32> to vector<2x256xf32>
    %374 = vector.shape_cast %371 : vector<2x256xf32> to vector<1x2x256xf32>
    tpu.vector_store %arg13[%c5_183, %c0_184, %c0_185], %374 {strides = array<i32>} : memref<8x2x256xf32, #tpu.memory_space<vmem>>, vector<1x2x256xf32>,
    %c6_186 = arith.constant 6 : index
    %c0_187 = arith.constant 0 : index
    %c0_188 = arith.constant 0 : index
    %375 = vector.load %arg14[%c6_186, %c0_187, %c0_188] : memref<8x2x64xf32, #tpu.memory_space<vmem>>, vector<1x2x64xf32>
    %376 = vector.shape_cast %375 : vector<1x2x64xf32> to vector<2x64xf32>
    %cst_189 = arith.constant dense<0.000000e+00> : vector<2x256xf32>
    %377 = tpu.matmul %376, %300, %cst_189 {dimension_numbers = #tpu.dot_dimension_numbers<[1], [0], [0], [1], [0, 0, 1, 1], [], []>} : vector<2x64xf32>, vector<64x256xf32>, vector<2x256xf32> -> vector<2x256xf32>
    %378 = vector.broadcast %302 : vector<1x256xf32> to vector<2x256xf32>
    %379 = arith.addf %377, %378 : vector<2x256xf32>
    %c6_190 = arith.constant 6 : index
    %c0_191 = arith.constant 0 : index
    %c0_192 = arith.constant 0 : index
    %380 = vector.load %arg12[%c6_190, %c0_191, %c0_192] : memref<8x2x256xf32, #tpu.memory_space<vmem>>, vector<1x2x256xf32>
    %381 = vector.shape_cast %380 : vector<1x2x256xf32> to vector<2x256xf32>
    %382 = vector.shape_cast %379 : vector<2x256xf32> to vector<1x2x256xf32>
    tpu.vector_store %arg12[%c6_190, %c0_191, %c0_192], %382 {strides = array<i32>} : memref<8x2x256xf32, #tpu.memory_space<vmem>>, vector<1x2x256xf32>,
    %cst_193 = arith.constant dense<0.000000e+00> : vector<2x256xf32>
    %383 = tpu.matmul %376, %301, %cst_193 {dimension_numbers = #tpu.dot_dimension_numbers<[1], [0], [0], [1], [0, 0, 1, 1], [], []>} : vector<2x64xf32>, vector<64x256xf32>, vector<2x256xf32> -> vector<2x256xf32>
    %c6_194 = arith.constant 6 : index
    %c0_195 = arith.constant 0 : index
    %c0_196 = arith.constant 0 : index
    %384 = vector.load %arg13[%c6_194, %c0_195, %c0_196] : memref<8x2x256xf32, #tpu.memory_space<vmem>>, vector<1x2x256xf32>
    %385 = vector.shape_cast %384 : vector<1x2x256xf32> to vector<2x256xf32>
    %386 = vector.shape_cast %383 : vector<2x256xf32> to vector<1x2x256xf32>
    tpu.vector_store %arg13[%c6_194, %c0_195, %c0_196], %386 {strides = array<i32>} : memref<8x2x256xf32, #tpu.memory_space<vmem>>, vector<1x2x256xf32>,
    %c7_197 = arith.constant 7 : index
    %c0_198 = arith.constant 0 : index
    %c0_199 = arith.constant 0 : index
    %387 = vector.load %arg14[%c7_197, %c0_198, %c0_199] : memref<8x2x64xf32, #tpu.memory_space<vmem>>, vector<1x2x64xf32>
    %388 = vector.shape_cast %387 : vector<1x2x64xf32> to vector<2x64xf32>
    %cst_200 = arith.constant dense<0.000000e+00> : vector<2x256xf32>
    %389 = tpu.matmul %388, %300, %cst_200 {dimension_numbers = #tpu.dot_dimension_numbers<[1], [0], [0], [1], [0, 0, 1, 1], [], []>} : vector<2x64xf32>, vector<64x256xf32>, vector<2x256xf32> -> vector<2x256xf32>
    %390 = vector.broadcast %302 : vector<1x256xf32> to vector<2x256xf32>
    %391 = arith.addf %389, %390 : vector<2x256xf32>
    %c7_201 = arith.constant 7 : index
    %c0_202 = arith.constant 0 : index
    %c0_203 = arith.constant 0 : index
    %392 = vector.load %arg12[%c7_201, %c0_202, %c0_203] : memref<8x2x256xf32, #tpu.memory_space<vmem>>, vector<1x2x256xf32>
    %393 = vector.shape_cast %392 : vector<1x2x256xf32> to vector<2x256xf32>
    %394 = vector.shape_cast %391 : vector<2x256xf32> to vector<1x2x256xf32>
    tpu.vector_store %arg12[%c7_201, %c0_202, %c0_203], %394 {strides = array<i32>} : memref<8x2x256xf32, #tpu.memory_space<vmem>>, vector<1x2x256xf32>,
    %cst_204 = arith.constant dense<0.000000e+00> : vector<2x256xf32>
    %395 = tpu.matmul %388, %301, %cst_204 {dimension_numbers = #tpu.dot_dimension_numbers<[1], [0], [0], [1], [0, 0, 1, 1], [], []>} : vector<2x64xf32>, vector<64x256xf32>, vector<2x256xf32> -> vector<2x256xf32>
    %c7_205 = arith.constant 7 : index
    %c0_206 = arith.constant 0 : index
    %c0_207 = arith.constant 0 : index
    %396 = vector.load %arg13[%c7_205, %c0_206, %c0_207] : memref<8x2x256xf32, #tpu.memory_space<vmem>>, vector<1x2x256xf32>
    %397 = vector.shape_cast %396 : vector<1x2x256xf32> to vector<2x256xf32>
    %398 = vector.shape_cast %395 : vector<2x256xf32> to vector<1x2x256xf32>
    tpu.vector_store %arg13[%c7_205, %c0_206, %c0_207], %398 {strides = array<i32>} : memref<8x2x256xf32, #tpu.memory_space<vmem>>, vector<1x2x256xf32>,
    %c0_208 = arith.constant 0 : index
    %c0_209 = arith.constant 0 : index
    %399 = vector.load %arg8[%c0_208, %c0_209] : memref<64x256xf32, #tpu.memory_space<vmem>>, vector<64x256xf32>
    %cst_210 = arith.constant 0.000000e+00 : f32
    %400 = vector.broadcast %cst_210 : f32 to vector<2x64xf32>
    %cst_211 = arith.constant 0.000000e+00 : f32
    %401 = vector.broadcast %cst_211 : f32 to vector<2x64xf32>
    %c0_212 = arith.constant 0 : index
    %c0_213 = arith.constant 0 : index
    %c0_214 = arith.constant 0 : index
    %402 = vector.load %arg12[%c0_212, %c0_213, %c0_214] : memref<8x2x256xf32, #tpu.memory_space<vmem>>, vector<1x2x256xf32>
    %403 = vector.shape_cast %402 : vector<1x2x256xf32> to vector<2x256xf32>
    %c7_215 = arith.constant 7 : index
    %c0_216 = arith.constant 0 : index
    %c0_217 = arith.constant 0 : index
    %404 = vector.load %arg13[%c7_215, %c0_216, %c0_217] : memref<8x2x256xf32, #tpu.memory_space<vmem>>, vector<1x2x256xf32>
    %405 = vector.shape_cast %404 : vector<1x2x256xf32> to vector<2x256xf32>
    %406 = arith.addf %403, %405 : vector<2x256xf32>
    %cst_218 = arith.constant dense<0.000000e+00> : vector<2x256xf32>
    %407 = tpu.matmul %400, %399, %cst_218 {dimension_numbers = #tpu.dot_dimension_numbers<[1], [0], [0], [1], [0, 0, 1, 1], [], []>} : vector<2x64xf32>, vector<64x256xf32>, vector<2x256xf32> -> vector<2x256xf32>
    %408 = arith.addf %406, %407 : vector<2x256xf32>
    %409 = vector.extract_strided_slice %408 {offsets = [0, 0], sizes = [2, 64], strides = [1, 1]} : vector<2x256xf32> to vector<2x64xf32>
    %410 = arith.negf %409 : vector<2x64xf32>
    %411 = math.exp %410 : vector<2x64xf32>
    %cst_219 = arith.constant 1.000000e+00 : f32
    %412 = vector.broadcast %cst_219 : f32 to vector<2x64xf32>
    %413 = arith.addf %412, %411 : vector<2x64xf32>
    %414 = arith.divf %412, %413 : vector<2x64xf32>
    %415 = vector.extract_strided_slice %408 {offsets = [0, 64], sizes = [2, 64], strides = [1, 1]} : vector<2x256xf32> to vector<2x64xf32>
    %416 = arith.negf %415 : vector<2x64xf32>
    %417 = math.exp %416 : vector<2x64xf32>
    %cst_220 = arith.constant 1.000000e+00 : f32
    %418 = vector.broadcast %cst_220 : f32 to vector<2x64xf32>
    %419 = arith.addf %418, %417 : vector<2x64xf32>
    %420 = arith.divf %418, %419 : vector<2x64xf32>
    %421 = vector.extract_strided_slice %408 {offsets = [0, 128], sizes = [2, 64], strides = [1, 1]} : vector<2x256xf32> to vector<2x64xf32>
    %422 = math.tanh %421 : vector<2x64xf32>
    %423 = vector.extract_strided_slice %408 {offsets = [0, 192], sizes = [2, 64], strides = [1, 1]} : vector<2x256xf32> to vector<2x64xf32>
    %424 = arith.negf %423 : vector<2x64xf32>
    %425 = math.exp %424 : vector<2x64xf32>
    %cst_221 = arith.constant 1.000000e+00 : f32
    %426 = vector.broadcast %cst_221 : f32 to vector<2x64xf32>
    %427 = arith.addf %426, %425 : vector<2x64xf32>
    %428 = arith.divf %426, %427 : vector<2x64xf32>
    %429 = arith.mulf %420, %401 : vector<2x64xf32>
    %430 = arith.mulf %414, %422 : vector<2x64xf32>
    %431 = arith.addf %429, %430 : vector<2x64xf32>
    %432 = math.tanh %431 : vector<2x64xf32>
    %433 = arith.mulf %428, %432 : vector<2x64xf32>
    %c0_222 = arith.constant 0 : index
    %c0_223 = arith.constant 0 : index
    %c0_224 = arith.constant 0 : index
    %434 = vector.load %arg15[%c0_222, %c0_223, %c0_224] : memref<8x2x64xf32, #tpu.memory_space<vmem>>, vector<1x2x64xf32>
    %435 = vector.shape_cast %434 : vector<1x2x64xf32> to vector<2x64xf32>
    %436 = vector.shape_cast %433 : vector<2x64xf32> to vector<1x2x64xf32>
    tpu.vector_store %arg15[%c0_222, %c0_223, %c0_224], %436 {strides = array<i32>} : memref<8x2x64xf32, #tpu.memory_space<vmem>>, vector<1x2x64xf32>,
    %c1_225 = arith.constant 1 : index
    %c0_226 = arith.constant 0 : index
    %c0_227 = arith.constant 0 : index
    %437 = vector.load %arg12[%c1_225, %c0_226, %c0_227] : memref<8x2x256xf32, #tpu.memory_space<vmem>>, vector<1x2x256xf32>
    %438 = vector.shape_cast %437 : vector<1x2x256xf32> to vector<2x256xf32>
    %c6_228 = arith.constant 6 : index
    %c0_229 = arith.constant 0 : index
    %c0_230 = arith.constant 0 : index
    %439 = vector.load %arg13[%c6_228, %c0_229, %c0_230] : memref<8x2x256xf32, #tpu.memory_space<vmem>>, vector<1x2x256xf32>
    %440 = vector.shape_cast %439 : vector<1x2x256xf32> to vector<2x256xf32>
    %441 = arith.addf %438, %440 : vector<2x256xf32>
    %cst_231 = arith.constant dense<0.000000e+00> : vector<2x256xf32>
    %442 = tpu.matmul %433, %399, %cst_231 {dimension_numbers = #tpu.dot_dimension_numbers<[1], [0], [0], [1], [0, 0, 1, 1], [], []>} : vector<2x64xf32>, vector<64x256xf32>, vector<2x256xf32> -> vector<2x256xf32>
    %443 = arith.addf %441, %442 : vector<2x256xf32>
    %444 = vector.extract_strided_slice %443 {offsets = [0, 0], sizes = [2, 64], strides = [1, 1]} : vector<2x256xf32> to vector<2x64xf32>
    %445 = arith.negf %444 : vector<2x64xf32>
    %446 = math.exp %445 : vector<2x64xf32>
    %cst_232 = arith.constant 1.000000e+00 : f32
    %447 = vector.broadcast %cst_232 : f32 to vector<2x64xf32>
    %448 = arith.addf %447, %446 : vector<2x64xf32>
    %449 = arith.divf %447, %448 : vector<2x64xf32>
    %450 = vector.extract_strided_slice %443 {offsets = [0, 64], sizes = [2, 64], strides = [1, 1]} : vector<2x256xf32> to vector<2x64xf32>
    %451 = arith.negf %450 : vector<2x64xf32>
    %452 = math.exp %451 : vector<2x64xf32>
    %cst_233 = arith.constant 1.000000e+00 : f32
    %453 = vector.broadcast %cst_233 : f32 to vector<2x64xf32>
    %454 = arith.addf %453, %452 : vector<2x64xf32>
    %455 = arith.divf %453, %454 : vector<2x64xf32>
    %456 = vector.extract_strided_slice %443 {offsets = [0, 128], sizes = [2, 64], strides = [1, 1]} : vector<2x256xf32> to vector<2x64xf32>
    %457 = math.tanh %456 : vector<2x64xf32>
    %458 = vector.extract_strided_slice %443 {offsets = [0, 192], sizes = [2, 64], strides = [1, 1]} : vector<2x256xf32> to vector<2x64xf32>
    %459 = arith.negf %458 : vector<2x64xf32>
    %460 = math.exp %459 : vector<2x64xf32>
    %cst_234 = arith.constant 1.000000e+00 : f32
    %461 = vector.broadcast %cst_234 : f32 to vector<2x64xf32>
    %462 = arith.addf %461, %460 : vector<2x64xf32>
    %463 = arith.divf %461, %462 : vector<2x64xf32>
    %464 = arith.mulf %455, %431 : vector<2x64xf32>
    %465 = arith.mulf %449, %457 : vector<2x64xf32>
    %466 = arith.addf %464, %465 : vector<2x64xf32>
    %467 = math.tanh %466 : vector<2x64xf32>
    %468 = arith.mulf %463, %467 : vector<2x64xf32>
    %c1_235 = arith.constant 1 : index
    %c0_236 = arith.constant 0 : index
    %c0_237 = arith.constant 0 : index
    %469 = vector.load %arg15[%c1_235, %c0_236, %c0_237] : memref<8x2x64xf32, #tpu.memory_space<vmem>>, vector<1x2x64xf32>
    %470 = vector.shape_cast %469 : vector<1x2x64xf32> to vector<2x64xf32>
    %471 = vector.shape_cast %468 : vector<2x64xf32> to vector<1x2x64xf32>
    tpu.vector_store %arg15[%c1_235, %c0_236, %c0_237], %471 {strides = array<i32>} : memref<8x2x64xf32, #tpu.memory_space<vmem>>, vector<1x2x64xf32>,
    %c2_238 = arith.constant 2 : index
    %c0_239 = arith.constant 0 : index
    %c0_240 = arith.constant 0 : index
    %472 = vector.load %arg12[%c2_238, %c0_239, %c0_240] : memref<8x2x256xf32, #tpu.memory_space<vmem>>, vector<1x2x256xf32>
    %473 = vector.shape_cast %472 : vector<1x2x256xf32> to vector<2x256xf32>
    %c5_241 = arith.constant 5 : index
    %c0_242 = arith.constant 0 : index
    %c0_243 = arith.constant 0 : index
    %474 = vector.load %arg13[%c5_241, %c0_242, %c0_243] : memref<8x2x256xf32, #tpu.memory_space<vmem>>, vector<1x2x256xf32>
    %475 = vector.shape_cast %474 : vector<1x2x256xf32> to vector<2x256xf32>
    %476 = arith.addf %473, %475 : vector<2x256xf32>
    %cst_244 = arith.constant dense<0.000000e+00> : vector<2x256xf32>
    %477 = tpu.matmul %468, %399, %cst_244 {dimension_numbers = #tpu.dot_dimension_numbers<[1], [0], [0], [1], [0, 0, 1, 1], [], []>} : vector<2x64xf32>, vector<64x256xf32>, vector<2x256xf32> -> vector<2x256xf32>
    %478 = arith.addf %476, %477 : vector<2x256xf32>
    %479 = vector.extract_strided_slice %478 {offsets = [0, 0], sizes = [2, 64], strides = [1, 1]} : vector<2x256xf32> to vector<2x64xf32>
    %480 = arith.negf %479 : vector<2x64xf32>
    %481 = math.exp %480 : vector<2x64xf32>
    %cst_245 = arith.constant 1.000000e+00 : f32
    %482 = vector.broadcast %cst_245 : f32 to vector<2x64xf32>
    %483 = arith.addf %482, %481 : vector<2x64xf32>
    %484 = arith.divf %482, %483 : vector<2x64xf32>
    %485 = vector.extract_strided_slice %478 {offsets = [0, 64], sizes = [2, 64], strides = [1, 1]} : vector<2x256xf32> to vector<2x64xf32>
    %486 = arith.negf %485 : vector<2x64xf32>
    %487 = math.exp %486 : vector<2x64xf32>
    %cst_246 = arith.constant 1.000000e+00 : f32
    %488 = vector.broadcast %cst_246 : f32 to vector<2x64xf32>
    %489 = arith.addf %488, %487 : vector<2x64xf32>
    %490 = arith.divf %488, %489 : vector<2x64xf32>
    %491 = vector.extract_strided_slice %478 {offsets = [0, 128], sizes = [2, 64], strides = [1, 1]} : vector<2x256xf32> to vector<2x64xf32>
    %492 = math.tanh %491 : vector<2x64xf32>
    %493 = vector.extract_strided_slice %478 {offsets = [0, 192], sizes = [2, 64], strides = [1, 1]} : vector<2x256xf32> to vector<2x64xf32>
    %494 = arith.negf %493 : vector<2x64xf32>
    %495 = math.exp %494 : vector<2x64xf32>
    %cst_247 = arith.constant 1.000000e+00 : f32
    %496 = vector.broadcast %cst_247 : f32 to vector<2x64xf32>
    %497 = arith.addf %496, %495 : vector<2x64xf32>
    %498 = arith.divf %496, %497 : vector<2x64xf32>
    %499 = arith.mulf %490, %466 : vector<2x64xf32>
    %500 = arith.mulf %484, %492 : vector<2x64xf32>
    %501 = arith.addf %499, %500 : vector<2x64xf32>
    %502 = math.tanh %501 : vector<2x64xf32>
    %503 = arith.mulf %498, %502 : vector<2x64xf32>
    %c2_248 = arith.constant 2 : index
    %c0_249 = arith.constant 0 : index
    %c0_250 = arith.constant 0 : index
    %504 = vector.load %arg15[%c2_248, %c0_249, %c0_250] : memref<8x2x64xf32, #tpu.memory_space<vmem>>, vector<1x2x64xf32>
    %505 = vector.shape_cast %504 : vector<1x2x64xf32> to vector<2x64xf32>
    %506 = vector.shape_cast %503 : vector<2x64xf32> to vector<1x2x64xf32>
    tpu.vector_store %arg15[%c2_248, %c0_249, %c0_250], %506 {strides = array<i32>} : memref<8x2x64xf32, #tpu.memory_space<vmem>>, vector<1x2x64xf32>,
    %c3_251 = arith.constant 3 : index
    %c0_252 = arith.constant 0 : index
    %c0_253 = arith.constant 0 : index
    %507 = vector.load %arg12[%c3_251, %c0_252, %c0_253] : memref<8x2x256xf32, #tpu.memory_space<vmem>>, vector<1x2x256xf32>
    %508 = vector.shape_cast %507 : vector<1x2x256xf32> to vector<2x256xf32>
    %c4_254 = arith.constant 4 : index
    %c0_255 = arith.constant 0 : index
    %c0_256 = arith.constant 0 : index
    %509 = vector.load %arg13[%c4_254, %c0_255, %c0_256] : memref<8x2x256xf32, #tpu.memory_space<vmem>>, vector<1x2x256xf32>
    %510 = vector.shape_cast %509 : vector<1x2x256xf32> to vector<2x256xf32>
    %511 = arith.addf %508, %510 : vector<2x256xf32>
    %cst_257 = arith.constant dense<0.000000e+00> : vector<2x256xf32>
    %512 = tpu.matmul %503, %399, %cst_257 {dimension_numbers = #tpu.dot_dimension_numbers<[1], [0], [0], [1], [0, 0, 1, 1], [], []>} : vector<2x64xf32>, vector<64x256xf32>, vector<2x256xf32> -> vector<2x256xf32>
    %513 = arith.addf %511, %512 : vector<2x256xf32>
    %514 = vector.extract_strided_slice %513 {offsets = [0, 0], sizes = [2, 64], strides = [1, 1]} : vector<2x256xf32> to vector<2x64xf32>
    %515 = arith.negf %514 : vector<2x64xf32>
    %516 = math.exp %515 : vector<2x64xf32>
    %cst_258 = arith.constant 1.000000e+00 : f32
    %517 = vector.broadcast %cst_258 : f32 to vector<2x64xf32>
    %518 = arith.addf %517, %516 : vector<2x64xf32>
    %519 = arith.divf %517, %518 : vector<2x64xf32>
    %520 = vector.extract_strided_slice %513 {offsets = [0, 64], sizes = [2, 64], strides = [1, 1]} : vector<2x256xf32> to vector<2x64xf32>
    %521 = arith.negf %520 : vector<2x64xf32>
    %522 = math.exp %521 : vector<2x64xf32>
    %cst_259 = arith.constant 1.000000e+00 : f32
    %523 = vector.broadcast %cst_259 : f32 to vector<2x64xf32>
    %524 = arith.addf %523, %522 : vector<2x64xf32>
    %525 = arith.divf %523, %524 : vector<2x64xf32>
    %526 = vector.extract_strided_slice %513 {offsets = [0, 128], sizes = [2, 64], strides = [1, 1]} : vector<2x256xf32> to vector<2x64xf32>
    %527 = math.tanh %526 : vector<2x64xf32>
    %528 = vector.extract_strided_slice %513 {offsets = [0, 192], sizes = [2, 64], strides = [1, 1]} : vector<2x256xf32> to vector<2x64xf32>
    %529 = arith.negf %528 : vector<2x64xf32>
    %530 = math.exp %529 : vector<2x64xf32>
    %cst_260 = arith.constant 1.000000e+00 : f32
    %531 = vector.broadcast %cst_260 : f32 to vector<2x64xf32>
    %532 = arith.addf %531, %530 : vector<2x64xf32>
    %533 = arith.divf %531, %532 : vector<2x64xf32>
    %534 = arith.mulf %525, %501 : vector<2x64xf32>
    %535 = arith.mulf %519, %527 : vector<2x64xf32>
    %536 = arith.addf %534, %535 : vector<2x64xf32>
    %537 = math.tanh %536 : vector<2x64xf32>
    %538 = arith.mulf %533, %537 : vector<2x64xf32>
    %c3_261 = arith.constant 3 : index
    %c0_262 = arith.constant 0 : index
    %c0_263 = arith.constant 0 : index
    %539 = vector.load %arg15[%c3_261, %c0_262, %c0_263] : memref<8x2x64xf32, #tpu.memory_space<vmem>>, vector<1x2x64xf32>
    %540 = vector.shape_cast %539 : vector<1x2x64xf32> to vector<2x64xf32>
    %541 = vector.shape_cast %538 : vector<2x64xf32> to vector<1x2x64xf32>
    tpu.vector_store %arg15[%c3_261, %c0_262, %c0_263], %541 {strides = array<i32>} : memref<8x2x64xf32, #tpu.memory_space<vmem>>, vector<1x2x64xf32>,
    %c4_264 = arith.constant 4 : index
    %c0_265 = arith.constant 0 : index
    %c0_266 = arith.constant 0 : index
    %542 = vector.load %arg12[%c4_264, %c0_265, %c0_266] : memref<8x2x256xf32, #tpu.memory_space<vmem>>, vector<1x2x256xf32>
    %543 = vector.shape_cast %542 : vector<1x2x256xf32> to vector<2x256xf32>
    %c3_267 = arith.constant 3 : index
    %c0_268 = arith.constant 0 : index
    %c0_269 = arith.constant 0 : index
    %544 = vector.load %arg13[%c3_267, %c0_268, %c0_269] : memref<8x2x256xf32, #tpu.memory_space<vmem>>, vector<1x2x256xf32>
    %545 = vector.shape_cast %544 : vector<1x2x256xf32> to vector<2x256xf32>
    %546 = arith.addf %543, %545 : vector<2x256xf32>
    %cst_270 = arith.constant dense<0.000000e+00> : vector<2x256xf32>
    %547 = tpu.matmul %538, %399, %cst_270 {dimension_numbers = #tpu.dot_dimension_numbers<[1], [0], [0], [1], [0, 0, 1, 1], [], []>} : vector<2x64xf32>, vector<64x256xf32>, vector<2x256xf32> -> vector<2x256xf32>
    %548 = arith.addf %546, %547 : vector<2x256xf32>
    %549 = vector.extract_strided_slice %548 {offsets = [0, 0], sizes = [2, 64], strides = [1, 1]} : vector<2x256xf32> to vector<2x64xf32>
    %550 = arith.negf %549 : vector<2x64xf32>
    %551 = math.exp %550 : vector<2x64xf32>
    %cst_271 = arith.constant 1.000000e+00 : f32
    %552 = vector.broadcast %cst_271 : f32 to vector<2x64xf32>
    %553 = arith.addf %552, %551 : vector<2x64xf32>
    %554 = arith.divf %552, %553 : vector<2x64xf32>
    %555 = vector.extract_strided_slice %548 {offsets = [0, 64], sizes = [2, 64], strides = [1, 1]} : vector<2x256xf32> to vector<2x64xf32>
    %556 = arith.negf %555 : vector<2x64xf32>
    %557 = math.exp %556 : vector<2x64xf32>
    %cst_272 = arith.constant 1.000000e+00 : f32
    %558 = vector.broadcast %cst_272 : f32 to vector<2x64xf32>
    %559 = arith.addf %558, %557 : vector<2x64xf32>
    %560 = arith.divf %558, %559 : vector<2x64xf32>
    %561 = vector.extract_strided_slice %548 {offsets = [0, 128], sizes = [2, 64], strides = [1, 1]} : vector<2x256xf32> to vector<2x64xf32>
    %562 = math.tanh %561 : vector<2x64xf32>
    %563 = vector.extract_strided_slice %548 {offsets = [0, 192], sizes = [2, 64], strides = [1, 1]} : vector<2x256xf32> to vector<2x64xf32>
    %564 = arith.negf %563 : vector<2x64xf32>
    %565 = math.exp %564 : vector<2x64xf32>
    %cst_273 = arith.constant 1.000000e+00 : f32
    %566 = vector.broadcast %cst_273 : f32 to vector<2x64xf32>
    %567 = arith.addf %566, %565 : vector<2x64xf32>
    %568 = arith.divf %566, %567 : vector<2x64xf32>
    %569 = arith.mulf %560, %536 : vector<2x64xf32>
    %570 = arith.mulf %554, %562 : vector<2x64xf32>
    %571 = arith.addf %569, %570 : vector<2x64xf32>
    %572 = math.tanh %571 : vector<2x64xf32>
    %573 = arith.mulf %568, %572 : vector<2x64xf32>
    %c4_274 = arith.constant 4 : index
    %c0_275 = arith.constant 0 : index
    %c0_276 = arith.constant 0 : index
    %574 = vector.load %arg15[%c4_274, %c0_275, %c0_276] : memref<8x2x64xf32, #tpu.memory_space<vmem>>, vector<1x2x64xf32>
    %575 = vector.shape_cast %574 : vector<1x2x64xf32> to vector<2x64xf32>
    %576 = vector.shape_cast %573 : vector<2x64xf32> to vector<1x2x64xf32>
    tpu.vector_store %arg15[%c4_274, %c0_275, %c0_276], %576 {strides = array<i32>} : memref<8x2x64xf32, #tpu.memory_space<vmem>>, vector<1x2x64xf32>,
    %c5_277 = arith.constant 5 : index
    %c0_278 = arith.constant 0 : index
    %c0_279 = arith.constant 0 : index
    %577 = vector.load %arg12[%c5_277, %c0_278, %c0_279] : memref<8x2x256xf32, #tpu.memory_space<vmem>>, vector<1x2x256xf32>
    %578 = vector.shape_cast %577 : vector<1x2x256xf32> to vector<2x256xf32>
    %c2_280 = arith.constant 2 : index
    %c0_281 = arith.constant 0 : index
    %c0_282 = arith.constant 0 : index
    %579 = vector.load %arg13[%c2_280, %c0_281, %c0_282] : memref<8x2x256xf32, #tpu.memory_space<vmem>>, vector<1x2x256xf32>
    %580 = vector.shape_cast %579 : vector<1x2x256xf32> to vector<2x256xf32>
    %581 = arith.addf %578, %580 : vector<2x256xf32>
    %cst_283 = arith.constant dense<0.000000e+00> : vector<2x256xf32>
    %582 = tpu.matmul %573, %399, %cst_283 {dimension_numbers = #tpu.dot_dimension_numbers<[1], [0], [0], [1], [0, 0, 1, 1], [], []>} : vector<2x64xf32>, vector<64x256xf32>, vector<2x256xf32> -> vector<2x256xf32>
    %583 = arith.addf %581, %582 : vector<2x256xf32>
    %584 = vector.extract_strided_slice %583 {offsets = [0, 0], sizes = [2, 64], strides = [1, 1]} : vector<2x256xf32> to vector<2x64xf32>
    %585 = arith.negf %584 : vector<2x64xf32>
    %586 = math.exp %585 : vector<2x64xf32>
    %cst_284 = arith.constant 1.000000e+00 : f32
    %587 = vector.broadcast %cst_284 : f32 to vector<2x64xf32>
    %588 = arith.addf %587, %586 : vector<2x64xf32>
    %589 = arith.divf %587, %588 : vector<2x64xf32>
    %590 = vector.extract_strided_slice %583 {offsets = [0, 64], sizes = [2, 64], strides = [1, 1]} : vector<2x256xf32> to vector<2x64xf32>
    %591 = arith.negf %590 : vector<2x64xf32>
    %592 = math.exp %591 : vector<2x64xf32>
    %cst_285 = arith.constant 1.000000e+00 : f32
    %593 = vector.broadcast %cst_285 : f32 to vector<2x64xf32>
    %594 = arith.addf %593, %592 : vector<2x64xf32>
    %595 = arith.divf %593, %594 : vector<2x64xf32>
    %596 = vector.extract_strided_slice %583 {offsets = [0, 128], sizes = [2, 64], strides = [1, 1]} : vector<2x256xf32> to vector<2x64xf32>
    %597 = math.tanh %596 : vector<2x64xf32>
    %598 = vector.extract_strided_slice %583 {offsets = [0, 192], sizes = [2, 64], strides = [1, 1]} : vector<2x256xf32> to vector<2x64xf32>
    %599 = arith.negf %598 : vector<2x64xf32>
    %600 = math.exp %599 : vector<2x64xf32>
    %cst_286 = arith.constant 1.000000e+00 : f32
    %601 = vector.broadcast %cst_286 : f32 to vector<2x64xf32>
    %602 = arith.addf %601, %600 : vector<2x64xf32>
    %603 = arith.divf %601, %602 : vector<2x64xf32>
    %604 = arith.mulf %595, %571 : vector<2x64xf32>
    %605 = arith.mulf %589, %597 : vector<2x64xf32>
    %606 = arith.addf %604, %605 : vector<2x64xf32>
    %607 = math.tanh %606 : vector<2x64xf32>
    %608 = arith.mulf %603, %607 : vector<2x64xf32>
    %c5_287 = arith.constant 5 : index
    %c0_288 = arith.constant 0 : index
    %c0_289 = arith.constant 0 : index
    %609 = vector.load %arg15[%c5_287, %c0_288, %c0_289] : memref<8x2x64xf32, #tpu.memory_space<vmem>>, vector<1x2x64xf32>
    %610 = vector.shape_cast %609 : vector<1x2x64xf32> to vector<2x64xf32>
    %611 = vector.shape_cast %608 : vector<2x64xf32> to vector<1x2x64xf32>
    tpu.vector_store %arg15[%c5_287, %c0_288, %c0_289], %611 {strides = array<i32>} : memref<8x2x64xf32, #tpu.memory_space<vmem>>, vector<1x2x64xf32>,
    %c6_290 = arith.constant 6 : index
    %c0_291 = arith.constant 0 : index
    %c0_292 = arith.constant 0 : index
    %612 = vector.load %arg12[%c6_290, %c0_291, %c0_292] : memref<8x2x256xf32, #tpu.memory_space<vmem>>, vector<1x2x256xf32>
    %613 = vector.shape_cast %612 : vector<1x2x256xf32> to vector<2x256xf32>
    %c1_293 = arith.constant 1 : index
    %c0_294 = arith.constant 0 : index
    %c0_295 = arith.constant 0 : index
    %614 = vector.load %arg13[%c1_293, %c0_294, %c0_295] : memref<8x2x256xf32, #tpu.memory_space<vmem>>, vector<1x2x256xf32>
    %615 = vector.shape_cast %614 : vector<1x2x256xf32> to vector<2x256xf32>
    %616 = arith.addf %613, %615 : vector<2x256xf32>
    %cst_296 = arith.constant dense<0.000000e+00> : vector<2x256xf32>
    %617 = tpu.matmul %608, %399, %cst_296 {dimension_numbers = #tpu.dot_dimension_numbers<[1], [0], [0], [1], [0, 0, 1, 1], [], []>} : vector<2x64xf32>, vector<64x256xf32>, vector<2x256xf32> -> vector<2x256xf32>
    %618 = arith.addf %616, %617 : vector<2x256xf32>
    %619 = vector.extract_strided_slice %618 {offsets = [0, 0], sizes = [2, 64], strides = [1, 1]} : vector<2x256xf32> to vector<2x64xf32>
    %620 = arith.negf %619 : vector<2x64xf32>
    %621 = math.exp %620 : vector<2x64xf32>
    %cst_297 = arith.constant 1.000000e+00 : f32
    %622 = vector.broadcast %cst_297 : f32 to vector<2x64xf32>
    %623 = arith.addf %622, %621 : vector<2x64xf32>
    %624 = arith.divf %622, %623 : vector<2x64xf32>
    %625 = vector.extract_strided_slice %618 {offsets = [0, 64], sizes = [2, 64], strides = [1, 1]} : vector<2x256xf32> to vector<2x64xf32>
    %626 = arith.negf %625 : vector<2x64xf32>
    %627 = math.exp %626 : vector<2x64xf32>
    %cst_298 = arith.constant 1.000000e+00 : f32
    %628 = vector.broadcast %cst_298 : f32 to vector<2x64xf32>
    %629 = arith.addf %628, %627 : vector<2x64xf32>
    %630 = arith.divf %628, %629 : vector<2x64xf32>
    %631 = vector.extract_strided_slice %618 {offsets = [0, 128], sizes = [2, 64], strides = [1, 1]} : vector<2x256xf32> to vector<2x64xf32>
    %632 = math.tanh %631 : vector<2x64xf32>
    %633 = vector.extract_strided_slice %618 {offsets = [0, 192], sizes = [2, 64], strides = [1, 1]} : vector<2x256xf32> to vector<2x64xf32>
    %634 = arith.negf %633 : vector<2x64xf32>
    %635 = math.exp %634 : vector<2x64xf32>
    %cst_299 = arith.constant 1.000000e+00 : f32
    %636 = vector.broadcast %cst_299 : f32 to vector<2x64xf32>
    %637 = arith.addf %636, %635 : vector<2x64xf32>
    %638 = arith.divf %636, %637 : vector<2x64xf32>
    %639 = arith.mulf %630, %606 : vector<2x64xf32>
    %640 = arith.mulf %624, %632 : vector<2x64xf32>
    %641 = arith.addf %639, %640 : vector<2x64xf32>
    %642 = math.tanh %641 : vector<2x64xf32>
    %643 = arith.mulf %638, %642 : vector<2x64xf32>
    %c6_300 = arith.constant 6 : index
    %c0_301 = arith.constant 0 : index
    %c0_302 = arith.constant 0 : index
    %644 = vector.load %arg15[%c6_300, %c0_301, %c0_302] : memref<8x2x64xf32, #tpu.memory_space<vmem>>, vector<1x2x64xf32>
    %645 = vector.shape_cast %644 : vector<1x2x64xf32> to vector<2x64xf32>
    %646 = vector.shape_cast %643 : vector<2x64xf32> to vector<1x2x64xf32>
    tpu.vector_store %arg15[%c6_300, %c0_301, %c0_302], %646 {strides = array<i32>} : memref<8x2x64xf32, #tpu.memory_space<vmem>>, vector<1x2x64xf32>,
    %c7_303 = arith.constant 7 : index
    %c0_304 = arith.constant 0 : index
    %c0_305 = arith.constant 0 : index
    %647 = vector.load %arg12[%c7_303, %c0_304, %c0_305] : memref<8x2x256xf32, #tpu.memory_space<vmem>>, vector<1x2x256xf32>
    %648 = vector.shape_cast %647 : vector<1x2x256xf32> to vector<2x256xf32>
    %c0_306 = arith.constant 0 : index
    %c0_307 = arith.constant 0 : index
    %c0_308 = arith.constant 0 : index
    %649 = vector.load %arg13[%c0_306, %c0_307, %c0_308] : memref<8x2x256xf32, #tpu.memory_space<vmem>>, vector<1x2x256xf32>
    %650 = vector.shape_cast %649 : vector<1x2x256xf32> to vector<2x256xf32>
    %651 = arith.addf %648, %650 : vector<2x256xf32>
    %cst_309 = arith.constant dense<0.000000e+00> : vector<2x256xf32>
    %652 = tpu.matmul %643, %399, %cst_309 {dimension_numbers = #tpu.dot_dimension_numbers<[1], [0], [0], [1], [0, 0, 1, 1], [], []>} : vector<2x64xf32>, vector<64x256xf32>, vector<2x256xf32> -> vector<2x256xf32>
    %653 = arith.addf %651, %652 : vector<2x256xf32>
    %654 = vector.extract_strided_slice %653 {offsets = [0, 0], sizes = [2, 64], strides = [1, 1]} : vector<2x256xf32> to vector<2x64xf32>
    %655 = arith.negf %654 : vector<2x64xf32>
    %656 = math.exp %655 : vector<2x64xf32>
    %cst_310 = arith.constant 1.000000e+00 : f32
    %657 = vector.broadcast %cst_310 : f32 to vector<2x64xf32>
    %658 = arith.addf %657, %656 : vector<2x64xf32>
    %659 = arith.divf %657, %658 : vector<2x64xf32>
    %660 = vector.extract_strided_slice %653 {offsets = [0, 64], sizes = [2, 64], strides = [1, 1]} : vector<2x256xf32> to vector<2x64xf32>
    %661 = arith.negf %660 : vector<2x64xf32>
    %662 = math.exp %661 : vector<2x64xf32>
    %cst_311 = arith.constant 1.000000e+00 : f32
    %663 = vector.broadcast %cst_311 : f32 to vector<2x64xf32>
    %664 = arith.addf %663, %662 : vector<2x64xf32>
    %665 = arith.divf %663, %664 : vector<2x64xf32>
    %666 = vector.extract_strided_slice %653 {offsets = [0, 128], sizes = [2, 64], strides = [1, 1]} : vector<2x256xf32> to vector<2x64xf32>
    %667 = math.tanh %666 : vector<2x64xf32>
    %668 = vector.extract_strided_slice %653 {offsets = [0, 192], sizes = [2, 64], strides = [1, 1]} : vector<2x256xf32> to vector<2x64xf32>
    %669 = arith.negf %668 : vector<2x64xf32>
    %670 = math.exp %669 : vector<2x64xf32>
    %cst_312 = arith.constant 1.000000e+00 : f32
    %671 = vector.broadcast %cst_312 : f32 to vector<2x64xf32>
    %672 = arith.addf %671, %670 : vector<2x64xf32>
    %673 = arith.divf %671, %672 : vector<2x64xf32>
    %674 = arith.mulf %665, %641 : vector<2x64xf32>
    %675 = arith.mulf %659, %667 : vector<2x64xf32>
    %676 = arith.addf %674, %675 : vector<2x64xf32>
    %677 = math.tanh %676 : vector<2x64xf32>
    %678 = arith.mulf %673, %677 : vector<2x64xf32>
    %c7_313 = arith.constant 7 : index
    %c0_314 = arith.constant 0 : index
    %c0_315 = arith.constant 0 : index
    %679 = vector.load %arg15[%c7_313, %c0_314, %c0_315] : memref<8x2x64xf32, #tpu.memory_space<vmem>>, vector<1x2x64xf32>
    %680 = vector.shape_cast %679 : vector<1x2x64xf32> to vector<2x64xf32>
    %681 = vector.shape_cast %678 : vector<2x64xf32> to vector<1x2x64xf32>
    tpu.vector_store %arg15[%c7_313, %c0_314, %c0_315], %681 {strides = array<i32>} : memref<8x2x64xf32, #tpu.memory_space<vmem>>, vector<1x2x64xf32>,
    %c0_316 = arith.constant 0 : index
    %c0_317 = arith.constant 0 : index
    %682 = vector.load %arg9[%c0_316, %c0_317] : memref<64x1xf32, #tpu.memory_space<vmem>>, vector<64x1xf32>
    %c7_318 = arith.constant 7 : index
    %c0_319 = arith.constant 0 : index
    %c0_320 = arith.constant 0 : index
    %683 = vector.load %arg15[%c7_318, %c0_319, %c0_320] : memref<8x2x64xf32, #tpu.memory_space<vmem>>, vector<1x2x64xf32>
    %684 = vector.shape_cast %683 : vector<1x2x64xf32> to vector<2x64xf32>
    %685 = vector.extract_strided_slice %684 {offsets = [0, 0], sizes = [2, 32], strides = [1, 1]} : vector<2x64xf32> to vector<2x32xf32>
    %c0_321 = arith.constant 0 : index
    %c0_322 = arith.constant 0 : index
    %c0_323 = arith.constant 0 : index
    %686 = vector.load %arg15[%c0_321, %c0_322, %c0_323] : memref<8x2x64xf32, #tpu.memory_space<vmem>>, vector<1x2x64xf32>
    %687 = vector.shape_cast %686 : vector<1x2x64xf32> to vector<2x64xf32>
    %688 = vector.extract_strided_slice %687 {offsets = [0, 32], sizes = [2, 32], strides = [1, 1]} : vector<2x64xf32> to vector<2x32xf32>
    %689 = vector.extract_strided_slice %682 {offsets = [0, 0], sizes = [32, 1], strides = [1, 1]} : vector<64x1xf32> to vector<32x1xf32>
    %cst_324 = arith.constant dense<0.000000e+00> : vector<2x1xf32>
    %690 = tpu.matmul %685, %689, %cst_324 {dimension_numbers = #tpu.dot_dimension_numbers<[1], [0], [0], [1], [0, 0, 1, 1], [], []>} : vector<2x32xf32>, vector<32x1xf32>, vector<2x1xf32> -> vector<2x1xf32>
    %691 = vector.extract_strided_slice %682 {offsets = [32, 0], sizes = [32, 1], strides = [1, 1]} : vector<64x1xf32> to vector<32x1xf32>
    %cst_325 = arith.constant dense<0.000000e+00> : vector<2x1xf32>
    %692 = tpu.matmul %688, %691, %cst_325 {dimension_numbers = #tpu.dot_dimension_numbers<[1], [0], [0], [1], [0, 0, 1, 1], [], []>} : vector<2x32xf32>, vector<32x1xf32>, vector<2x1xf32> -> vector<2x1xf32>
    %693 = arith.addf %690, %692 : vector<2x1xf32>
    %c0_326 = arith.constant 0 : index
    %c0_327 = arith.constant 0 : index
    %694 = vector.load %arg10[%c0_326, %c0_327] : memref<1x1xf32, #tpu.memory_space<vmem>>, vector<1x1xf32>
    %695 = vector.broadcast %694 : vector<1x1xf32> to vector<2x1xf32>
    %696 = arith.addf %693, %695 : vector<2x1xf32>
    %cst_328 = arith.constant 1.000000e+02 : f32
    %697 = vector.broadcast %cst_328 : f32 to vector<2x1xf32>
    %698 = arith.mulf %696, %697 : vector<2x1xf32>
    %c0_329 = arith.constant 0 : index
    %c0_330 = arith.constant 0 : index
    %699 = vector.load %arg11[%c0_329, %c0_330] : memref<2x1xf32, #tpu.memory_space<vmem>>, vector<2x1xf32>
    tpu.vector_store %arg11[%c0_329, %c0_330], %698 {strides = array<i32>} : memref<2x1xf32, #tpu.memory_space<vmem>>, vector<2x1xf32>,
    return
  }
}

</mosaic_0001>

<bundles_post_ra>
// kernel: net_forward.1
= control target key start
LH: loop header
LB: loop body
LE: loop exit
PB: predicated region body
PF: predicated region fallthrough
CT: control target
= control target key end

     0   :  { %s4580_s0 = inlined_call_operand.vmem [shape: f32[8,2,1], index: 0, kind: input, shape index: {}]   ;;  %s4581_s1 = inlined_call_operand.vmem [shape: f32[1,256], index: 1, kind: input, shape index: {}]   ;;  %s4582_s2 = inlined_call_operand.vmem [shape: f32[1,256], index: 2, kind: input, shape index: {}]   ;;  %s4583_s3 = inlined_call_operand.vmem [shape: f32[1,256], index: 3, kind: input, shape index: {}]   ;;  %s4584_s4 = inlined_call_operand.hbm [shape: f32[64,256], index: 4, kind: input, shape index: {}]   ;;  %s4585_s5 = inlined_call_operand.hbm [shape: f32[64,256], index: 5, kind: input, shape index: {}]   ;;  %s4586_s6 = inlined_call_operand.hbm [shape: f32[64,256], index: 6, kind: input, shape index: {}]   ;;  %s4587_s7 = inlined_call_operand.vmem [shape: f32[1,256], index: 7, kind: input, shape index: {}]   ;;  %s4588_s8 = inlined_call_operand.hbm [shape: f32[64,256], index: 8, kind: input, shape index: {}]   ;;  %s4589_s9 = inlined_call_operand.vmem [shape: f32[64,1], index: 9, kind: input, shape index: {}]   ;;  %s4590_s10 = inlined_call_operand.<no memory space> [shape: f32[1,1], index: 10, kind: input, shape index: {}]   ;;  %s4591_s11 = inlined_call_operand.vmem [shape: f32[2,1], index: 11, kind: output, shape index: {}]  }
   0x1   :  { %v16_v0 = vstv %s4590_s10 }
   0x2   :  { %17 = vst [vmem:[#allocation6] sm:$0x1] %v16_v0 }
   0x3   :  { %18 = vsyncpa [#allocation8], 0 }
   0x4   :  { %19 = vsyncpa [#allocation10], 0 }
   0x5   :  { %20 = vsyncpa [#allocation13], 0  ;;  %s46_s21 = sshll.u32 %s4585_s5, 4  ;;  %s3447_s22 = smov [#allocation9]   ;;  %s47_s21 = int_to_ptr.hbm [resolvable:$true] %s46_s21 }
   0x6   :  { %s48_s23 = sshll.u32 %s3447_s22, 4  ;;  %s33_s26 = sshll.u32 %s4584_s4, 4  ;;  %s49_s23 = int_to_ptr.vmem [resolvable:$true] %s48_s23  ;;  %s34_s26 = int_to_ptr.hbm [resolvable:$true] %s33_s26 }
   0x7   :  { %s3448_s27 = smov 256   ;;  %s3449_s28 = smov 16  }
   0x8   :  { %54 = dma.hbm_to_vmem [thread:$0]  %s47_s21, 2048, %s49_s23, [#allocation10], %s3448_s27, %s3448_s27, %s3449_s28  }
   0x9   :  { %s3450_s10 = smov [#allocation7]   ;;  %s59_s13 = sshll.u32 %s4586_s6, 4  ;;  %s60_s13 = int_to_ptr.hbm [resolvable:$true] %s59_s13 }
   0xa   :  { %s35_s29 = sshll.u32 %s3450_s10, 4  ;;  %s74_s15 = sshll.u32 %s4588_s8, 4  ;;  %s36_s29 = int_to_ptr.vmem [resolvable:$true] %s35_s29  ;;  %s75_s15 = int_to_ptr.hbm [resolvable:$true] %s74_s15 }
   0xb   :  { %41 = dma.hbm_to_vmem [thread:$0]  %s34_s26, 2048, %s36_s29, [#allocation8], %s3448_s27, %s3448_s27, %s3449_s28  }
   0xc   :  { %s3451_s16 = smov [#allocation11]   ;;  %s3452_s4 = smov [#allocation12]  }
   0xd   :  { %s61_s17 = sshll.u32 %s3451_s16, 4  ;;  %s76_s18 = sshll.u32 %s3452_s4, 4  ;;  %s62_s17 = int_to_ptr.vmem [resolvable:$true] %s61_s17  ;;  %s77_s18 = int_to_ptr.vmem [resolvable:$true] %s76_s18 }
   0xe   :  { %67 = dma.hbm_to_vmem [thread:$0]  %s60_s13, 2048, %s62_s17, [#allocation10], %s3448_s27, %s3448_s27, %s3449_s28  }
   0xf   :  { %82 = dma.hbm_to_vmem [thread:$0]  %s75_s15, 2048, %s77_s18, [#allocation13], %s3448_s27, %s3448_s27, %s3449_s28  }
  0x10   :  { %3441 = dma.done.wait [#allocation8], 2048  }
  0x11   :  { %3442 = vsyncadd [#allocation8], 4294965248 }
  0x12   :  { %3443 = dma.done.wait [#allocation10], 4096  }
  0x13   :  { %3444 = vsyncadd [#allocation10], 4294963200 }
  0x14   :  { %3445 = dma.done.wait [#allocation13], 2048  }
  0x15   :  { %3446 = vsyncadd [#allocation13], 4294965248  ;;  %v3453_v1 = vmov 0   ;;  %v3532_v2 = vld [vmem:[#allocation7 + $0x78] sm:$0xff]  ;;  %v3537_v4 = vld [vmem:[#allocation7 + $0x70] sm:$0xff]  ;;  %v3454_v21 = vmov 0.0  }
  0x16   :  { %3149 = vset.pattern.permute.xlu0 %v3453_v1  ;;  %3150 = vset.pattern.permute.xlu2 %v3453_v1  ;;  %v103_v3 = vld [vmem:[%s4580_s0] sm:$0x3]  ;;  %v3540_v5 = vld [vmem:[#allocation7 + $0x68] sm:$0xff]  ;;  %v3549_v8 = vld [vmem:[#allocation7 + $0x50] sm:$0xff]  ;;  %vm219_vm0 = vcmask 1041408   ;;  %vm443_vm9 = vcmask 517120  }
  0x17   :  { %3151 = vset.pattern.permute.xlu1 %v3453_v1  ;;  %366 = vmatpush.msra.mxu1 %v3532_v2  ;;  %v3542_v6 = vld [vmem:[#allocation7 + $0x60] sm:$0xff]  ;;  %v3545_v7 = vld [vmem:[#allocation7 + $0x58] sm:$0xff]  ;;  %v3553_v9 = vld [vmem:[#allocation7 + $0x48] sm:$0xff]  ;;  %vm334_vm10 = vcmask 523264  }
  0x18   :  { %114 = vperm.xlu0 %3149, %v103_v3   ;;  %346 = vmatpush.msra.mxu0 %v3537_v4  ;;  %v3557_v10 = vld [vmem:[#allocation7 + $0x40] sm:$0xff]  ;;  %v3561_v11 = vld [vmem:[#allocation7 + $0x38] sm:$0xff]  ;;  %v110_v12 = vld [vmem:[%s4580_s0 + $0xe] sm:$0x3] }
  0x19   :  { %461 = vmatpush.msra.mxu2 %v3537_v4  ;;  %367 = vmatpush.msra.mxu1 %v3540_v5  ;;  %v3568_v13 = vld [vmem:[#allocation7 + $0x30] sm:$0xff]  ;;  %v3572_v14 = vld [vmem:[#allocation7 + $0x28] sm:$0xff]  ;;  %v3576_v15 = vld [vmem:[#allocation7 + $0x20] sm:$0xff] }
  0x1a   :  { %481 = vmatpush.msra.mxu3 %v3532_v2  ;;  %347 = vmatpush.msra.mxu0 %v3542_v6  ;;  %v3579_v16 = vld [vmem:[#allocation7 + $0x18] sm:$0xff]  ;;  %v3583_v17 = vld [vmem:[#allocation7 + $0x10] sm:$0xff]  ;;  %v3587_v18 = vld [vmem:[#allocation7 + $0x8] sm:$0xff] }
  0x1b   :  { %462 = vmatpush.msra.mxu2 %v3542_v6  ;;  %368 = vmatpush.msra.mxu1 %v3545_v7  ;;  %v3591_v19 = vld [vmem:[#allocation7] sm:$0xff]  ;;  %v109_v20 = vld [vmem:[%s4580_s0 + $0xc] sm:$0x3] }
  0x1c   :  { %482 = vmatpush.msra.mxu3 %v3540_v5  ;;  %348 = vmatpush.msra.mxu0 %v3549_v8  ;;  %v111_v22 = vld [vmem:[%s4581_s1] sm:$0x3]  ;;  %s3455_s1 = smov 64  }
  0x1d   :  { %463 = vmatpush.msra.mxu2 %v3549_v8  ;;  %369 = vmatpush.msra.mxu1 %v3553_v9  ;;  %v244_v23 = vld [vmem:[%s4582_s2] sm:$0x3]  ;;  %v3664_v25 = vperm.slane %v111_v22, 0  ;;  %v3666_v26 = vperm.slane %v111_v22, 1 }
  0x1e   :  { %483 = vmatpush.msra.mxu3 %v3545_v7  ;;  %349 = vmatpush.msra.mxu0 %v3557_v10  ;;  %v173_v24 = vld [vmem:[%s4583_s3] sm:$0x3]  ;;  %v3668_v27 = vperm.slane %v244_v23, 0  ;;  %v3670_v28 = vperm.slane %v244_v23, 1 }
  0x1f   :  { %464 = vmatpush.msra.mxu2 %v3557_v10  ;;  %370 = vmatpush.msra.mxu1 %v3561_v11  ;;  %v3672_v29 = vperm.slane %v173_v24, 0  ;;  %v3674_v30 = vperm.slane %v173_v24, 1 }
  0x20   :  { %149 = vperm.xlu0 %3149, %v110_v12   ;;  %350 = vmatpush.msra.mxu0 %v3568_v13 }
  0x21   :  { %484 = vmatpush.msra.mxu3 %v3553_v9  ;;  %371 = vmatpush.msra.mxu1 %v3572_v14 }
  0x22   :  { %465 = vmatpush.msra.mxu2 %v3568_v13  ;;  %351 = vmatpush.msra.mxu0 %v3576_v15 }
  0x23   :  { %485 = vmatpush.msra.mxu3 %v3561_v11  ;;  %372 = vmatpush.msra.mxu1 %v3579_v16 }
  0x24   :  { %466 = vmatpush.msra.mxu2 %v3576_v15  ;;  %352 = vmatpush.msra.mxu0 %v3583_v17 }
  0x25   :  { %486 = vmatpush.msra.mxu3 %v3572_v14  ;;  %373 = vmatpush.msra.mxu1 %v3587_v18 }
  0x26   :  { %467 = vmatpush.msra.mxu2 %v3583_v17  ;;  %374 = vmatmul.f32.vlgmr.msra.gmra.mxu1 %v3454_v21 }
  0x27   :  { %353 = vmatpush.msra.mxu0 %v3591_v19  ;;  %487 = vmatpush.msra.mxu3 %v3579_v16 }
  0x28   :  { %144 = vperm.xlu0 %3149, %v109_v20   ;;  %354 = vmatmul.f32.vlgmr.msra.gmra.mxu0 %v3454_v21 }
  0x29   :  { %468 = vmatpush.msra.mxu2 %v3591_v19  ;;  %576 = vmatpush.msrb.mxu0 %v3537_v4 }
  0x2a   :  { %596 = vmatpush.msrb.mxu1 %v3532_v2  ;;  %488 = vmatpush.msra.mxu3 %v3587_v18 }
  0x2b   :  { %691 = vmatpush.msrb.mxu2 %v3537_v4  ;;  %577 = vmatpush.msrb.mxu0 %v3542_v6 }
  0x2c   :  { %597 = vmatpush.msrb.mxu1 %v3540_v5  ;;  %711 = vmatpush.msrb.mxu3 %v3532_v2 }
  0x2d   :  { %692 = vmatpush.msrb.mxu2 %v3542_v6  ;;  %578 = vmatpush.msrb.mxu0 %v3549_v8 }
  0x2e   :  { %598 = vmatpush.msrb.mxu1 %v3545_v7  ;;  %712 = vmatpush.msrb.mxu3 %v3540_v5 }
  0x2f   :  { %693 = vmatpush.msrb.mxu2 %v3549_v8  ;;  %579 = vmatpush.msrb.mxu0 %v3557_v10 }
  0x30   :  { %599 = vmatpush.msrb.mxu1 %v3553_v9  ;;  %713 = vmatpush.msrb.mxu3 %v3545_v7 }
  0x31   :  { %694 = vmatpush.msrb.mxu2 %v3557_v10  ;;  %580 = vmatpush.msrb.mxu0 %v3568_v13 }
  0x32   :  { %600 = vmatpush.msrb.mxu1 %v3561_v11  ;;  %714 = vmatpush.msrb.mxu3 %v3553_v9 }
  0x33   :  { %695 = vmatpush.msrb.mxu2 %v3568_v13  ;;  %581 = vmatpush.msrb.mxu0 %v3576_v15 }
  0x34   :  { %601 = vmatpush.msrb.mxu1 %v3572_v14  ;;  %715 = vmatpush.msrb.mxu3 %v3561_v11 }
  0x35   :  { %696 = vmatpush.msrb.mxu2 %v3576_v15  ;;  %582 = vmatpush.msrb.mxu0 %v3583_v17 }
  0x36   :  { %602 = vmatpush.msrb.mxu1 %v3579_v16  ;;  %716 = vmatpush.msrb.mxu3 %v3572_v14 }
  0x37   :  { %697 = vmatpush.msrb.mxu2 %v3583_v17  ;;  %583 = vmatpush.msrb.mxu0 %v3591_v19 }
  0x38   :  { %603 = vmatpush.msrb.mxu1 %v3587_v18  ;;  %717 = vmatpush.msrb.mxu3 %v3579_v16 }
  0x39   :  { %698 = vmatpush.msrb.mxu2 %v3591_v19  ;;  %806 = vmatpush.msra.mxu0 %v3537_v4 }
  0x3a   :  { %826 = vmatpush.msra.mxu1 %v3532_v2  ;;  %718 = vmatpush.msrb.mxu3 %v3587_v18 }
  0x3b   :  { %807 = vmatpush.msra.mxu0 %v3542_v6 }
  0x3c   :  { %827 = vmatpush.msra.mxu1 %v3540_v5 }
  0x3d   :  { %808 = vmatpush.msra.mxu0 %v3549_v8 }
  0x3e   :  { %828 = vmatpush.msra.mxu1 %v3545_v7 }
  0x3f   :  { %809 = vmatpush.msra.mxu0 %v3557_v10 }
  0x40   :  { %829 = vmatpush.msra.mxu1 %v3553_v9 }
  0x41   :  { %810 = vmatpush.msra.mxu0 %v3568_v13 }
  0x42   :  { %830 = vmatpush.msra.mxu1 %v3561_v11 }
  0x43   :  { %811 = vmatpush.msra.mxu0 %v3576_v15 }
  0x44   :  { %831 = vmatpush.msra.mxu1 %v3572_v14 }
  0x45   :  { %812 = vmatpush.msra.mxu0 %v3583_v17 }
  0x46   :  { %832 = vmatpush.msra.mxu1 %v3579_v16 }
  0x47   :  { %813 = vmatpush.msra.mxu0 %v3591_v19 }
  0x48   :  { %833 = vmatpush.msra.mxu1 %v3587_v18 }
  0x8a   :  { %v115_v31 = vpop.permute.xlu0 %114 }
  0x8b   :  { %v157_v32 = vmul.f32 %v3664_v25, %v115_v31  ;;  %v158_v33 = vmul.f32 %v3666_v26, %v115_v31  ;;  %v250_v34 = vmul.f32 %v3668_v27, %v115_v31  ;;  %v251_v35 = vmul.f32 %v3670_v28, %v115_v31 }
  0x8d   :  { %v179_v36 = vadd.f32 %v3672_v29, %v157_v32  ;;  %v180_v37 = vadd.f32 %v3674_v30, %v158_v33  ;;  %v282_v38 = vrot.slane %v251_v35, 6 }
  0x8f   :  { %v211_v39 = vrot.slane %v180_v37, 6  ;;  %v290_v40 = vsel %vm219_vm0, %v250_v34, %v282_v38 }
  0x90   :  { %306 = vst [vmem:[#allocation3] sm:$0xf] %v290_v40 }
  0x91   :  { %v220_v41 = vsel %vm219_vm0, %v179_v36, %v211_v39 }
  0x92   :  { %236 = vst [vmem:[#allocation2] sm:$0xf] %v220_v41  ;;  %v150_v42 = vpop.permute.xlu0 %149 }
  0x93   :  { %v171_v43 = vmul.f32 %v3664_v25, %v150_v42  ;;  %v172_v44 = vmul.f32 %v3666_v26, %v150_v42  ;;  %v265_v45 = vmul.f32 %v3670_v28, %v150_v42  ;;  %v264_v47 = vmul.f32 %v3668_v27, %v150_v42 }
  0x95   :  { %v194_v46 = vadd.f32 %v3674_v30, %v172_v44  ;;  %v289_v48 = vrot.slane %v265_v45, 6  ;;  %v193_v49 = vadd.f32 %v3672_v29, %v171_v43 }
  0x97   :  { %v218_v50 = vrot.slane %v194_v46, 6  ;;  %v297_v51 = vsel %vm219_vm0, %v264_v47, %v289_v48 }
  0x98   :  { %313 = vst [vmem:[#allocation3 + $0x1c] sm:$0xf] %v297_v51  ;;  %v104_v51 = vld [vmem:[%s4580_s0 + $0x2] sm:$0x3] }
  0x99   :  { %v227_v52 = vsel %vm219_vm0, %v193_v49, %v218_v50  ;;  %v330_v12 = vld [vmem:[#allocation2] sm:$0xf] }
  0x9a   :  { %243 = vst [vmem:[#allocation2 + $0x1c] sm:$0xf] %v227_v52  ;;  %v145_v53 = vpop.permute.xlu0 %144 }
  0x9b   :  { %v169_v54 = vmul.f32 %v3664_v25, %v145_v53  ;;  %v170_v55 = vmul.f32 %v3666_v26, %v145_v53  ;;  %v263_v56 = vmul.f32 %v3670_v28, %v145_v53  ;;  %v262_v58 = vmul.f32 %v3668_v27, %v145_v53 }
  0x9d   :  { %v192_v57 = vadd.f32 %v3674_v30, %v170_v55  ;;  %v288_v59 = vrot.slane %v263_v56, 6  ;;  %v191_v60 = vadd.f32 %v3672_v29, %v169_v54 }
  0x9f   :  { %v217_v61 = vrot.slane %v192_v57, 6  ;;  %v296_v62 = vsel %vm219_vm0, %v262_v58, %v288_v59  ;;  %v332_v0 = vld [vmem:[#allocation3 + $0x1c] sm:$0xf] }
  0xa0   :  { %312 = vst [vmem:[#allocation3 + $0x18] sm:$0xf] %v296_v62  ;;  %v333_v22 = vadd.f32 %v332_v0, %v330_v12 }
  0xa1   :  { %v226_v63 = vsel %vm219_vm0, %v191_v60, %v217_v61 }
  0xa2   :  { %242 = vst [vmem:[#allocation2 + $0x18] sm:$0xf] %v226_v63 }
  0xa3   :  { %v375_v1 = vpop.f32.mrf.mxu1 }
  0xa4   :  { %v380_v3 = vrot.slane %v375_v1, 6 }
  0xa5   :  { %v355_v20 = vpop.f32.mrf.mxu0 }
  0xa6   :  { %v381_v23 = vsel %vm219_vm0, %v355_v20, %v380_v3 }
  0xa7   :  { %v383_v24 = vadd.f32 %v381_v23, %v333_v22 }
  0xa9   :  { %v3045_v31 = vmul.f32 -1.442695, %v383_v24  ;;  %v404_v35 = vrot.slane %v383_v24, 2 }
  0xab   :  { %3153 = vpow2.f32 %v3045_v31 }
  0xb1   :  { %v3154_v32 = vpop.eup %3153 }
  0xb2   :  { %v387_v33 = vadd.f32 1.0, %v3154_v32 }
  0xb4   :  { %3155 = vrcp.f32 %v387_v33  ;;  %v399_v38 = vand.u32 2147483648, %v387_v33  ;;  %v397_v40 = vand.u32 2147483647, %v387_v33  ;;  %vm393_vm2 = vweird.f32 %v387_v33 }
  0xb5   :  { %3157 = vtanh.f32 %v404_v35 }
  0xb6   :  { %v400_v42 = vor.u32 1.1754944e-38, %v399_v38  ;;  %vm398_vm4 = vcmp.eq.f32.partialorder %v397_v40, 8.507059e+37 }
  0xba   :  { %v3156_v34 = vpop.eup %3155 }
  0xbb   :  { %v389_v36 = vmul.f32 %v3156_v34, %v387_v33  ;;  %vm394_vm1 = vweird.f32 %v3156_v34  ;;  %v3158_v44 = vpop.eup %3157 }
  0xbc   :  { %vm395_vm3 = vmor %vm393_vm2, %vm394_vm1 }
  0xbd   :  { %v390_v37 = vsub.f32 1.0, %v389_v36 }
  0xbf   :  { %v391_v39 = vmul.f32 %v3156_v34, %v390_v37 }
  0xc1   :  { %v392_v41 = vadd.f32 %v3156_v34, %v391_v39 }
  0xc3   :  { %v396_v43 = vsel %vm395_vm3, %v3156_v34, %v392_v41 }
  0xc4   :  { %v401_v45 = vsel %vm398_vm4, %v400_v42, %v396_v43  ;;  %v448_v42 = vld [vmem:[#allocation3 + $0x18] sm:$0xf] }
  0xc5   :  { %v431_v46 = vmul.f32 %v3158_v44, %v401_v45  ;;  %v430_v47 = vmul.f32 0.0, %v401_v45 }
  0xc7   :  { %433 = vrot.lane.b32.xlu1 %v431_v46, %s3455_s1 }
  0xcf   :  { %407 = vrot.lane.b32.xlu1 %v383_v24, %s3455_s1 }
 0x139   :  { %v434_v48 = vpop.permute.xlu1 %433 }
 0x13a   :  { %v3703_v49 = vadd.f32 %v434_v48, %v430_v47  ;;  %v108_v48 = vld [vmem:[%s4580_s0 + $0xa] sm:$0x3] }
 0x13c   :  { %3159 = vtanh.f32 %v3703_v49 }
 0x141   :  { %v408_v52 = vpop.permute.xlu1 %407 }
 0x142   :  { %v3160_v50 = vpop.eup %3159  ;;  %v409_v53 = vrot.slane %v408_v52, 2 }
 0x143   :  { %439 = vrot.lane.b32.xlu2 %v3160_v50, %s3455_s1 }
 0x144   :  { %v3046_v54 = vmul.f32 -1.442695, %v409_v53 }
 0x146   :  { %3161 = vpow2.f32 %v3046_v54 }
 0x14b   :  { %119 = vperm.xlu2 %3150, %v104_v51  }
 0x14c   :  { %v3162_v55 = vpop.eup %3161 }
 0x14d   :  { %v414_v56 = vadd.f32 1.0, %v3162_v55 }
 0x14f   :  { %3163 = vrcp.f32 %v414_v56  ;;  %v426_v62 = vand.u32 2147483648, %v414_v56  ;;  %vm420_vm6 = vweird.f32 %v414_v56  ;;  %v424_v63 = vand.u32 2147483647, %v414_v56 }
 0x151   :  { %v427_v1 = vor.u32 1.1754944e-38, %v426_v62  ;;  %vm425_vm8 = vcmp.eq.f32.partialorder %v424_v63, 8.507059e+37 }
 0x155   :  { %v3164_v57 = vpop.eup %3163 }
 0x156   :  { %v416_v58 = vmul.f32 %v3164_v57, %v414_v56  ;;  %vm421_vm5 = vweird.f32 %v3164_v57 }
 0x157   :  { %vm422_vm7 = vmor %vm420_vm6, %vm421_vm5 }
 0x158   :  { %v417_v59 = vsub.f32 1.0, %v416_v58 }
 0x15a   :  { %v418_v60 = vmul.f32 %v3164_v57, %v417_v59 }
 0x15c   :  { %v419_v61 = vadd.f32 %v3164_v57, %v418_v60 }
 0x15e   :  { %v423_v0 = vsel %vm422_vm7, %v3164_v57, %v419_v61 }
 0x15f   :  { %v428_v3 = vsel %vm425_vm8, %v427_v1, %v423_v0  ;;  %v105_v1 = vld [vmem:[%s4580_s0 + $0x4] sm:$0x3] }
 0x19d   :  { %v440_v12 = vpop.permute.xlu2 %439 }
 0x19e   :  { %v442_v20 = vmul.f32 %v440_v12, %v428_v3 }
 0x1a0   :  { %444 = vst.msk [vmem:[#allocation4] sm:$0x3] %vm443_vm9, %v442_v20  ;;  %3047 = vmatmul.msk.f32.vlgmr.msra.gmra.mxu2 %vm334_vm10, %v442_v20  ;;  %3048 = vmatmul.msk.f32.vlgmr.msra.gmra.mxu3 %vm334_vm10, %v442_v20 }
 0x1a1   :  { %921 = vmatpush.msra.mxu2 %v3537_v4  ;;  %941 = vmatpush.msra.mxu3 %v3532_v2 }
 0x1a3   :  { %922 = vmatpush.msra.mxu2 %v3542_v6  ;;  %942 = vmatpush.msra.mxu3 %v3540_v5 }
 0x1a5   :  { %v120_v22 = vpop.permute.xlu2 %119  ;;  %923 = vmatpush.msra.mxu2 %v3549_v8  ;;  %943 = vmatpush.msra.mxu3 %v3545_v7 }
 0x1a6   :  { %v159_v23 = vmul.f32 %v3664_v25, %v120_v22  ;;  %v160_v24 = vmul.f32 %v3666_v26, %v120_v22  ;;  %v252_v31 = vmul.f32 %v3668_v27, %v120_v22  ;;  %v253_v32 = vmul.f32 %v3670_v28, %v120_v22 }
 0x1a7   :  { %924 = vmatpush.msra.mxu2 %v3557_v10  ;;  %944 = vmatpush.msra.mxu3 %v3553_v9 }
 0x1a8   :  { %v181_v33 = vadd.f32 %v3672_v29, %v159_v23  ;;  %v182_v34 = vadd.f32 %v3674_v30, %v160_v24  ;;  %v283_v35 = vrot.slane %v253_v32, 6 }
 0x1a9   :  { %925 = vmatpush.msra.mxu2 %v3568_v13  ;;  %945 = vmatpush.msra.mxu3 %v3561_v11 }
 0x1aa   :  { %v212_v36 = vrot.slane %v182_v34, 6  ;;  %v291_v37 = vsel %vm219_vm0, %v252_v31, %v283_v35 }
 0x1ab   :  { %307 = vst [vmem:[#allocation3 + $0x4] sm:$0xf] %v291_v37  ;;  %926 = vmatpush.msra.mxu2 %v3576_v15  ;;  %946 = vmatpush.msra.mxu3 %v3572_v14 }
 0x1ac   :  { %v221_v38 = vsel %vm219_vm0, %v181_v33, %v212_v36 }
 0x1ad   :  { %237 = vst [vmem:[#allocation2 + $0x4] sm:$0xf] %v221_v38  ;;  %927 = vmatpush.msra.mxu2 %v3583_v17  ;;  %947 = vmatpush.msra.mxu3 %v3579_v16 }
 0x1af   :  { %928 = vmatpush.msra.mxu2 %v3591_v19  ;;  %948 = vmatpush.msra.mxu3 %v3587_v18 }
 0x1b4   :  { %v446_v39 = vld [vmem:[#allocation2 + $0x4] sm:$0xf] }
 0x1b5   :  { %v449_v44 = vadd.f32 %v448_v42, %v446_v39 }
 0x223   :  { %v490_v40 = vpop.f32.mrf.mxu3  ;;  %v470_v43 = vpop.f32.mrf.mxu2 }
 0x224   :  { %v495_v41 = vrot.slane %v490_v40, 6 }
 0x226   :  { %v496_v45 = vsel %vm219_vm0, %v470_v43, %v495_v41 }
 0x227   :  { %v498_v46 = vadd.f32 %v496_v45, %v449_v44 }
 0x229   :  { %522 = vrot.lane.b32.xlu2 %v498_v46, %s3455_s1  ;;  %v3049_v47 = vmul.f32 -1.442695, %v498_v46  ;;  %v519_v53 = vrot.slane %v498_v46, 2 }
 0x22b   :  { %3165 = vpow2.f32 %v3049_v47 }
 0x231   :  { %v3166_v50 = vpop.eup %3165  ;;  %139 = vperm.xlu2 %3150, %v108_v48  }
 0x232   :  { %v502_v51 = vadd.f32 1.0, %v3166_v50 }
 0x234   :  { %3167 = vrcp.f32 %v502_v51  ;;  %v514_v56 = vand.u32 2147483648, %v502_v51  ;;  %v512_v58 = vand.u32 2147483647, %v502_v51  ;;  %vm508_vm12 = vweird.f32 %v502_v51 }
 0x235   :  { %3169 = vtanh.f32 %v519_v53 }
 0x236   :  { %v515_v60 = vor.u32 1.1754944e-38, %v514_v56  ;;  %vm513_vm14 = vcmp.eq.f32.partialorder %v512_v58, 8.507059e+37 }
 0x23a   :  { %v3168_v52 = vpop.eup %3167 }
 0x23b   :  { %v504_v54 = vmul.f32 %v3168_v52, %v502_v51  ;;  %vm509_vm11 = vweird.f32 %v3168_v52  ;;  %v3170_v62 = vpop.eup %3169 }
 0x23c   :  { %vm510_vm13 = vmor %vm508_vm12, %vm509_vm11 }
 0x23d   :  { %v505_v55 = vsub.f32 1.0, %v504_v54 }
 0x23f   :  { %v506_v57 = vmul.f32 %v3168_v52, %v505_v55 }
 0x241   :  { %v507_v59 = vadd.f32 %v3168_v52, %v506_v57 }
 0x243   :  { %v511_v61 = vsel %vm510_vm13, %v3168_v52, %v507_v59 }
 0x244   :  { %v516_v63 = vsel %vm513_vm14, %v515_v60, %v511_v61 }
 0x245   :  { %v546_v0 = vmul.f32 %v3170_v62, %v516_v63  ;;  %v545_v37 = vmul.f32 %v516_v63, %v3703_v49 }
 0x247   :  { %548 = vrot.lane.b32.xlu1 %v546_v0, %s3455_s1 }
 0x24f   :  { %124 = vperm.xlu1 %3151, %v105_v1  }
 0x283   :  { %v523_v3 = vpop.permute.xlu2 %522 }
 0x284   :  { %v524_v52 = vrot.slane %v523_v3, 2 }
 0x286   :  { %v3050_v53 = vmul.f32 -1.442695, %v524_v52 }
 0x28b   :  { %v140_v12 = vpop.permute.xlu2 %139 }
 0x28c   :  { %v167_v20 = vmul.f32 %v3664_v25, %v140_v12  ;;  %v168_v22 = vmul.f32 %v3666_v26, %v140_v12  ;;  %v261_v23 = vmul.f32 %v3670_v28, %v140_v12  ;;  %v260_v31 = vmul.f32 %v3668_v27, %v140_v12 }
 0x28e   :  { %v190_v24 = vadd.f32 %v3674_v30, %v168_v22  ;;  %v287_v32 = vrot.slane %v261_v23, 6  ;;  %v189_v33 = vadd.f32 %v3672_v29, %v167_v20 }
 0x290   :  { %v216_v34 = vrot.slane %v190_v24, 6  ;;  %v295_v35 = vsel %vm219_vm0, %v260_v31, %v287_v32 }
 0x291   :  { %311 = vst [vmem:[#allocation3 + $0x14] sm:$0xf] %v295_v35 }
 0x292   :  { %v225_v36 = vsel %vm219_vm0, %v189_v33, %v216_v34 }
 0x293   :  { %241 = vst [vmem:[#allocation2 + $0x14] sm:$0xf] %v225_v36  ;;  %v107_v36 = vld [vmem:[%s4580_s0 + $0x8] sm:$0x3] }
 0x298   :  { %v563_v24 = vld [vmem:[#allocation3 + $0x14] sm:$0xf] }
 0x2b9   :  { %v549_v38 = vpop.permute.xlu1 %548 }
 0x2ba   :  { %v3755_v39 = vadd.f32 %v549_v38, %v545_v37 }
 0x2bc   :  { %3171 = vtanh.f32 %v3755_v39 }
 0x2bd   :  { %3173 = vpow2.f32 %v3050_v53  ;;  %v106_v53 = vld [vmem:[%s4580_s0 + $0x6] sm:$0x3] }
 0x2c1   :  { %v125_v40 = vpop.permute.xlu1 %124 }
 0x2c2   :  { %v3172_v41 = vpop.eup %3171  ;;  %v161_v42 = vmul.f32 %v3664_v25, %v125_v40  ;;  %v162_v43 = vmul.f32 %v3666_v26, %v125_v40  ;;  %v254_v44 = vmul.f32 %v3668_v27, %v125_v40  ;;  %v255_v45 = vmul.f32 %v3670_v28, %v125_v40 }
 0x2c3   :  { %554 = vrot.lane.b32.xlu0 %v3172_v41, %s3455_s1  ;;  %v3174_v54 = vpop.eup %3173 }
 0x2c4   :  { %v183_v46 = vadd.f32 %v3672_v29, %v161_v42  ;;  %v184_v49 = vadd.f32 %v3674_v30, %v162_v43  ;;  %v284_v47 = vrot.slane %v255_v45, 6  ;;  %v529_v55 = vadd.f32 1.0, %v3174_v54 }
 0x2c6   :  { %v213_v48 = vrot.slane %v184_v49, 6  ;;  %v292_v50 = vsel %vm219_vm0, %v254_v44, %v284_v47  ;;  %3175 = vrcp.f32 %v529_v55  ;;  %v541_v61 = vand.u32 2147483648, %v529_v55 }
 0x2c7   :  { %308 = vst [vmem:[#allocation3 + $0x8] sm:$0xf] %v292_v50  ;;  %vm535_vm1 = vweird.f32 %v529_v55  ;;  %v539_v62 = vand.u32 2147483647, %v529_v55 }
 0x2c8   :  { %v222_v51 = vsel %vm219_vm0, %v183_v46, %v213_v48  ;;  %v542_v0 = vor.u32 1.1754944e-38, %v541_v61 }
 0x2c9   :  { %238 = vst [vmem:[#allocation2 + $0x8] sm:$0xf] %v222_v51  ;;  %vm540_vm3 = vcmp.eq.f32.partialorder %v539_v62, 8.507059e+37 }
 0x2cc   :  { %v3176_v56 = vpop.eup %3175 }
 0x2cd   :  { %v531_v57 = vmul.f32 %v3176_v56, %v529_v55  ;;  %vm536_vm15 = vweird.f32 %v3176_v56 }
 0x2ce   :  { %vm537_vm2 = vmor %vm535_vm1, %vm536_vm15 }
 0x2cf   :  { %v532_v58 = vsub.f32 1.0, %v531_v57 }
 0x2d0   :  { %v561_v20 = vld [vmem:[#allocation2 + $0x8] sm:$0xf] }
 0x2d1   :  { %v533_v59 = vmul.f32 %v3176_v56, %v532_v58  ;;  %v564_v32 = vadd.f32 %v563_v24, %v561_v20 }
 0x2d3   :  { %v534_v60 = vadd.f32 %v3176_v56, %v533_v59 }
 0x2d5   :  { %v538_v63 = vsel %vm537_vm2, %v3176_v56, %v534_v60 }
 0x2d6   :  { %v543_v1 = vsel %vm540_vm3, %v542_v0, %v538_v63 }
 0x335   :  { %v555_v3 = vpop.permute.xlu0 %554 }
 0x336   :  { %v557_v12 = vmul.f32 %v555_v3, %v543_v1 }
 0x338   :  { %559 = vst.msk [vmem:[#allocation4 + $0x2] sm:$0x3] %vm443_vm9, %v557_v12  ;;  %3051 = vmatmul.msk.f32.vlgmr.msrb.gmra.mxu0 %vm334_vm10, %v557_v12  ;;  %3052 = vmatmul.msk.f32.vlgmr.msrb.gmra.mxu1 %vm334_vm10, %v557_v12 }
 0x339   :  { %1036 = vmatpush.msrb.mxu0 %v3537_v4  ;;  %1056 = vmatpush.msrb.mxu1 %v3532_v2 }
 0x33b   :  { %1037 = vmatpush.msrb.mxu0 %v3542_v6  ;;  %1057 = vmatpush.msrb.mxu1 %v3540_v5 }
 0x33d   :  { %1038 = vmatpush.msrb.mxu0 %v3549_v8  ;;  %1058 = vmatpush.msrb.mxu1 %v3545_v7 }
 0x33f   :  { %1039 = vmatpush.msrb.mxu0 %v3557_v10  ;;  %1059 = vmatpush.msrb.mxu1 %v3553_v9 }
 0x341   :  { %1040 = vmatpush.msrb.mxu0 %v3568_v13  ;;  %1060 = vmatpush.msrb.mxu1 %v3561_v11 }
 0x343   :  { %1041 = vmatpush.msrb.mxu0 %v3576_v15  ;;  %1061 = vmatpush.msrb.mxu1 %v3572_v14 }
 0x345   :  { %1042 = vmatpush.msrb.mxu0 %v3583_v17  ;;  %1062 = vmatpush.msrb.mxu1 %v3579_v16 }
 0x347   :  { %1043 = vmatpush.msrb.mxu0 %v3591_v19  ;;  %1063 = vmatpush.msrb.mxu1 %v3587_v18 }
 0x3b5   :  { %v605_v22 = vpop.f32.mrf.mxu1  ;;  %v585_v31 = vpop.f32.mrf.mxu0 }
 0x3b6   :  { %v610_v23 = vrot.slane %v605_v22, 6 }
 0x3b8   :  { %v611_v33 = vsel %vm219_vm0, %v585_v31, %v610_v23 }
 0x3b9   :  { %v613_v34 = vadd.f32 %v611_v33, %v564_v32 }
 0x3bb   :  { %637 = vrot.lane.b32.xlu1 %v613_v34, %s3455_s1  ;;  %v3053_v35 = vmul.f32 -1.442695, %v613_v34  ;;  %v634_v41 = vrot.slane %v613_v34, 2 }
 0x3bd   :  { %3177 = vpow2.f32 %v3053_v35 }
 0x3c3   :  { %v3178_v37 = vpop.eup %3177  ;;  %134 = vperm.xlu1 %3151, %v107_v36  }
 0x3c4   :  { %v617_v38 = vadd.f32 1.0, %v3178_v37 }
 0x3c6   :  { %3179 = vrcp.f32 %v617_v38  ;;  %v629_v44 = vand.u32 2147483648, %v617_v38  ;;  %v627_v46 = vand.u32 2147483647, %v617_v38  ;;  %vm623_vm5 = vweird.f32 %v617_v38 }
 0x3c7   :  { %3181 = vtanh.f32 %v634_v41 }
 0x3c8   :  { %v630_v47 = vor.u32 1.1754944e-38, %v629_v44  ;;  %vm628_vm7 = vcmp.eq.f32.partialorder %v627_v46, 8.507059e+37 }
 0x3cc   :  { %v3180_v40 = vpop.eup %3179 }
 0x3cd   :  { %v619_v42 = vmul.f32 %v3180_v40, %v617_v38  ;;  %vm624_vm4 = vweird.f32 %v3180_v40  ;;  %v3182_v50 = vpop.eup %3181 }
 0x3ce   :  { %vm625_vm6 = vmor %vm623_vm5, %vm624_vm4 }
 0x3cf   :  { %v620_v43 = vsub.f32 1.0, %v619_v42 }
 0x3d1   :  { %v621_v45 = vmul.f32 %v3180_v40, %v620_v43 }
 0x3d3   :  { %v622_v49 = vadd.f32 %v3180_v40, %v621_v45 }
 0x3d5   :  { %v626_v48 = vsel %vm625_vm6, %v3180_v40, %v622_v49 }
 0x3d6   :  { %v631_v51 = vsel %vm628_vm7, %v630_v47, %v626_v48 }
 0x3d7   :  { %v661_v52 = vmul.f32 %v3182_v50, %v631_v51  ;;  %v660_v3 = vmul.f32 %v631_v51, %v3755_v39 }
 0x3d9   :  { %663 = vrot.lane.b32.xlu0 %v661_v52, %s3455_s1 }
 0x3e1   :  { %129 = vperm.xlu0 %3149, %v106_v53  }
 0x42d   :  { %v638_v54 = vpop.permute.xlu1 %637 }
 0x435   :  { %v135_v55 = vpop.permute.xlu1 %134 }
 0x436   :  { %v165_v56 = vmul.f32 %v3664_v25, %v135_v55  ;;  %v166_v57 = vmul.f32 %v3666_v26, %v135_v55  ;;  %v259_v58 = vmul.f32 %v3670_v28, %v135_v55  ;;  %v258_v60 = vmul.f32 %v3668_v27, %v135_v55 }
 0x438   :  { %v188_v59 = vadd.f32 %v3674_v30, %v166_v57  ;;  %v286_v61 = vrot.slane %v259_v58, 6  ;;  %v187_v62 = vadd.f32 %v3672_v29, %v165_v56 }
 0x43a   :  { %v215_v63 = vrot.slane %v188_v59, 6  ;;  %v294_v0 = vsel %vm219_vm0, %v258_v60, %v286_v61 }
 0x43b   :  { %310 = vst [vmem:[#allocation3 + $0x10] sm:$0xf] %v294_v0 }
 0x43c   :  { %v224_v1 = vsel %vm219_vm0, %v187_v62, %v215_v63 }
 0x43d   :  { %240 = vst [vmem:[#allocation2 + $0x10] sm:$0xf] %v224_v1 }
 0x44b   :  { %v664_v12 = vpop.permute.xlu0 %663 }
 0x44c   :  { %v3804_v20 = vadd.f32 %v664_v12, %v660_v3 }
 0x44e   :  { %3183 = vtanh.f32 %v3804_v20 }
 0x453   :  { %v130_v22 = vpop.permute.xlu0 %129 }
 0x454   :  { %v3184_v23 = vpop.eup %3183  ;;  %v163_v24 = vmul.f32 %v3664_v25, %v130_v22  ;;  %v164_v31 = vmul.f32 %v3666_v26, %v130_v22  ;;  %v257_v32 = vmul.f32 %v3670_v28, %v130_v22  ;;  %v256_v34 = vmul.f32 %v3668_v27, %v130_v22 }
 0x455   :  { %669 = vrot.lane.b32.xlu2 %v3184_v23, %s3455_s1  ;;  %v639_v25 = vrot.slane %v638_v54, 2 }
 0x456   :  { %v186_v33 = vadd.f32 %v3674_v30, %v164_v31  ;;  %v285_v39 = vrot.slane %v257_v32, 6  ;;  %v185_v35 = vadd.f32 %v3672_v29, %v163_v24 }
 0x457   :  { %v3054_v26 = vmul.f32 -1.442695, %v639_v25 }
 0x458   :  { %v214_v36 = vrot.slane %v186_v33, 6  ;;  %v293_v37 = vsel %vm219_vm0, %v256_v34, %v285_v39 }
 0x459   :  { %309 = vst [vmem:[#allocation3 + $0xc] sm:$0xf] %v293_v37  ;;  %3185 = vpow2.f32 %v3054_v26  ;;  %v791_v26 = vld [vmem:[#allocation2 + $0x10] sm:$0xf] }
 0x45a   :  { %v223_v38 = vsel %vm219_vm0, %v185_v35, %v214_v36 }
 0x45b   :  { %239 = vst [vmem:[#allocation2 + $0xc] sm:$0xf] %v223_v38 }
 0x45f   :  { %v3186_v28 = vpop.eup %3185 }
 0x460   :  { %v644_v40 = vadd.f32 1.0, %v3186_v28  ;;  %v793_v37 = vld [vmem:[#allocation3 + $0xc] sm:$0xf] }
 0x462   :  { %3187 = vrcp.f32 %v644_v40  ;;  %v656_v29 = vand.u32 2147483648, %v644_v40  ;;  %vm650_vm11 = vweird.f32 %v644_v40  ;;  %v654_v44 = vand.u32 2147483647, %v644_v40 }
 0x464   :  { %v657_v46 = vor.u32 1.1754944e-38, %v656_v29  ;;  %vm655_vm13 = vcmp.eq.f32.partialorder %v654_v44, 8.507059e+37 }
 0x468   :  { %v3188_v41 = vpop.eup %3187 }
 0x469   :  { %v646_v30 = vmul.f32 %v3188_v41, %v644_v40  ;;  %vm651_vm8 = vweird.f32 %v3188_v41  ;;  %v794_v40 = vadd.f32 %v793_v37, %v791_v26 }
 0x46a   :  { %vm652_vm12 = vmor %vm650_vm11, %vm651_vm8 }
 0x46b   :  { %v647_v42 = vsub.f32 1.0, %v646_v30 }
 0x46d   :  { %v648_v27 = vmul.f32 %v3188_v41, %v647_v42 }
 0x46f   :  { %v649_v43 = vadd.f32 %v3188_v41, %v648_v27 }
 0x471   :  { %v653_v45 = vsel %vm652_vm12, %v3188_v41, %v649_v43 }
 0x472   :  { %v658_v49 = vsel %vm655_vm13, %v657_v46, %v653_v45 }
 0x4af   :  { %v670_v47 = vpop.permute.xlu2 %669 }
 0x4b0   :  { %v672_v48 = vmul.f32 %v670_v47, %v658_v49 }
 0x4b2   :  { %674 = vst.msk [vmem:[#allocation4 + $0x4] sm:$0x3] %vm443_vm9, %v672_v48  ;;  %3055 = vmatmul.msk.f32.vlgmr.msrb.gmra.mxu2 %vm334_vm10, %v672_v48  ;;  %3056 = vmatmul.msk.f32.vlgmr.msrb.gmra.mxu3 %vm334_vm10, %v672_v48 }
 0x4b3   :  { %1150 = vmatpush.msrb.mxu2 %v3537_v4  ;;  %1170 = vmatpush.msrb.mxu3 %v3532_v2  ;;  %v676_v2 = vld [vmem:[#allocation2 + $0xc] sm:$0xf] }
 0x4b5   :  { %1151 = vmatpush.msrb.mxu2 %v3542_v6  ;;  %1171 = vmatpush.msrb.mxu3 %v3540_v5  ;;  %v678_v6 = vld [vmem:[#allocation3 + $0x10] sm:$0xf] }
 0x4b7   :  { %1152 = vmatpush.msrb.mxu2 %v3549_v8  ;;  %1172 = vmatpush.msrb.mxu3 %v3545_v7  ;;  %v679_v8 = vadd.f32 %v678_v6, %v676_v2 }
 0x4b9   :  { %1153 = vmatpush.msrb.mxu2 %v3557_v10  ;;  %1173 = vmatpush.msrb.mxu3 %v3553_v9 }
 0x4bb   :  { %1154 = vmatpush.msrb.mxu2 %v3568_v13  ;;  %1174 = vmatpush.msrb.mxu3 %v3561_v11 }
 0x4bd   :  { %1155 = vmatpush.msrb.mxu2 %v3576_v15  ;;  %1175 = vmatpush.msrb.mxu3 %v3572_v14 }
 0x4bf   :  { %1156 = vmatpush.msrb.mxu2 %v3583_v17  ;;  %1176 = vmatpush.msrb.mxu3 %v3579_v16 }
 0x4c1   :  { %1157 = vmatpush.msrb.mxu2 %v3591_v19  ;;  %1177 = vmatpush.msrb.mxu3 %v3587_v18 }
 0x535   :  { %v720_v4 = vpop.f32.mrf.mxu3  ;;  %v700_v7 = vpop.f32.mrf.mxu2 }
 0x536   :  { %v725_v5 = vrot.slane %v720_v4, 6 }
 0x538   :  { %v726_v9 = vsel %vm219_vm0, %v700_v7, %v725_v5 }
 0x539   :  { %v728_v10 = vadd.f32 %v726_v9, %v679_v8 }
 0x53b   :  { %752 = vrot.lane.b32.xlu0 %v728_v10, %s3455_s1  ;;  %v3057_v11 = vmul.f32 -1.442695, %v728_v10  ;;  %v749_v16 = vrot.slane %v728_v10, 2 }
 0x53d   :  { %3189 = vpow2.f32 %v3057_v11 }
 0x543   :  { %v3190_v13 = vpop.eup %3189 }
 0x544   :  { %v732_v14 = vadd.f32 1.0, %v3190_v13 }
 0x546   :  { %3191 = vrcp.f32 %v732_v14  ;;  %v744_v19 = vand.u32 2147483648, %v732_v14  ;;  %v742_v51 = vand.u32 2147483647, %v732_v14  ;;  %vm738_vm15 = vweird.f32 %v732_v14 }
 0x547   :  { %3193 = vtanh.f32 %v749_v16 }
 0x548   :  { %v745_v53 = vor.u32 1.1754944e-38, %v744_v19  ;;  %vm743_vm2 = vcmp.eq.f32.partialorder %v742_v51, 8.507059e+37 }
 0x54c   :  { %v3192_v15 = vpop.eup %3191 }
 0x54d   :  { %v734_v17 = vmul.f32 %v3192_v15, %v732_v14  ;;  %vm739_vm14 = vweird.f32 %v3192_v15  ;;  %v3194_v55 = vpop.eup %3193 }
 0x54e   :  { %vm740_vm1 = vmor %vm738_vm15, %vm739_vm14 }
 0x54f   :  { %v735_v18 = vsub.f32 1.0, %v734_v17 }
 0x551   :  { %v736_v50 = vmul.f32 %v3192_v15, %v735_v18 }
 0x553   :  { %v737_v52 = vadd.f32 %v3192_v15, %v736_v50 }
 0x555   :  { %v741_v54 = vsel %vm740_vm1, %v3192_v15, %v737_v52 }
 0x556   :  { %v746_v56 = vsel %vm743_vm2, %v745_v53, %v741_v54 }
 0x557   :  { %v776_v57 = vmul.f32 %v3194_v55, %v746_v56  ;;  %v775_v58 = vmul.f32 %v746_v56, %v3804_v20 }
 0x559   :  { %778 = vrot.lane.b32.xlu2 %v776_v57, %s3455_s1 }
 0x5ad   :  { %v753_v62 = vpop.permute.xlu0 %752 }
 0x5ae   :  { %v754_v63 = vrot.slane %v753_v62, 2 }
 0x5b0   :  { %v3058_v0 = vmul.f32 -1.442695, %v754_v63 }
 0x5b3   :  { %v779_v59 = vpop.permute.xlu2 %778 }
 0x5b4   :  { %v3839_v60 = vadd.f32 %v779_v59, %v775_v58 }
 0x5b6   :  { %3195 = vtanh.f32 %v3839_v60 }
 0x5b7   :  { %3197 = vpow2.f32 %v3058_v0  ;;  %v906_v0 = vld [vmem:[#allocation2 + $0x14] sm:$0xf] }
 0x5bc   :  { %v3196_v61 = vpop.eup %3195 }
 0x5bd   :  { %784 = vrot.lane.b32.xlu1 %v3196_v61, %s3455_s1  ;;  %v3198_v1 = vpop.eup %3197  ;;  %v908_v61 = vld [vmem:[#allocation3 + $0x8] sm:$0xf] }
 0x5be   :  { %v759_v3 = vadd.f32 1.0, %v3198_v1 }
 0x5c0   :  { %3199 = vrcp.f32 %v759_v3  ;;  %v771_v31 = vand.u32 2147483648, %v759_v3  ;;  %vm765_vm4 = vweird.f32 %v759_v3  ;;  %v769_v32 = vand.u32 2147483647, %v759_v3 }
 0x5c2   :  { %v772_v34 = vor.u32 1.1754944e-38, %v771_v31  ;;  %vm770_vm6 = vcmp.eq.f32.partialorder %v769_v32, 8.507059e+37 }
 0x5c6   :  { %v3200_v12 = vpop.eup %3199 }
 0x5c7   :  { %v761_v22 = vmul.f32 %v3200_v12, %v759_v3  ;;  %vm766_vm3 = vweird.f32 %v3200_v12  ;;  %v909_v3 = vadd.f32 %v908_v61, %v906_v0  ;;  %v3960_v61 = vld [vmem:[#allocation4 + $0x4] sm:$0x3] }
 0x5c8   :  { %vm767_vm5 = vmor %vm765_vm4, %vm766_vm3 }
 0x5c9   :  { %v762_v23 = vsub.f32 1.0, %v761_v22 }
 0x5cb   :  { %v763_v24 = vmul.f32 %v3200_v12, %v762_v23 }
 0x5cd   :  { %v764_v20 = vadd.f32 %v3200_v12, %v763_v24 }
 0x5cf   :  { %v768_v33 = vsel %vm767_vm5, %v3200_v12, %v764_v20 }
 0x5d0   :  { %v773_v39 = vsel %vm770_vm6, %v772_v34, %v768_v33 }
 0x62f   :  { %v785_v35 = vpop.permute.xlu1 %784 }
 0x630   :  { %v787_v36 = vmul.f32 %v785_v35, %v773_v39 }
 0x632   :  { %789 = vst.msk [vmem:[#allocation4 + $0x6] sm:$0x3] %vm443_vm9, %v787_v36  ;;  %3059 = vmatmul.msk.f32.vlgmr.msra.gmra.mxu0 %vm334_vm10, %v787_v36  ;;  %3060 = vmatmul.msk.f32.vlgmr.msra.gmra.mxu1 %vm334_vm10, %v787_v36 }
 0x6af   :  { %v835_v38 = vpop.f32.mrf.mxu1  ;;  %v815_v28 = vpop.f32.mrf.mxu0 }
 0x6b0   :  { %v840_v25 = vrot.slane %v835_v38, 6 }
 0x6b2   :  { %v841_v41 = vsel %vm219_vm0, %v815_v28, %v840_v25 }
 0x6b3   :  { %v843_v30 = vadd.f32 %v841_v41, %v794_v40  ;;  %v3860_v41 = vld [vmem:[#allocation9 + $0x70] sm:$0xff] }
 0x6b4   :  { %1299 = vmatpush.msra.mxu0 %v3860_v41 }
 0x6b5   :  { %867 = vrot.lane.b32.xlu0 %v843_v30, %s3455_s1  ;;  %v3061_v42 = vmul.f32 -1.442695, %v843_v30  ;;  %v864_v44 = vrot.slane %v843_v30, 2  ;;  %v3862_v30 = vld [vmem:[#allocation9 + $0x78] sm:$0xff] }
 0x6b6   :  { %1319 = vmatpush.msra.mxu1 %v3862_v30 }
 0x6b7   :  { %3201 = vpow2.f32 %v3061_v42  ;;  %v3864_v42 = vld [vmem:[#allocation9 + $0x60] sm:$0xff] }
 0x6b8   :  { %1300 = vmatpush.msra.mxu0 %v3864_v42 }
 0x6bd   :  { %v3202_v27 = vpop.eup %3201 }
 0x6be   :  { %v847_v43 = vadd.f32 1.0, %v3202_v27  ;;  %v3868_v27 = vld [vmem:[#allocation9 + $0x68] sm:$0xff] }
 0x6bf   :  { %1320 = vmatpush.msra.mxu1 %v3868_v27 }
 0x6c0   :  { %3203 = vrcp.f32 %v847_v43  ;;  %v859_v49 = vand.u32 2147483648, %v847_v43  ;;  %v857_v48 = vand.u32 2147483647, %v847_v43  ;;  %vm853_vm8 = vweird.f32 %v847_v43 }
 0x6c1   :  { %3205 = vtanh.f32 %v864_v44  ;;  %v3876_v44 = vld [vmem:[#allocation9 + $0x40] sm:$0xff] }
 0x6c2   :  { %v860_v4 = vor.u32 1.1754944e-38, %v859_v49  ;;  %vm858_vm12 = vcmp.eq.f32.partialorder %v857_v48, 8.507059e+37  ;;  %v3884_v49 = vld [vmem:[#allocation9 + $0x38] sm:$0xff]  ;;  %v3890_v48 = vld [vmem:[#allocation9 + $0x28] sm:$0xff] }
 0x6c6   :  { %v3204_v29 = vpop.eup %3203 }
 0x6c7   :  { %v849_v45 = vmul.f32 %v3204_v29, %v847_v43  ;;  %vm854_vm7 = vweird.f32 %v3204_v29  ;;  %v3206_v6 = vpop.eup %3205  ;;  %v3870_v43 = vld [vmem:[#allocation9 + $0x50] sm:$0xff] }
 0x6c8   :  { %vm855_vm11 = vmor %vm853_vm8, %vm854_vm7  ;;  %1301 = vmatpush.msra.mxu0 %v3870_v43 }
 0x6c9   :  { %v850_v46 = vsub.f32 1.0, %v849_v45  ;;  %v3878_v45 = vld [vmem:[#allocation9 + $0x48] sm:$0xff] }
 0x6ca   :  { %1302 = vmatpush.msra.mxu0 %v3876_v44 }
 0x6cb   :  { %v851_v47 = vmul.f32 %v3204_v29, %v850_v46  ;;  %v3882_v46 = vld [vmem:[#allocation9 + $0x30] sm:$0xff] }
 0x6cc   :  { %1303 = vmatpush.msra.mxu0 %v3882_v46 }
 0x6cd   :  { %v852_v2 = vadd.f32 %v3204_v29, %v851_v47  ;;  %v3888_v47 = vld [vmem:[#allocation9 + $0x20] sm:$0xff] }
 0x6ce   :  { %1304 = vmatpush.msra.mxu0 %v3888_v47 }
 0x6cf   :  { %v856_v5 = vsel %vm855_vm11, %v3204_v29, %v852_v2  ;;  %v3872_v29 = vld [vmem:[#allocation9 + $0x58] sm:$0xff]  ;;  %v3894_v2 = vld [vmem:[#allocation9 + $0x10] sm:$0xff] }
 0x6d0   :  { %v861_v7 = vsel %vm858_vm12, %v860_v4, %v856_v5  ;;  %1321 = vmatpush.msra.mxu1 %v3872_v29  ;;  %v3896_v4 = vld [vmem:[#allocation9 + $0x18] sm:$0xff]  ;;  %1305 = vmatpush.msra.mxu0 %v3894_v2 }
 0x6d1   :  { %v891_v8 = vmul.f32 %v3206_v6, %v861_v7  ;;  %v890_v9 = vmul.f32 %v861_v7, %v3839_v60 }
 0x6d2   :  { %1322 = vmatpush.msra.mxu1 %v3878_v45 }
 0x6d3   :  { %893 = vrot.lane.b32.xlu2 %v891_v8, %s3455_s1 }
 0x6d4   :  { %1323 = vmatpush.msra.mxu1 %v3884_v49 }
 0x6d6   :  { %1324 = vmatpush.msra.mxu1 %v3890_v48 }
 0x6d8   :  { %1325 = vmatpush.msra.mxu1 %v3896_v4 }
 0x727   :  { %v868_v14 = vpop.permute.xlu0 %867 }
 0x728   :  { %v869_v15 = vrot.slane %v868_v14, 2 }
 0x72a   :  { %v3062_v16 = vmul.f32 -1.442695, %v869_v15 }
 0x72d   :  { %v894_v10 = vpop.permute.xlu2 %893 }
 0x72e   :  { %v3850_v11 = vadd.f32 %v894_v10, %v890_v9 }
 0x730   :  { %3207 = vtanh.f32 %v3850_v11 }
 0x731   :  { %3209 = vpow2.f32 %v3062_v16  ;;  %v3907_v16 = vld [vmem:[#allocation9] sm:$0xff] }
 0x732   :  { %1306 = vmatpush.msra.mxu0 %v3907_v16 }
 0x736   :  { %v3208_v13 = vpop.eup %3207 }
 0x737   :  { %899 = vrot.lane.b32.xlu1 %v3208_v13, %s3455_s1  ;;  %v3210_v17 = vpop.eup %3209 }
 0x738   :  { %v874_v18 = vadd.f32 1.0, %v3210_v17  ;;  %v3909_v17 = vld [vmem:[#allocation9 + $0x8] sm:$0xff] }
 0x739   :  { %1326 = vmatpush.msra.mxu1 %v3909_v17 }
 0x73a   :  { %3211 = vrcp.f32 %v874_v18  ;;  %v886_v54 = vand.u32 2147483648, %v874_v18  ;;  %vm880_vm14 = vweird.f32 %v874_v18  ;;  %v884_v55 = vand.u32 2147483647, %v874_v18 }
 0x73c   :  { %v887_v57 = vor.u32 1.1754944e-38, %v886_v54  ;;  %vm885_vm1 = vcmp.eq.f32.partialorder %v884_v55, 8.507059e+37 }
 0x740   :  { %v3212_v19 = vpop.eup %3211 }
 0x741   :  { %v876_v50 = vmul.f32 %v3212_v19, %v874_v18  ;;  %vm881_vm13 = vweird.f32 %v3212_v19 }
 0x742   :  { %vm882_vm15 = vmor %vm880_vm14, %vm881_vm13 }
 0x743   :  { %v877_v51 = vsub.f32 1.0, %v876_v50 }
 0x745   :  { %v878_v52 = vmul.f32 %v3212_v19, %v877_v51 }
 0x747   :  { %v879_v53 = vadd.f32 %v3212_v19, %v878_v52 }
 0x749   :  { %v883_v56 = vsel %vm882_vm15, %v3212_v19, %v879_v53 }
 0x74a   :  { %v888_v58 = vsel %vm885_vm1, %v887_v57, %v883_v56 }
 0x7a9   :  { %v900_v59 = vpop.permute.xlu1 %899 }
 0x7aa   :  { %v902_v60 = vmul.f32 %v900_v59, %v888_v58  ;;  %v3924_v59 = vld [vmem:[#allocation4] sm:$0x3] }
 0x7ac   :  { %904 = vst.msk [vmem:[#allocation4 + $0x8] sm:$0x3] %vm443_vm9, %v902_v60  ;;  %3063 = vmatmul.msk.f32.vlgmr.msra.gmra.mxu2 %vm334_vm10, %v902_v60  ;;  %3064 = vmatmul.msk.f32.vlgmr.msra.gmra.mxu3 %vm334_vm10, %v902_v60  ;;  %v3940_v60 = vld [vmem:[#allocation4 + $0x2] sm:$0x3] }
 0x82f   :  { %v950_v62 = vpop.f32.mrf.mxu3  ;;  %v930_v1 = vpop.f32.mrf.mxu2 }
 0x830   :  { %v955_v63 = vrot.slane %v950_v62, 6  ;;  %v3982_v62 = vld [vmem:[#allocation4 + $0x6] sm:$0x3] }
 0x832   :  { %v956_v12 = vsel %vm219_vm0, %v930_v1, %v955_v63  ;;  %v4004_v63 = vld [vmem:[#allocation4 + $0x8] sm:$0x3]  ;;  %v1023_v1 = vld [vmem:[#allocation3 + $0x4] sm:$0xf] }
 0x833   :  { %v958_v22 = vadd.f32 %v956_v12, %v909_v3 }
 0x835   :  { %982 = vrot.lane.b32.xlu0 %v958_v22, %s3455_s1  ;;  %v3065_v23 = vmul.f32 -1.442695, %v958_v22  ;;  %v979_v32 = vrot.slane %v958_v22, 2 }
 0x837   :  { %3213 = vpow2.f32 %v3065_v23  ;;  %v1021_v23 = vld [vmem:[#allocation2 + $0x18] sm:$0xf] }
 0x83d   :  { %v3214_v24 = vpop.eup %3213 }
 0x83e   :  { %v962_v20 = vadd.f32 1.0, %v3214_v24  ;;  %v1024_v24 = vadd.f32 %v1023_v1, %v1021_v23 }
 0x840   :  { %3215 = vrcp.f32 %v962_v20  ;;  %v974_v39 = vand.u32 2147483648, %v962_v20  ;;  %v972_v36 = vand.u32 2147483647, %v962_v20  ;;  %vm968_vm3 = vweird.f32 %v962_v20 }
 0x841   :  { %3217 = vtanh.f32 %v979_v32 }
 0x842   :  { %v975_v38 = vor.u32 1.1754944e-38, %v974_v39  ;;  %vm973_vm5 = vcmp.eq.f32.partialorder %v972_v36, 8.507059e+37 }
 0x846   :  { %v3216_v31 = vpop.eup %3215 }
 0x847   :  { %v964_v33 = vmul.f32 %v3216_v31, %v962_v20  ;;  %vm969_vm2 = vweird.f32 %v3216_v31  ;;  %v3218_v26 = vpop.eup %3217  ;;  %v1281_v20 = vld [vmem:[%s4587_s7] sm:$0x3]  ;;  %s3456_s7 = smov 96  }
 0x848   :  { %vm970_vm4 = vmor %vm968_vm3, %vm969_vm2  ;;  %v4071_v39 = vperm.slane %v1281_v20, 0 }
 0x849   :  { %v965_v34 = vsub.f32 1.0, %v964_v33  ;;  %v4068_v33 = vperm.slane %v1281_v20, 1 }
 0x84b   :  { %v966_v35 = vmul.f32 %v3216_v31, %v965_v34 }
 0x84d   :  { %v967_v37 = vadd.f32 %v3216_v31, %v966_v35 }
 0x84f   :  { %v971_v25 = vsel %vm970_vm4, %v3216_v31, %v967_v37 }
 0x850   :  { %v976_v28 = vsel %vm973_vm5, %v975_v38, %v971_v25 }
 0x851   :  { %v1006_v40 = vmul.f32 %v3218_v26, %v976_v28  ;;  %v1005_v5 = vmul.f32 %v976_v28, %v3850_v11 }
 0x853   :  { %1008 = vrot.lane.b32.xlu2 %v1006_v40, %s3455_s1 }
 0x8a7   :  { %v983_v9 = vpop.permute.xlu0 %982 }
 0x8a8   :  { %v984_v10 = vrot.slane %v983_v9, 2 }
 0x8aa   :  { %v3066_v13 = vmul.f32 -1.442695, %v984_v10 }
 0x8ad   :  { %v1009_v6 = vpop.permute.xlu2 %1008 }
 0x8ae   :  { %v3903_v7 = vadd.f32 %v1009_v6, %v1005_v5 }
 0x8b0   :  { %3219 = vtanh.f32 %v3903_v7 }
 0x8b1   :  { %3221 = vpow2.f32 %v3066_v13 }
 0x8b6   :  { %v3220_v8 = vpop.eup %3219 }
 0x8b7   :  { %1014 = vrot.lane.b32.xlu1 %v3220_v8, %s3455_s1  ;;  %v3222_v14 = vpop.eup %3221 }
 0x8b8   :  { %v989_v15 = vadd.f32 1.0, %v3222_v14 }
 0x8ba   :  { %3223 = vrcp.f32 %v989_v15  ;;  %v1001_v52 = vand.u32 2147483648, %v989_v15  ;;  %vm995_vm7 = vweird.f32 %v989_v15  ;;  %v999_v53 = vand.u32 2147483647, %v989_v15 }
 0x8bc   :  { %v1002_v55 = vor.u32 1.1754944e-38, %v1001_v52  ;;  %vm1000_vm11 = vcmp.eq.f32.partialorder %v999_v53, 8.507059e+37 }
 0x8c0   :  { %v3224_v11 = vpop.eup %3223 }
 0x8c1   :  { %v991_v18 = vmul.f32 %v3224_v11, %v989_v15  ;;  %vm996_vm6 = vweird.f32 %v3224_v11 }
 0x8c2   :  { %vm997_vm8 = vmor %vm995_vm7, %vm996_vm6 }
 0x8c3   :  { %v992_v19 = vsub.f32 1.0, %v991_v18 }
 0x8c5   :  { %v993_v50 = vmul.f32 %v3224_v11, %v992_v19 }
 0x8c7   :  { %v994_v51 = vadd.f32 %v3224_v11, %v993_v50 }
 0x8c9   :  { %v998_v54 = vsel %vm997_vm8, %v3224_v11, %v994_v51 }
 0x8ca   :  { %v1003_v56 = vsel %vm1000_vm11, %v1002_v55, %v998_v54 }
 0x929   :  { %v1015_v57 = vpop.permute.xlu1 %1014 }
 0x92a   :  { %v1017_v58 = vmul.f32 %v1015_v57, %v1003_v56 }
 0x92c   :  { %1019 = vst.msk [vmem:[#allocation4 + $0xa] sm:$0x3] %vm443_vm9, %v1017_v58  ;;  %3067 = vmatmul.msk.f32.vlgmr.msrb.gmra.mxu0 %vm334_vm10, %v1017_v58  ;;  %3068 = vmatmul.msk.f32.vlgmr.msrb.gmra.mxu1 %vm334_vm10, %v1017_v58 }
 0x92d   :  { %1395 = vmatpush.msrb.mxu0 %v3860_v41  ;;  %1415 = vmatpush.msrb.mxu1 %v3862_v30 }
 0x92f   :  { %1396 = vmatpush.msrb.mxu0 %v3864_v42  ;;  %1416 = vmatpush.msrb.mxu1 %v3868_v27 }
 0x931   :  { %1397 = vmatpush.msrb.mxu0 %v3870_v43  ;;  %1417 = vmatpush.msrb.mxu1 %v3872_v29 }
 0x933   :  { %1398 = vmatpush.msrb.mxu0 %v3876_v44  ;;  %1418 = vmatpush.msrb.mxu1 %v3878_v45  ;;  %v4026_v0 = vld [vmem:[#allocation4 + $0xa] sm:$0x3] }
 0x934   :  { %3075 = vmatmul.msk.f32.vlgmr.msra.gmra.mxu0 %vm334_vm10, %v3924_v59  ;;  %3076 = vmatmul.msk.f32.vlgmr.msra.gmra.mxu1 %vm334_vm10, %v3924_v59 }
 0x935   :  { %1399 = vmatpush.msrb.mxu0 %v3882_v46  ;;  %1419 = vmatpush.msrb.mxu1 %v3884_v49 }
 0x937   :  { %1400 = vmatpush.msrb.mxu0 %v3888_v47  ;;  %1420 = vmatpush.msrb.mxu1 %v3890_v48 }
 0x939   :  { %1401 = vmatpush.msrb.mxu0 %v3894_v2  ;;  %1421 = vmatpush.msrb.mxu1 %v3896_v4 }
 0x93b   :  { %1402 = vmatpush.msrb.mxu0 %v3907_v16  ;;  %1422 = vmatpush.msrb.mxu1 %v3909_v17 }
 0x93c   :  { %3079 = vmatmul.msk.f32.vlgmr.msrb.gmra.mxu0 %vm334_vm10, %v3940_v60  ;;  %3080 = vmatmul.msk.f32.vlgmr.msrb.gmra.mxu1 %vm334_vm10, %v3940_v60 }
 0x93d   :  { %1491 = vmatpush.msra.mxu0 %v3860_v41  ;;  %1511 = vmatpush.msra.mxu1 %v3862_v30 }
 0x93f   :  { %1492 = vmatpush.msra.mxu0 %v3864_v42  ;;  %1512 = vmatpush.msra.mxu1 %v3868_v27 }
 0x941   :  { %1493 = vmatpush.msra.mxu0 %v3870_v43  ;;  %1513 = vmatpush.msra.mxu1 %v3872_v29 }
 0x943   :  { %1494 = vmatpush.msra.mxu0 %v3876_v44  ;;  %1514 = vmatpush.msra.mxu1 %v3878_v45 }
 0x945   :  { %1495 = vmatpush.msra.mxu0 %v3882_v46  ;;  %1515 = vmatpush.msra.mxu1 %v3884_v49 }
 0x947   :  { %1496 = vmatpush.msra.mxu0 %v3888_v47  ;;  %1516 = vmatpush.msra.mxu1 %v3890_v48 }
 0x949   :  { %1497 = vmatpush.msra.mxu0 %v3894_v2  ;;  %1517 = vmatpush.msra.mxu1 %v3896_v4 }
 0x94b   :  { %1498 = vmatpush.msra.mxu0 %v3907_v16  ;;  %1518 = vmatpush.msra.mxu1 %v3909_v17 }
 0x94c   :  { %3083 = vmatmul.msk.f32.vlgmr.msra.gmra.mxu0 %vm334_vm10, %v3960_v61  ;;  %3084 = vmatmul.msk.f32.vlgmr.msra.gmra.mxu1 %vm334_vm10, %v3960_v61 }
 0x94d   :  { %1587 = vmatpush.msrb.mxu0 %v3860_v41  ;;  %1607 = vmatpush.msrb.mxu1 %v3862_v30 }
 0x94f   :  { %1588 = vmatpush.msrb.mxu0 %v3864_v42  ;;  %1608 = vmatpush.msrb.mxu1 %v3868_v27 }
 0x951   :  { %1589 = vmatpush.msrb.mxu0 %v3870_v43  ;;  %1609 = vmatpush.msrb.mxu1 %v3872_v29 }
 0x953   :  { %1590 = vmatpush.msrb.mxu0 %v3876_v44  ;;  %1610 = vmatpush.msrb.mxu1 %v3878_v45 }
 0x955   :  { %1591 = vmatpush.msrb.mxu0 %v3882_v46  ;;  %1611 = vmatpush.msrb.mxu1 %v3884_v49 }
 0x957   :  { %1592 = vmatpush.msrb.mxu0 %v3888_v47  ;;  %1612 = vmatpush.msrb.mxu1 %v3890_v48 }
 0x959   :  { %1593 = vmatpush.msrb.mxu0 %v3894_v2  ;;  %1613 = vmatpush.msrb.mxu1 %v3896_v4 }
 0x95b   :  { %1594 = vmatpush.msrb.mxu0 %v3907_v16  ;;  %1614 = vmatpush.msrb.mxu1 %v3909_v17 }
 0x95c   :  { %3087 = vmatmul.msk.f32.vlgmr.msrb.gmra.mxu0 %vm334_vm10, %v3982_v62  ;;  %3088 = vmatmul.msk.f32.vlgmr.msrb.gmra.mxu1 %vm334_vm10, %v3982_v62 }
 0x95d   :  { %1683 = vmatpush.msra.mxu0 %v3860_v41  ;;  %1703 = vmatpush.msra.mxu1 %v3862_v30 }
 0x95f   :  { %1684 = vmatpush.msra.mxu0 %v3864_v42  ;;  %1704 = vmatpush.msra.mxu1 %v3868_v27 }
 0x961   :  { %1685 = vmatpush.msra.mxu0 %v3870_v43  ;;  %1705 = vmatpush.msra.mxu1 %v3872_v29 }
 0x963   :  { %1686 = vmatpush.msra.mxu0 %v3876_v44  ;;  %1706 = vmatpush.msra.mxu1 %v3878_v45 }
 0x965   :  { %1687 = vmatpush.msra.mxu0 %v3882_v46  ;;  %1707 = vmatpush.msra.mxu1 %v3884_v49 }
 0x967   :  { %1688 = vmatpush.msra.mxu0 %v3888_v47  ;;  %1708 = vmatpush.msra.mxu1 %v3890_v48 }
 0x969   :  { %1689 = vmatpush.msra.mxu0 %v3894_v2  ;;  %1709 = vmatpush.msra.mxu1 %v3896_v4 }
 0x96b   :  { %1690 = vmatpush.msra.mxu0 %v3907_v16  ;;  %1710 = vmatpush.msra.mxu1 %v3909_v17 }
 0x96c   :  { %3091 = vmatmul.msk.f32.vlgmr.msra.gmra.mxu0 %vm334_vm10, %v4004_v63  ;;  %3092 = vmatmul.msk.f32.vlgmr.msra.gmra.mxu1 %vm334_vm10, %v4004_v63 }
 0x96d   :  { %1779 = vmatpush.msrb.mxu0 %v3860_v41  ;;  %1799 = vmatpush.msrb.mxu1 %v3862_v30 }
 0x96f   :  { %1780 = vmatpush.msrb.mxu0 %v3864_v42  ;;  %1800 = vmatpush.msrb.mxu1 %v3868_v27 }
 0x971   :  { %1781 = vmatpush.msrb.mxu0 %v3870_v43  ;;  %1801 = vmatpush.msrb.mxu1 %v3872_v29 }
 0x973   :  { %1782 = vmatpush.msrb.mxu0 %v3876_v44  ;;  %1802 = vmatpush.msrb.mxu1 %v3878_v45 }
 0x975   :  { %1783 = vmatpush.msrb.mxu0 %v3882_v46  ;;  %1803 = vmatpush.msrb.mxu1 %v3884_v49 }
 0x977   :  { %1784 = vmatpush.msrb.mxu0 %v3888_v47  ;;  %1804 = vmatpush.msrb.mxu1 %v3890_v48 }
 0x979   :  { %1785 = vmatpush.msrb.mxu0 %v3894_v2  ;;  %1805 = vmatpush.msrb.mxu1 %v3896_v4 }
 0x97b   :  { %1786 = vmatpush.msrb.mxu0 %v3907_v16  ;;  %1806 = vmatpush.msrb.mxu1 %v3909_v17 }
 0x97c   :  { %3095 = vmatmul.msk.f32.vlgmr.msrb.gmra.mxu0 %vm334_vm10, %v4026_v0  ;;  %3096 = vmatmul.msk.f32.vlgmr.msrb.gmra.mxu1 %vm334_vm10, %v4026_v0 }
 0x97d   :  { %1875 = vmatpush.msra.mxu0 %v3860_v41  ;;  %1895 = vmatpush.msra.mxu1 %v3862_v30 }
 0x97f   :  { %1876 = vmatpush.msra.mxu0 %v3864_v42  ;;  %1896 = vmatpush.msra.mxu1 %v3868_v27 }
 0x981   :  { %1877 = vmatpush.msra.mxu0 %v3870_v43  ;;  %1897 = vmatpush.msra.mxu1 %v3872_v29 }
 0x983   :  { %1878 = vmatpush.msra.mxu0 %v3876_v44  ;;  %1898 = vmatpush.msra.mxu1 %v3878_v45 }
 0x985   :  { %1879 = vmatpush.msra.mxu0 %v3882_v46  ;;  %1899 = vmatpush.msra.mxu1 %v3884_v49 }
 0x987   :  { %1880 = vmatpush.msra.mxu0 %v3888_v47  ;;  %1900 = vmatpush.msra.mxu1 %v3890_v48 }
 0x989   :  { %1881 = vmatpush.msra.mxu0 %v3894_v2  ;;  %1901 = vmatpush.msra.mxu1 %v3896_v4 }
 0x98b   :  { %1882 = vmatpush.msra.mxu0 %v3907_v16  ;;  %1902 = vmatpush.msra.mxu1 %v3909_v17 }
 0x98d   :  { %1971 = vmatpush.msrb.mxu0 %v3860_v41  ;;  %1991 = vmatpush.msrb.mxu1 %v3862_v30 }
 0x98f   :  { %1972 = vmatpush.msrb.mxu0 %v3864_v42  ;;  %1992 = vmatpush.msrb.mxu1 %v3868_v27 }
 0x991   :  { %1973 = vmatpush.msrb.mxu0 %v3870_v43  ;;  %1993 = vmatpush.msrb.mxu1 %v3872_v29 }
 0x993   :  { %1974 = vmatpush.msrb.mxu0 %v3876_v44  ;;  %1994 = vmatpush.msrb.mxu1 %v3878_v45 }
 0x995   :  { %1975 = vmatpush.msrb.mxu0 %v3882_v46  ;;  %1995 = vmatpush.msrb.mxu1 %v3884_v49 }
 0x997   :  { %1976 = vmatpush.msrb.mxu0 %v3888_v47  ;;  %1996 = vmatpush.msrb.mxu1 %v3890_v48 }
 0x999   :  { %1977 = vmatpush.msrb.mxu0 %v3894_v2  ;;  %1997 = vmatpush.msrb.mxu1 %v3896_v4 }
 0x99b   :  { %1978 = vmatpush.msrb.mxu0 %v3907_v16  ;;  %1998 = vmatpush.msrb.mxu1 %v3909_v17 }
 0x9a9   :  { %v1045_v3 = vpop.f32.mrf.mxu0  ;;  %v1065_v12 = vpop.f32.mrf.mxu1 }
 0x9aa   :  { %v1070_v22 = vrot.slane %v1065_v12, 6 }
 0x9ac   :  { %v1071_v31 = vsel %vm219_vm0, %v1045_v3, %v1070_v22 }
 0x9ad   :  { %v1073_v32 = vadd.f32 %v1071_v31, %v1024_v24  ;;  %v4092_v31 = vld [vmem:[#allocation11 + $0x70] sm:$0xff] }
 0x9ae   :  { %1345 = vmatpush.msra.mxu2 %v4092_v31 }
 0x9af   :  { %1097 = vrot.lane.b32.xlu0 %v1073_v32, %s3455_s1  ;;  %v3069_v34 = vmul.f32 -1.442695, %v1073_v32  ;;  %v1094_v45 = vrot.slane %v1073_v32, 2  ;;  %v4094_v32 = vld [vmem:[#allocation11 + $0x78] sm:$0xff] }
 0x9b0   :  { %1365 = vmatpush.msra.mxu3 %v4094_v32 }
 0x9b1   :  { %3225 = vpow2.f32 %v3069_v34  ;;  %v1308_v35 = vpop.f32.mrf.mxu0  ;;  %v1328_v36 = vpop.f32.mrf.mxu1  ;;  %v4096_v34 = vld [vmem:[#allocation11 + $0x60] sm:$0xff] }
 0x9b2   :  { %v1329_v37 = vadd.f32 %v1328_v36, %v4068_v33  ;;  %v1309_v38 = vadd.f32 %v1308_v35, %v4071_v39  ;;  %v4100_v35 = vld [vmem:[#allocation11 + $0x68] sm:$0xff]  ;;  %v4102_v36 = vld [vmem:[#allocation11 + $0x50] sm:$0xff]  ;;  %1346 = vmatpush.msra.mxu2 %v4096_v34 }
 0x9b3   :  { %1366 = vmatpush.msra.mxu3 %v4100_v35 }
 0x9b4   :  { %v1333_v25 = vrot.slane %v1329_v37, 6  ;;  %v4104_v37 = vld [vmem:[#allocation11 + $0x58] sm:$0xff]  ;;  %1347 = vmatpush.msra.mxu2 %v4102_v36 }
 0x9b5   :  { %1367 = vmatpush.msra.mxu3 %v4104_v37 }
 0x9b6   :  { %v1334_v26 = vsel %vm219_vm0, %v1309_v38, %v1333_v25  ;;  %v4108_v38 = vld [vmem:[#allocation11 + $0x40] sm:$0xff]  ;;  %v4110_v25 = vld [vmem:[#allocation11 + $0x48] sm:$0xff] }
 0x9b7   :  { %v3226_v28 = vpop.eup %3225  ;;  %1336 = vst [vmem:[#allocation2] sm:$0xf] %v1334_v26  ;;  %v4114_v26 = vld [vmem:[#allocation11 + $0x30] sm:$0xff]  ;;  %1348 = vmatpush.msra.mxu2 %v4108_v38  ;;  %1368 = vmatpush.msra.mxu3 %v4110_v25 }
 0x9b8   :  { %v1077_v40 = vadd.f32 1.0, %v3226_v28  ;;  %v4116_v28 = vld [vmem:[#allocation11 + $0x38] sm:$0xff] }
 0x9b9   :  { %v1404_v41 = vpop.f32.mrf.mxu0  ;;  %v1424_v30 = vpop.f32.mrf.mxu1  ;;  %1349 = vmatpush.msra.mxu2 %v4114_v26  ;;  %1369 = vmatpush.msra.mxu3 %v4116_v28 }
 0x9ba   :  { %3227 = vrcp.f32 %v1077_v40  ;;  %v1425_v42 = vadd.f32 %v1424_v30, %v4068_v33  ;;  %v1405_v27 = vadd.f32 %v1404_v41, %v4071_v39  ;;  %v1089_v47 = vand.u32 2147483648, %v1077_v40  ;;  %v4122_v41 = vld [vmem:[#allocation11 + $0x28] sm:$0xff]  ;;  %v4126_v30 = vld [vmem:[#allocation11 + $0x10] sm:$0xff] }
 0x9bb   :  { %3229 = vtanh.f32 %v1094_v45  ;;  %v1087_v2 = vand.u32 2147483647, %v1077_v40  ;;  %vm1083_vm13 = vweird.f32 %v1077_v40  ;;  %1370 = vmatpush.msra.mxu3 %v4122_v41 }
 0x9bc   :  { %v1429_v43 = vrot.slane %v1425_v42, 6  ;;  %v1090_v8 = vor.u32 1.1754944e-38, %v1089_v47  ;;  %v4128_v42 = vld [vmem:[#allocation11 + $0x18] sm:$0xff] }
 0x9bd   :  { %vm1088_vm15 = vcmp.eq.f32.partialorder %v1087_v2, 8.507059e+37  ;;  %1371 = vmatpush.msra.mxu3 %v4128_v42  ;;  %v4139_v2 = vld [vmem:[#allocation11] sm:$0xff] }
 0x9be   :  { %v1430_v29 = vsel %vm219_vm0, %v1405_v27, %v1429_v43 }
 0x9bf   :  { %1432 = vst [vmem:[#allocation2 + $0x4] sm:$0xf] %v1430_v29 }
 0x9c0   :  { %v3228_v44 = vpop.eup %3227 }
 0x9c1   :  { %v1079_v46 = vmul.f32 %v3228_v44, %v1077_v40  ;;  %vm1084_vm12 = vweird.f32 %v3228_v44  ;;  %v3230_v13 = vpop.eup %3229  ;;  %v4120_v40 = vld [vmem:[#allocation11 + $0x20] sm:$0xff] }
 0x9c2   :  { %vm1085_vm14 = vmor %vm1083_vm13, %vm1084_vm12  ;;  %1350 = vmatpush.msra.mxu2 %v4120_v40 }
 0x9c3   :  { %v1080_v49 = vsub.f32 1.0, %v1079_v46 }
 0x9c4   :  { %1351 = vmatpush.msra.mxu2 %v4126_v30 }
 0x9c5   :  { %v1081_v48 = vmul.f32 %v3228_v44, %v1080_v49 }
 0x9c6   :  { %1352 = vmatpush.msra.mxu2 %v4139_v2 }
 0x9c7   :  { %v1082_v4 = vadd.f32 %v3228_v44, %v1081_v48 }
 0x9c9   :  { %v1500_v5 = vpop.f32.mrf.mxu0  ;;  %v1520_v6 = vpop.f32.mrf.mxu1  ;;  %v1086_v10 = vsel %vm1085_vm14, %v3228_v44, %v1082_v4  ;;  %v4141_v4 = vld [vmem:[#allocation11 + $0x8] sm:$0xff] }
 0x9ca   :  { %v1521_v9 = vadd.f32 %v1520_v6, %v4068_v33  ;;  %v1091_v14 = vsel %vm1088_vm15, %v1090_v8, %v1086_v10  ;;  %v1501_v15 = vadd.f32 %v1500_v5, %v4071_v39  ;;  %1372 = vmatpush.msra.mxu3 %v4141_v4 }
 0x9cb   :  { %v1121_v17 = vmul.f32 %v3230_v13, %v1091_v14  ;;  %v1120_v27 = vmul.f32 %v1091_v14, %v3903_v7 }
 0x9cc   :  { %v1525_v16 = vrot.slane %v1521_v9, 6 }
 0x9cd   :  { %1123 = vrot.lane.b32.xlu2 %v1121_v17, %s3455_s1 }
 0x9ce   :  { %v1526_v11 = vsel %vm219_vm0, %v1501_v15, %v1525_v16 }
 0x9cf   :  { %1528 = vst [vmem:[#allocation2 + $0x8] sm:$0xf] %v1526_v11 }
 0x9d9   :  { %v1596_v18 = vpop.f32.mrf.mxu0  ;;  %v1616_v19 = vpop.f32.mrf.mxu1 }
 0x9da   :  { %v1617_v50 = vadd.f32 %v1616_v19, %v4068_v33  ;;  %v1597_v51 = vadd.f32 %v1596_v18, %v4071_v39 }
 0x9dc   :  { %v1621_v52 = vrot.slane %v1617_v50, 6 }
 0x9de   :  { %v1622_v53 = vsel %vm219_vm0, %v1597_v51, %v1621_v52 }
 0x9df   :  { %1624 = vst [vmem:[#allocation2 + $0xc] sm:$0xf] %v1622_v53 }
 0x9e9   :  { %v1692_v54 = vpop.f32.mrf.mxu0  ;;  %v1712_v55 = vpop.f32.mrf.mxu1 }
 0x9ea   :  { %v1713_v56 = vadd.f32 %v1712_v55, %v4068_v33  ;;  %v1693_v57 = vadd.f32 %v1692_v54, %v4071_v39 }
 0x9ec   :  { %v1717_v58 = vrot.slane %v1713_v56, 6 }
 0x9ee   :  { %v1718_v1 = vsel %vm219_vm0, %v1693_v57, %v1717_v58 }
 0x9ef   :  { %1720 = vst [vmem:[#allocation2 + $0x10] sm:$0xf] %v1718_v1 }
 0x9f9   :  { %v1788_v3 = vpop.f32.mrf.mxu0  ;;  %v1808_v12 = vpop.f32.mrf.mxu1 }
 0x9fa   :  { %v1809_v22 = vadd.f32 %v1808_v12, %v4068_v33  ;;  %v1789_v23 = vadd.f32 %v1788_v3, %v4071_v39 }
 0x9fc   :  { %v1813_v24 = vrot.slane %v1809_v22, 6 }
 0x9fe   :  { %v1814_v20 = vsel %vm219_vm0, %v1789_v23, %v1813_v24 }
 0x9ff   :  { %1816 = vst [vmem:[#allocation2 + $0x14] sm:$0xf] %v1814_v20 }
 0xa21   :  { %v1098_v45 = vpop.permute.xlu0 %1097 }
 0xa22   :  { %v1099_v46 = vrot.slane %v1098_v45, 2 }
 0xa24   :  { %v3070_v49 = vmul.f32 -1.442695, %v1099_v46 }
 0xa27   :  { %v1124_v43 = vpop.permute.xlu2 %1123 }
 0xa28   :  { %v4135_v29 = vadd.f32 %v1124_v43, %v1120_v27 }
 0xa2a   :  { %3231 = vtanh.f32 %v4135_v29 }
 0xa2b   :  { %3233 = vpow2.f32 %v3070_v49 }
 0xa30   :  { %v3232_v44 = vpop.eup %3231 }
 0xa31   :  { %1129 = vrot.lane.b32.xlu1 %v3232_v44, %s3455_s1  ;;  %v3234_v47 = vpop.eup %3233 }
 0xa32   :  { %v1104_v48 = vadd.f32 1.0, %v3234_v47 }
 0xa34   :  { %3235 = vrcp.f32 %v1104_v48  ;;  %v1116_v10 = vand.u32 2147483648, %v1104_v48  ;;  %vm1110_vm2 = vweird.f32 %v1104_v48  ;;  %v1114_v13 = vand.u32 2147483647, %v1104_v48 }
 0xa36   :  { %v1117_v15 = vor.u32 1.1754944e-38, %v1116_v10  ;;  %vm1115_vm4 = vcmp.eq.f32.partialorder %v1114_v13, 8.507059e+37 }
 0xa3a   :  { %v3236_v7 = vpop.eup %3235 }
 0xa3b   :  { %v1106_v5 = vmul.f32 %v3236_v7, %v1104_v48  ;;  %vm1111_vm1 = vweird.f32 %v3236_v7 }
 0xa3c   :  { %vm1112_vm3 = vmor %vm1110_vm2, %vm1111_vm1 }
 0xa3d   :  { %v1107_v6 = vsub.f32 1.0, %v1106_v5 }
 0xa3f   :  { %v1108_v8 = vmul.f32 %v3236_v7, %v1107_v6 }
 0xa41   :  { %v1109_v9 = vadd.f32 %v3236_v7, %v1108_v8 }
 0xa43   :  { %v1113_v14 = vsel %vm1112_vm3, %v3236_v7, %v1109_v9 }
 0xa44   :  { %v1118_v16 = vsel %vm1115_vm4, %v1117_v15, %v1113_v14 }
 0xaa3   :  { %v1130_v17 = vpop.permute.xlu1 %1129 }
 0xaa4   :  { %v1132_v11 = vmul.f32 %v1130_v17, %v1118_v16 }
 0xaa6   :  { %1134 = vst.msk [vmem:[#allocation4 + $0xc] sm:$0x3] %vm443_vm9, %v1132_v11  ;;  %3071 = vmatmul.msk.f32.vlgmr.msrb.gmra.mxu2 %vm334_vm10, %v1132_v11  ;;  %3072 = vmatmul.msk.f32.vlgmr.msrb.gmra.mxu3 %vm334_vm10, %v1132_v11 }
 0xaa7   :  { %1441 = vmatpush.msrb.mxu2 %v4092_v31  ;;  %1461 = vmatpush.msrb.mxu3 %v4094_v32 }
 0xaa9   :  { %1442 = vmatpush.msrb.mxu2 %v4096_v34  ;;  %1462 = vmatpush.msrb.mxu3 %v4100_v35 }
 0xaab   :  { %1443 = vmatpush.msrb.mxu2 %v4102_v36  ;;  %1463 = vmatpush.msrb.mxu3 %v4104_v37 }
 0xaad   :  { %1444 = vmatpush.msrb.mxu2 %v4108_v38  ;;  %1464 = vmatpush.msrb.mxu3 %v4110_v25  ;;  %v4156_v18 = vld [vmem:[#allocation4 + $0xc] sm:$0x3] }
 0xaae   :  { %3077 = vmatmul.msk.f32.vlgmr.msra.gmra.mxu2 %vm334_vm10, %v3924_v59  ;;  %3078 = vmatmul.msk.f32.vlgmr.msra.gmra.mxu3 %vm334_vm10, %v3924_v59  ;;  %v1136_v59 = vld [vmem:[#allocation2 + $0x1c] sm:$0xf] }
 0xaaf   :  { %1445 = vmatpush.msrb.mxu2 %v4114_v26  ;;  %1465 = vmatpush.msrb.mxu3 %v4116_v28 }
 0xab0   :  { %3099 = vmatmul.msk.f32.vlgmr.msra.gmra.mxu0 %vm334_vm10, %v4156_v18  ;;  %3100 = vmatmul.msk.f32.vlgmr.msra.gmra.mxu1 %vm334_vm10, %v4156_v18 }
 0xab1   :  { %1446 = vmatpush.msrb.mxu2 %v4120_v40  ;;  %1466 = vmatpush.msrb.mxu3 %v4122_v41 }
 0xab3   :  { %1447 = vmatpush.msrb.mxu2 %v4126_v30  ;;  %1467 = vmatpush.msrb.mxu3 %v4128_v42 }
 0xab5   :  { %1448 = vmatpush.msrb.mxu2 %v4139_v2  ;;  %1468 = vmatpush.msrb.mxu3 %v4141_v4 }
 0xab6   :  { %3081 = vmatmul.msk.f32.vlgmr.msrb.gmra.mxu2 %vm334_vm10, %v3940_v60  ;;  %3082 = vmatmul.msk.f32.vlgmr.msrb.gmra.mxu3 %vm334_vm10, %v3940_v60 }
 0xab7   :  { %1537 = vmatpush.msra.mxu2 %v4092_v31  ;;  %1557 = vmatpush.msra.mxu3 %v4094_v32 }
 0xab9   :  { %1538 = vmatpush.msra.mxu2 %v4096_v34  ;;  %1558 = vmatpush.msra.mxu3 %v4100_v35 }
 0xabb   :  { %1539 = vmatpush.msra.mxu2 %v4102_v36  ;;  %1559 = vmatpush.msra.mxu3 %v4104_v37 }
 0xabd   :  { %1540 = vmatpush.msra.mxu2 %v4108_v38  ;;  %1560 = vmatpush.msra.mxu3 %v4110_v25 }
 0xabf   :  { %1541 = vmatpush.msra.mxu2 %v4114_v26  ;;  %1561 = vmatpush.msra.mxu3 %v4116_v28 }
 0xac1   :  { %1542 = vmatpush.msra.mxu2 %v4120_v40  ;;  %1562 = vmatpush.msra.mxu3 %v4122_v41 }
 0xac3   :  { %1543 = vmatpush.msra.mxu2 %v4126_v30  ;;  %1563 = vmatpush.msra.mxu3 %v4128_v42 }
 0xac5   :  { %1544 = vmatpush.msra.mxu2 %v4139_v2  ;;  %1564 = vmatpush.msra.mxu3 %v4141_v4 }
 0xac6   :  { %3085 = vmatmul.msk.f32.vlgmr.msra.gmra.mxu2 %vm334_vm10, %v3960_v61  ;;  %3086 = vmatmul.msk.f32.vlgmr.msra.gmra.mxu3 %vm334_vm10, %v3960_v61 }
 0xac7   :  { %1633 = vmatpush.msrb.mxu2 %v4092_v31  ;;  %1653 = vmatpush.msrb.mxu3 %v4094_v32 }
 0xac9   :  { %1634 = vmatpush.msrb.mxu2 %v4096_v34  ;;  %1654 = vmatpush.msrb.mxu3 %v4100_v35 }
 0xacb   :  { %1635 = vmatpush.msrb.mxu2 %v4102_v36  ;;  %1655 = vmatpush.msrb.mxu3 %v4104_v37 }
 0xacd   :  { %1636 = vmatpush.msrb.mxu2 %v4108_v38  ;;  %1656 = vmatpush.msrb.mxu3 %v4110_v25 }
 0xacf   :  { %1637 = vmatpush.msrb.mxu2 %v4114_v26  ;;  %1657 = vmatpush.msrb.mxu3 %v4116_v28 }
 0xad1   :  { %1638 = vmatpush.msrb.mxu2 %v4120_v40  ;;  %1658 = vmatpush.msrb.mxu3 %v4122_v41 }
 0xad3   :  { %1639 = vmatpush.msrb.mxu2 %v4126_v30  ;;  %1659 = vmatpush.msrb.mxu3 %v4128_v42 }
 0xad5   :  { %1640 = vmatpush.msrb.mxu2 %v4139_v2  ;;  %1660 = vmatpush.msrb.mxu3 %v4141_v4 }
 0xad6   :  { %3089 = vmatmul.msk.f32.vlgmr.msrb.gmra.mxu2 %vm334_vm10, %v3982_v62  ;;  %3090 = vmatmul.msk.f32.vlgmr.msrb.gmra.mxu3 %vm334_vm10, %v3982_v62 }
 0xad7   :  { %1729 = vmatpush.msra.mxu2 %v4092_v31  ;;  %1749 = vmatpush.msra.mxu3 %v4094_v32 }
 0xad9   :  { %1730 = vmatpush.msra.mxu2 %v4096_v34  ;;  %1750 = vmatpush.msra.mxu3 %v4100_v35 }
 0xadb   :  { %1731 = vmatpush.msra.mxu2 %v4102_v36  ;;  %1751 = vmatpush.msra.mxu3 %v4104_v37 }
 0xadd   :  { %1732 = vmatpush.msra.mxu2 %v4108_v38  ;;  %1752 = vmatpush.msra.mxu3 %v4110_v25 }
 0xadf   :  { %1733 = vmatpush.msra.mxu2 %v4114_v26  ;;  %1753 = vmatpush.msra.mxu3 %v4116_v28 }
 0xae1   :  { %1734 = vmatpush.msra.mxu2 %v4120_v40  ;;  %1754 = vmatpush.msra.mxu3 %v4122_v41 }
 0xae3   :  { %1735 = vmatpush.msra.mxu2 %v4126_v30  ;;  %1755 = vmatpush.msra.mxu3 %v4128_v42 }
 0xae5   :  { %1736 = vmatpush.msra.mxu2 %v4139_v2  ;;  %1756 = vmatpush.msra.mxu3 %v4141_v4 }
 0xae6   :  { %3093 = vmatmul.msk.f32.vlgmr.msra.gmra.mxu2 %vm334_vm10, %v4004_v63  ;;  %3094 = vmatmul.msk.f32.vlgmr.msra.gmra.mxu3 %vm334_vm10, %v4004_v63  ;;  %v1137_v63 = vld [vmem:[#allocation3] sm:$0xf] }
 0xae7   :  { %1825 = vmatpush.msrb.mxu2 %v4092_v31  ;;  %1845 = vmatpush.msrb.mxu3 %v4094_v32 }
 0xae9   :  { %1826 = vmatpush.msrb.mxu2 %v4096_v34  ;;  %1846 = vmatpush.msrb.mxu3 %v4100_v35 }
 0xaeb   :  { %1827 = vmatpush.msrb.mxu2 %v4102_v36  ;;  %1847 = vmatpush.msrb.mxu3 %v4104_v37 }
 0xaed   :  { %1828 = vmatpush.msrb.mxu2 %v4108_v38  ;;  %1848 = vmatpush.msrb.mxu3 %v4110_v25 }
 0xaef   :  { %1829 = vmatpush.msrb.mxu2 %v4114_v26  ;;  %1849 = vmatpush.msrb.mxu3 %v4116_v28 }
 0xaf1   :  { %1830 = vmatpush.msrb.mxu2 %v4120_v40  ;;  %1850 = vmatpush.msrb.mxu3 %v4122_v41 }
 0xaf3   :  { %1831 = vmatpush.msrb.mxu2 %v4126_v30  ;;  %1851 = vmatpush.msrb.mxu3 %v4128_v42 }
 0xaf5   :  { %1832 = vmatpush.msrb.mxu2 %v4139_v2  ;;  %1852 = vmatpush.msrb.mxu3 %v4141_v4 }
 0xaf6   :  { %3097 = vmatmul.msk.f32.vlgmr.msrb.gmra.mxu2 %vm334_vm10, %v4026_v0  ;;  %3098 = vmatmul.msk.f32.vlgmr.msrb.gmra.mxu3 %vm334_vm10, %v4026_v0  ;;  %v1138_v0 = vadd.f32 %v1137_v63, %v1136_v59 }
 0xaf7   :  { %1921 = vmatpush.msra.mxu2 %v4092_v31  ;;  %1941 = vmatpush.msra.mxu3 %v4094_v32 }
 0xaf9   :  { %1922 = vmatpush.msra.mxu2 %v4096_v34  ;;  %1942 = vmatpush.msra.mxu3 %v4100_v35 }
 0xafb   :  { %1923 = vmatpush.msra.mxu2 %v4102_v36  ;;  %1943 = vmatpush.msra.mxu3 %v4104_v37 }
 0xafd   :  { %1924 = vmatpush.msra.mxu2 %v4108_v38  ;;  %1944 = vmatpush.msra.mxu3 %v4110_v25 }
 0xaff   :  { %1925 = vmatpush.msra.mxu2 %v4114_v26  ;;  %1945 = vmatpush.msra.mxu3 %v4116_v28 }
 0xb01   :  { %1926 = vmatpush.msra.mxu2 %v4120_v40  ;;  %1946 = vmatpush.msra.mxu3 %v4122_v41 }
 0xb03   :  { %1927 = vmatpush.msra.mxu2 %v4126_v30  ;;  %1947 = vmatpush.msra.mxu3 %v4128_v42 }
 0xb05   :  { %1928 = vmatpush.msra.mxu2 %v4139_v2  ;;  %1948 = vmatpush.msra.mxu3 %v4141_v4 }
 0xb06   :  { %3101 = vmatmul.msk.f32.vlgmr.msra.gmra.mxu2 %vm334_vm10, %v4156_v18  ;;  %3102 = vmatmul.msk.f32.vlgmr.msra.gmra.mxu3 %vm334_vm10, %v4156_v18 }
 0xb07   :  { %2017 = vmatpush.msrb.mxu2 %v4092_v31  ;;  %2037 = vmatpush.msrb.mxu3 %v4094_v32 }
 0xb09   :  { %2018 = vmatpush.msrb.mxu2 %v4096_v34  ;;  %2038 = vmatpush.msrb.mxu3 %v4100_v35 }
 0xb0b   :  { %2019 = vmatpush.msrb.mxu2 %v4102_v36  ;;  %2039 = vmatpush.msrb.mxu3 %v4104_v37 }
 0xb0d   :  { %2020 = vmatpush.msrb.mxu2 %v4108_v38  ;;  %2040 = vmatpush.msrb.mxu3 %v4110_v25 }
 0xb0f   :  { %2021 = vmatpush.msrb.mxu2 %v4114_v26  ;;  %2041 = vmatpush.msrb.mxu3 %v4116_v28 }
 0xb11   :  { %2022 = vmatpush.msrb.mxu2 %v4120_v40  ;;  %2042 = vmatpush.msrb.mxu3 %v4122_v41 }
 0xb13   :  { %2023 = vmatpush.msrb.mxu2 %v4126_v30  ;;  %2043 = vmatpush.msrb.mxu3 %v4128_v42 }
 0xb15   :  { %2024 = vmatpush.msrb.mxu2 %v4139_v2  ;;  %2044 = vmatpush.msrb.mxu3 %v4141_v4 }
 0xb29   :  { %v1159_v60 = vpop.f32.mrf.mxu2  ;;  %v1179_v61 = vpop.f32.mrf.mxu3 }
 0xb2a   :  { %v1184_v62 = vrot.slane %v1179_v61, 6 }
 0xb2c   :  { %v1185_v19 = vsel %vm219_vm0, %v1159_v60, %v1184_v62 }
 0xb2d   :  { %v1884_v50 = vpop.f32.mrf.mxu0  ;;  %v1904_v51 = vpop.f32.mrf.mxu1  ;;  %v1187_v52 = vadd.f32 %v1185_v19, %v1138_v0 }
 0xb2e   :  { %v1905_v53 = vadd.f32 %v1904_v51, %v4068_v33  ;;  %v1885_v55 = vadd.f32 %v1884_v50, %v4071_v39  ;;  %v4311_v51 = vld [vmem:[#allocation12 + $0x78] sm:$0xff] }
 0xb2f   :  { %1211 = vrot.lane.b32.xlu0 %v1187_v52, %s3455_s1  ;;  %v3073_v54 = vmul.f32 -1.442695, %v1187_v52  ;;  %v1208_v35 = vrot.slane %v1187_v52, 2  ;;  %v4313_v52 = vld [vmem:[#allocation12 + $0x70] sm:$0xff]  ;;  %2102 = vmatpush.msra.mxu1 %v4311_v51 }
 0xb30   :  { %v1909_v56 = vrot.slane %v1905_v53, 6  ;;  %2082 = vmatpush.msra.mxu0 %v4313_v52  ;;  %2194 = vmatpush.msra.mxu2 %v4313_v52 }
 0xb31   :  { %3237 = vpow2.f32 %v3073_v54  ;;  %v1374_v57 = vpop.f32.mrf.mxu3  ;;  %v1354_v1 = vpop.f32.mrf.mxu2  ;;  %v4320_v54 = vld [vmem:[#allocation12 + $0x60] sm:$0xff]  ;;  %2214 = vmatpush.msra.mxu3 %v4311_v51 }
 0xb32   :  { %v1910_v58 = vsel %vm219_vm0, %v1885_v55, %v1909_v56  ;;  %v1379_v3 = vrot.slane %v1374_v57, 6  ;;  %v4322_v55 = vld [vmem:[#allocation12 + $0x58] sm:$0xff]  ;;  %v4324_v56 = vld [vmem:[#allocation12 + $0x50] sm:$0xff]  ;;  %2083 = vmatpush.msra.mxu0 %v4320_v54  ;;  %v4330_v57 = vld [vmem:[#allocation12 + $0x48] sm:$0xff]  ;;  %2195 = vmatpush.msra.mxu2 %v4320_v54 }
 0xb33   :  { %1912 = vst [vmem:[#allocation2 + $0x18] sm:$0xf] %v1910_v58  ;;  %v4332_v58 = vld [vmem:[#allocation12 + $0x40] sm:$0xff] }
 0xb34   :  { %v1380_v12 = vsel %vm219_vm0, %v1354_v1, %v1379_v3  ;;  %2084 = vmatpush.msra.mxu0 %v4324_v56  ;;  %v4338_v3 = vld [vmem:[#allocation12 + $0x38] sm:$0xff]  ;;  %2196 = vmatpush.msra.mxu2 %v4324_v56 }
 0xb35   :  { %1382 = vst [vmem:[#allocation3] sm:$0xf] %v1380_v12  ;;  %v4340_v12 = vld [vmem:[#allocation12 + $0x30] sm:$0xff] }
 0xb36   :  { %2085 = vmatpush.msra.mxu0 %v4332_v58  ;;  %2197 = vmatpush.msra.mxu2 %v4332_v58 }
 0xb37   :  { %v3238_v22 = vpop.eup %3237 }
 0xb38   :  { %v1191_v23 = vadd.f32 1.0, %v3238_v22  ;;  %v4346_v22 = vld [vmem:[#allocation12 + $0x28] sm:$0xff]  ;;  %2086 = vmatpush.msra.mxu0 %v4340_v12  ;;  %2198 = vmatpush.msra.mxu2 %v4340_v12 }
 0xb39   :  { %v1470_v24 = vpop.f32.mrf.mxu3  ;;  %v1450_v31 = vpop.f32.mrf.mxu2 }
 0xb3a   :  { %3239 = vrcp.f32 %v1191_v23  ;;  %v1475_v20 = vrot.slane %v1470_v24, 6  ;;  %v1203_v38 = vand.u32 2147483648, %v1191_v23  ;;  %v1201_v26 = vand.u32 2147483647, %v1191_v23 }
 0xb3b   :  { %3241 = vtanh.f32 %v1208_v35  ;;  %vm1197_vm6 = vweird.f32 %v1191_v23 }
 0xb3c   :  { %v1476_v32 = vsel %vm219_vm0, %v1450_v31, %v1475_v20  ;;  %v1204_v41 = vor.u32 1.1754944e-38, %v1203_v38  ;;  %vm1202_vm8 = vcmp.eq.f32.partialorder %v1201_v26, 8.507059e+37  ;;  %v4355_v20 = vld [vmem:[#allocation12 + $0x18] sm:$0xff]  ;;  %v4357_v31 = vld [vmem:[#allocation12 + $0x10] sm:$0xff] }
 0xb3d   :  { %1478 = vst [vmem:[#allocation3 + $0x4] sm:$0xf] %v1476_v32  ;;  %v4363_v32 = vld [vmem:[#allocation12 + $0x8] sm:$0xff] }
 0xb40   :  { %v3240_v34 = vpop.eup %3239 }
 0xb41   :  { %v1193_v36 = vmul.f32 %v3240_v34, %v1191_v23  ;;  %vm1198_vm5 = vweird.f32 %v3240_v34  ;;  %v3242_v27 = vpop.eup %3241  ;;  %v4348_v23 = vld [vmem:[#allocation12 + $0x20] sm:$0xff] }
 0xb42   :  { %vm1199_vm7 = vmor %vm1197_vm6, %vm1198_vm5  ;;  %2087 = vmatpush.msra.mxu0 %v4348_v23  ;;  %2199 = vmatpush.msra.mxu2 %v4348_v23 }
 0xb43   :  { %v1194_v37 = vsub.f32 1.0, %v1193_v36 }
 0xb44   :  { %2088 = vmatpush.msra.mxu0 %v4357_v31  ;;  %2200 = vmatpush.msra.mxu2 %v4357_v31 }
 0xb45   :  { %v1195_v25 = vmul.f32 %v3240_v34, %v1194_v37 }
 0xb47   :  { %v1196_v28 = vadd.f32 %v3240_v34, %v1195_v25 }
 0xb49   :  { %v1566_v40 = vpop.f32.mrf.mxu3  ;;  %v1200_v42 = vsel %vm1199_vm7, %v3240_v34, %v1196_v28  ;;  %v1546_v43 = vpop.f32.mrf.mxu2  ;;  %v4365_v34 = vld [vmem:[#allocation12] sm:$0xff] }
 0xb4a   :  { %v1571_v30 = vrot.slane %v1566_v40, 6  ;;  %v1205_v44 = vsel %vm1202_vm8, %v1204_v41, %v1200_v42  ;;  %2089 = vmatpush.msra.mxu0 %v4365_v34  ;;  %2201 = vmatpush.msra.mxu2 %v4365_v34 }
 0xb4b   :  { %v1235_v46 = vmul.f32 %v3242_v27, %v1205_v44  ;;  %v1234_v11 = vmul.f32 %v1205_v44, %v4135_v29  ;;  %v4315_v29 = vld [vmem:[#allocation12 + $0x68] sm:$0xff] }
 0xb4c   :  { %v1572_v45 = vsel %vm219_vm0, %v1546_v43, %v1571_v30  ;;  %2103 = vmatpush.msra.mxu1 %v4315_v29  ;;  %2215 = vmatpush.msra.mxu3 %v4315_v29 }
 0xb4d   :  { %1574 = vst [vmem:[#allocation3 + $0x8] sm:$0xf] %v1572_v45  ;;  %1237 = vrot.lane.b32.xlu2 %v1235_v46, %s3455_s1 }
 0xb4e   :  { %2104 = vmatpush.msra.mxu1 %v4322_v55  ;;  %2216 = vmatpush.msra.mxu3 %v4322_v55 }
 0xb50   :  { %2105 = vmatpush.msra.mxu1 %v4330_v57  ;;  %2217 = vmatpush.msra.mxu3 %v4330_v57 }
 0xb52   :  { %2106 = vmatpush.msra.mxu1 %v4338_v3  ;;  %2218 = vmatpush.msra.mxu3 %v4338_v3 }
 0xb54   :  { %2107 = vmatpush.msra.mxu1 %v4346_v22  ;;  %2219 = vmatpush.msra.mxu3 %v4346_v22 }
 0xb56   :  { %2108 = vmatpush.msra.mxu1 %v4355_v20  ;;  %2220 = vmatpush.msra.mxu3 %v4355_v20 }
 0xb58   :  { %2109 = vmatpush.msra.mxu1 %v4363_v32  ;;  %2221 = vmatpush.msra.mxu3 %v4363_v32 }
 0xb59   :  { %v1662_v49 = vpop.f32.mrf.mxu3  ;;  %v1642_v48 = vpop.f32.mrf.mxu2 }
 0xb5a   :  { %v1667_v47 = vrot.slane %v1662_v49, 6 }
 0xb5c   :  { %v1668_v2 = vsel %vm219_vm0, %v1642_v48, %v1667_v47 }
 0xb5d   :  { %1670 = vst [vmem:[#allocation3 + $0xc] sm:$0xf] %v1668_v2 }
 0xb69   :  { %v1758_v4 = vpop.f32.mrf.mxu3  ;;  %v1738_v5 = vpop.f32.mrf.mxu2 }
 0xb6a   :  { %v1763_v7 = vrot.slane %v1758_v4, 6 }
 0xb6c   :  { %v1764_v6 = vsel %vm219_vm0, %v1738_v5, %v1763_v7  ;;  %v2071_v7 = vld [vmem:[#allocation2] sm:$0xf] }
 0xb6d   :  { %1766 = vst [vmem:[#allocation3 + $0x10] sm:$0xf] %v1764_v6 }
 0xb79   :  { %v1854_v8 = vpop.f32.mrf.mxu3  ;;  %v1834_v10 = vpop.f32.mrf.mxu2 }
 0xb7a   :  { %v1859_v9 = vrot.slane %v1854_v8, 6 }
 0xb7c   :  { %v1860_v13 = vsel %vm219_vm0, %v1834_v10, %v1859_v9 }
 0xb7d   :  { %1862 = vst [vmem:[#allocation3 + $0x14] sm:$0xf] %v1860_v13 }
 0xb89   :  { %v1950_v14 = vpop.f32.mrf.mxu3  ;;  %v1930_v16 = vpop.f32.mrf.mxu2 }
 0xb8a   :  { %v1955_v15 = vrot.slane %v1950_v14, 6 }
 0xb8c   :  { %v1956_v17 = vsel %vm219_vm0, %v1930_v16, %v1955_v15 }
 0xb8d   :  { %1958 = vst [vmem:[#allocation3 + $0x18] sm:$0xf] %v1956_v17 }
 0xba1   :  { %v1212_v61 = vpop.permute.xlu0 %1211 }
 0xba2   :  { %v1213_v62 = vrot.slane %v1212_v61, 2 }
 0xba4   :  { %v3074_v63 = vmul.f32 -1.442695, %v1213_v62 }
 0xba7   :  { %v1238_v18 = vpop.permute.xlu2 %1237 }
 0xba8   :  { %v1240_v59 = vadd.f32 %v1238_v18, %v1234_v11 }
 0xbaa   :  { %3243 = vtanh.f32 %v1240_v59 }
 0xbab   :  { %3245 = vpow2.f32 %v3074_v63 }
 0xbb0   :  { %v3244_v60 = vpop.eup %3243 }
 0xbb1   :  { %1243 = vrot.lane.b32.xlu1 %v3244_v60, %s3455_s1  ;;  %v3246_v0 = vpop.eup %3245 }
 0xbb2   :  { %v1218_v19 = vadd.f32 1.0, %v3246_v0 }
 0xbb4   :  { %3247 = vrcp.f32 %v1218_v19  ;;  %v1230_v36 = vand.u32 2147483648, %v1218_v19  ;;  %vm1224_vm12 = vweird.f32 %v1218_v19  ;;  %v1228_v37 = vand.u32 2147483647, %v1218_v19 }
 0xbb6   :  { %v1231_v25 = vor.u32 1.1754944e-38, %v1230_v36  ;;  %vm1229_vm14 = vcmp.eq.f32.partialorder %v1228_v37, 8.507059e+37 }
 0xbba   :  { %v4309_v50 = vpop.eup %3247 }
 0xbbb   :  { %v1220_v53 = vmul.f32 %v4309_v50, %v1218_v19  ;;  %vm1225_vm11 = vweird.f32 %v4309_v50 }
 0xbbc   :  { %vm1226_vm13 = vmor %vm1224_vm12, %vm1225_vm11 }
 0xbbd   :  { %v1221_v1 = vsub.f32 1.0, %v1220_v53 }
 0xbbf   :  { %v1222_v24 = vmul.f32 %v4309_v50, %v1221_v1 }
 0xbc1   :  { %v1223_v35 = vadd.f32 %v4309_v50, %v1222_v24 }
 0xbc3   :  { %v1227_v38 = vsel %vm1226_vm13, %v4309_v50, %v1223_v35 }
 0xbc4   :  { %v1232_v26 = vsel %vm1229_vm14, %v1231_v25, %v1227_v38 }
 0xc23   :  { %v1244_v28 = vpop.permute.xlu1 %1243 }
 0xc24   :  { %v1246_v40 = vmul.f32 %v1244_v28, %v1232_v26 }
 0xc26   :  { %1248 = vst.msk [vmem:[#allocation4 + $0xe] sm:$0x3] %vm443_vm9, %v1246_v40 }
 0xc2d   :  { %v1959_v41 = vld [vmem:[#allocation4 + $0xe] sm:$0x3] }
 0xc2e   :  { %3103 = vmatmul.msk.f32.vlgmr.msrb.gmra.mxu0 %vm334_vm10, %v1959_v41  ;;  %3104 = vmatmul.msk.f32.vlgmr.msrb.gmra.mxu1 %vm334_vm10, %v1959_v41 }
 0xc2f   :  { %3105 = vmatmul.msk.f32.vlgmr.msrb.gmra.mxu2 %vm334_vm10, %v1959_v41  ;;  %3106 = vmatmul.msk.f32.vlgmr.msrb.gmra.mxu3 %vm334_vm10, %v1959_v41 }
 0xc30   :  { %2307 = vmatpush.msrb.mxu0 %v4313_v52  ;;  %2327 = vmatpush.msrb.mxu1 %v4311_v51 }
 0xc31   :  { %2420 = vmatpush.msrb.mxu2 %v4313_v52  ;;  %2440 = vmatpush.msrb.mxu3 %v4311_v51 }
 0xc32   :  { %2308 = vmatpush.msrb.mxu0 %v4320_v54  ;;  %2328 = vmatpush.msrb.mxu1 %v4315_v29 }
 0xc33   :  { %2421 = vmatpush.msrb.mxu2 %v4320_v54  ;;  %2441 = vmatpush.msrb.mxu3 %v4315_v29 }
 0xc34   :  { %2309 = vmatpush.msrb.mxu0 %v4324_v56  ;;  %2329 = vmatpush.msrb.mxu1 %v4322_v55 }
 0xc35   :  { %2422 = vmatpush.msrb.mxu2 %v4324_v56  ;;  %2442 = vmatpush.msrb.mxu3 %v4322_v55 }
 0xc36   :  { %2110 = vmatmul.f32.vlgmr.msra.gmra.mxu1 %v3454_v21  ;;  %2090 = vmatmul.f32.vlgmr.msra.gmra.mxu0 %v3454_v21 }
 0xc37   :  { %2310 = vmatpush.msrb.mxu0 %v4332_v58  ;;  %2330 = vmatpush.msrb.mxu1 %v4330_v57 }
 0xc38   :  { %2423 = vmatpush.msrb.mxu2 %v4332_v58  ;;  %2443 = vmatpush.msrb.mxu3 %v4330_v57 }
 0xc39   :  { %2311 = vmatpush.msrb.mxu0 %v4340_v12  ;;  %2331 = vmatpush.msrb.mxu1 %v4338_v3 }
 0xc3a   :  { %2424 = vmatpush.msrb.mxu2 %v4340_v12  ;;  %2444 = vmatpush.msrb.mxu3 %v4338_v3 }
 0xc3b   :  { %2312 = vmatpush.msrb.mxu0 %v4348_v23  ;;  %2332 = vmatpush.msrb.mxu1 %v4346_v22 }
 0xc3c   :  { %2425 = vmatpush.msrb.mxu2 %v4348_v23  ;;  %2445 = vmatpush.msrb.mxu3 %v4346_v22 }
 0xc3d   :  { %2313 = vmatpush.msrb.mxu0 %v4357_v31  ;;  %2333 = vmatpush.msrb.mxu1 %v4355_v20 }
 0xc3e   :  { %2426 = vmatpush.msrb.mxu2 %v4357_v31  ;;  %2446 = vmatpush.msrb.mxu3 %v4355_v20 }
 0xc3f   :  { %2314 = vmatpush.msrb.mxu0 %v4365_v34  ;;  %2334 = vmatpush.msrb.mxu1 %v4363_v32 }
 0xc40   :  { %2427 = vmatpush.msrb.mxu2 %v4365_v34  ;;  %2447 = vmatpush.msrb.mxu3 %v4363_v32 }
 0xc41   :  { %2533 = vmatpush.msra.mxu0 %v4313_v52  ;;  %2553 = vmatpush.msra.mxu1 %v4311_v51 }
 0xc43   :  { %2534 = vmatpush.msra.mxu0 %v4320_v54  ;;  %2554 = vmatpush.msra.mxu1 %v4315_v29 }
 0xc45   :  { %2535 = vmatpush.msra.mxu0 %v4324_v56  ;;  %2555 = vmatpush.msra.mxu1 %v4322_v55 }
 0xc47   :  { %2536 = vmatpush.msra.mxu0 %v4332_v58  ;;  %2556 = vmatpush.msra.mxu1 %v4330_v57 }
 0xc49   :  { %2537 = vmatpush.msra.mxu0 %v4340_v12  ;;  %2557 = vmatpush.msra.mxu1 %v4338_v3 }
 0xc4b   :  { %2538 = vmatpush.msra.mxu0 %v4348_v23  ;;  %2558 = vmatpush.msra.mxu1 %v4346_v22 }
 0xc4d   :  { %2539 = vmatpush.msra.mxu0 %v4357_v31  ;;  %2559 = vmatpush.msra.mxu1 %v4355_v20 }
 0xc4f   :  { %2540 = vmatpush.msra.mxu0 %v4365_v34  ;;  %2560 = vmatpush.msra.mxu1 %v4363_v32 }
 0xcab   :  { %v1980_v21 = vpop.f32.mrf.mxu0  ;;  %v2000_v30 = vpop.f32.mrf.mxu1 }
 0xcac   :  { %v2001_v42 = vadd.f32 %v2000_v30, %v4068_v33  ;;  %v1981_v27 = vadd.f32 %v1980_v21, %v4071_v39 }
 0xcae   :  { %v2005_v43 = vrot.slane %v2001_v42, 6 }
 0xcb0   :  { %v2006_v44 = vsel %vm219_vm0, %v1981_v27, %v2005_v43 }
 0xcb1   :  { %2008 = vst [vmem:[#allocation2 + $0x1c] sm:$0xf] %v2006_v44 }
 0xcb2   :  { %v2046_v45 = vpop.f32.mrf.mxu3  ;;  %v2026_v49 = vpop.f32.mrf.mxu2 }
 0xcb3   :  { %v2051_v46 = vrot.slane %v2046_v45, 6  ;;  %v2111_v48 = vpop.f32.mrf.mxu1  ;;  %v2091_v4 = vpop.f32.mrf.mxu0 }
 0xcb4   :  { %v2116_v2 = vrot.slane %v2111_v48, 6  ;;  %v2180_v48 = vld [vmem:[#allocation2 + $0x4] sm:$0xf] }
 0xcb5   :  { %v2052_v47 = vsel %vm219_vm0, %v2026_v49, %v2051_v46  ;;  %v2181_v46 = vld [vmem:[#allocation3 + $0x18] sm:$0xf] }
 0xcb6   :  { %2054 = vst [vmem:[#allocation3 + $0x1c] sm:$0xf] %v2052_v47  ;;  %v2117_v6 = vsel %vm219_vm0, %v2091_v4, %v2116_v2  ;;  %v2182_v4 = vadd.f32 %v2181_v46, %v2180_v48  ;;  %v2293_v46 = vld [vmem:[#allocation2 + $0x8] sm:$0xf] }
 0xcbd   :  { %v2072_v5 = vld [vmem:[#allocation3 + $0x1c] sm:$0xf] }
 0xcbe   :  { %v2073_v33 = vadd.f32 %v2072_v5, %v2071_v7 }
 0xcc0   :  { %v2119_v8 = vadd.f32 %v2117_v6, %v2073_v33 }
 0xcc2   :  { %v3107_v39 = vmul.f32 -1.442695, %v2119_v8  ;;  %2143 = vrot.lane.b32.xlu0 %v2119_v8, %s3455_s1  ;;  %v2140_v14 = vrot.slane %v2119_v8, 2 }
 0xcc4   :  { %3249 = vpow2.f32 %v3107_v39 }
 0xcca   :  { %v3250_v9 = vpop.eup %3249 }
 0xccb   :  { %v2123_v10 = vadd.f32 1.0, %v3250_v9 }
 0xccd   :  { %3251 = vrcp.f32 %v2123_v10  ;;  %v2135_v17 = vand.u32 2147483648, %v2123_v10  ;;  %v2133_v18 = vand.u32 2147483647, %v2123_v10  ;;  %vm2129_vm1 = vweird.f32 %v2123_v10 }
 0xcce   :  { %3253 = vtanh.f32 %v2140_v14 }
 0xccf   :  { %v2136_v60 = vor.u32 1.1754944e-38, %v2135_v17  ;;  %vm2134_vm3 = vcmp.eq.f32.partialorder %v2133_v18, 8.507059e+37 }
 0xcd3   :  { %v3252_v13 = vpop.eup %3251 }
 0xcd4   :  { %v2125_v15 = vmul.f32 %v3252_v13, %v2123_v10  ;;  %vm2130_vm15 = vweird.f32 %v3252_v13  ;;  %v3254_v62 = vpop.eup %3253 }
 0xcd5   :  { %vm2131_vm2 = vmor %vm2129_vm1, %vm2130_vm15 }
 0xcd6   :  { %v2126_v16 = vsub.f32 1.0, %v2125_v15 }
 0xcd8   :  { %v2127_v11 = vmul.f32 %v3252_v13, %v2126_v16 }
 0xcda   :  { %v2128_v59 = vadd.f32 %v3252_v13, %v2127_v11 }
 0xcdc   :  { %v2132_v61 = vsel %vm2131_vm2, %v3252_v13, %v2128_v59 }
 0xcdd   :  { %v2137_v63 = vsel %vm2134_vm3, %v2136_v60, %v2132_v61 }
 0xcde   :  { %v2167_v0 = vmul.f32 %v3254_v62, %v2137_v63  ;;  %v2166_v19 = vmul.f32 0.0, %v2137_v63 }
 0xce0   :  { %2169 = vrot.lane.b32.xlu2 %v2167_v0, %s3455_s1 }
 0xd34   :  { %v2144_v24 = vpop.permute.xlu0 %2143 }
 0xd35   :  { %v2145_v35 = vrot.slane %v2144_v24, 2 }
 0xd37   :  { %v3108_v36 = vmul.f32 -1.442695, %v2145_v35 }
 0xd3a   :  { %v2170_v50 = vpop.permute.xlu2 %2169 }
 0xd3b   :  { %v4442_v53 = vadd.f32 %v2170_v50, %v2166_v19 }
 0xd3d   :  { %3255 = vtanh.f32 %v4442_v53 }
 0xd3e   :  { %3257 = vpow2.f32 %v3108_v36 }
 0xd43   :  { %v3256_v1 = vpop.eup %3255 }
 0xd44   :  { %2175 = vrot.lane.b32.xlu1 %v3256_v1, %s3455_s1  ;;  %v3258_v37 = vpop.eup %3257 }
 0xd45   :  { %v2150_v38 = vadd.f32 1.0, %v3258_v37 }
 0xd47   :  { %3259 = vrcp.f32 %v2150_v38  ;;  %v2162_v21 = vand.u32 2147483648, %v2150_v38  ;;  %vm2156_vm5 = vweird.f32 %v2150_v38  ;;  %v2160_v30 = vand.u32 2147483647, %v2150_v38 }
 0xd49   :  { %v2163_v27 = vor.u32 1.1754944e-38, %v2162_v21  ;;  %vm2161_vm7 = vcmp.eq.f32.partialorder %v2160_v30, 8.507059e+37 }
 0xd4d   :  { %v3260_v25 = vpop.eup %3259 }
 0xd4e   :  { %v2152_v26 = vmul.f32 %v3260_v25, %v2150_v38  ;;  %vm2157_vm4 = vweird.f32 %v3260_v25 }
 0xd4f   :  { %vm2158_vm6 = vmor %vm2156_vm5, %vm2157_vm4 }
 0xd50   :  { %v2153_v28 = vsub.f32 1.0, %v2152_v26 }
 0xd52   :  { %v2154_v40 = vmul.f32 %v3260_v25, %v2153_v28 }
 0xd54   :  { %v2155_v41 = vadd.f32 %v3260_v25, %v2154_v40 }
 0xd56   :  { %v2159_v42 = vsel %vm2158_vm6, %v3260_v25, %v2155_v41 }
 0xd57   :  { %v2164_v43 = vsel %vm2161_vm7, %v2163_v27, %v2159_v42 }
 0xdb6   :  { %v2176_v44 = vpop.permute.xlu1 %2175 }
 0xdb7   :  { %v2178_v45 = vmul.f32 %v2176_v44, %v2164_v43  ;;  %v2294_v43 = vld [vmem:[#allocation3 + $0x14] sm:$0xf] }
 0xdb9   :  { %2179 = vst.msk [vmem:[#allocation5] sm:$0x3] %vm443_vm9, %v2178_v45  ;;  %3109 = vmatmul.msk.f32.vlgmr.msra.gmra.mxu2 %vm334_vm10, %v2178_v45  ;;  %3110 = vmatmul.msk.f32.vlgmr.msra.gmra.mxu3 %vm334_vm10, %v2178_v45 }
 0xdba   :  { %2646 = vmatpush.msra.mxu2 %v4313_v52  ;;  %2666 = vmatpush.msra.mxu3 %v4311_v51 }
 0xdbc   :  { %2647 = vmatpush.msra.mxu2 %v4320_v54  ;;  %2667 = vmatpush.msra.mxu3 %v4315_v29 }
 0xdbe   :  { %2648 = vmatpush.msra.mxu2 %v4324_v56  ;;  %2668 = vmatpush.msra.mxu3 %v4322_v55 }
 0xdc0   :  { %2649 = vmatpush.msra.mxu2 %v4332_v58  ;;  %2669 = vmatpush.msra.mxu3 %v4330_v57 }
 0xdc2   :  { %2650 = vmatpush.msra.mxu2 %v4340_v12  ;;  %2670 = vmatpush.msra.mxu3 %v4338_v3 }
 0xdc4   :  { %2651 = vmatpush.msra.mxu2 %v4348_v23  ;;  %2671 = vmatpush.msra.mxu3 %v4346_v22 }
 0xdc6   :  { %2652 = vmatpush.msra.mxu2 %v4357_v31  ;;  %2672 = vmatpush.msra.mxu3 %v4355_v20 }
 0xdc8   :  { %2653 = vmatpush.msra.mxu2 %v4365_v34  ;;  %2673 = vmatpush.msra.mxu3 %v4363_v32 }
 0xe3c   :  { %v2223_v49 = vpop.f32.mrf.mxu3  ;;  %v2203_v2 = vpop.f32.mrf.mxu2 }
 0xe3d   :  { %v2228_v47 = vrot.slane %v2223_v49, 6 }
 0xe3f   :  { %v2229_v7 = vsel %vm219_vm0, %v2203_v2, %v2228_v47  ;;  %v2295_v47 = vadd.f32 %v2294_v43, %v2293_v46 }
 0xe40   :  { %v2231_v5 = vadd.f32 %v2229_v7, %v2182_v4 }
 0xe42   :  { %2255 = vrot.lane.b32.xlu0 %v2231_v5, %s3455_s1  ;;  %v3111_v6 = vmul.f32 -1.442695, %v2231_v5  ;;  %v2252_v9 = vrot.slane %v2231_v5, 2 }
 0xe44   :  { %3261 = vpow2.f32 %v3111_v6 }
 0xe4a   :  { %v3262_v33 = vpop.eup %3261 }
 0xe4b   :  { %v2235_v8 = vadd.f32 1.0, %v3262_v33 }
 0xe4d   :  { %3263 = vrcp.f32 %v2235_v8  ;;  %v2247_v14 = vand.u32 2147483648, %v2235_v8  ;;  %v2245_v16 = vand.u32 2147483647, %v2235_v8  ;;  %vm2241_vm11 = vweird.f32 %v2235_v8 }
 0xe4e   :  { %3265 = vtanh.f32 %v2252_v9 }
 0xe4f   :  { %v2248_v11 = vor.u32 1.1754944e-38, %v2247_v14  ;;  %vm2246_vm13 = vcmp.eq.f32.partialorder %v2245_v16, 8.507059e+37 }
 0xe53   :  { %v3264_v39 = vpop.eup %3263 }
 0xe54   :  { %v2237_v10 = vmul.f32 %v3264_v39, %v2235_v8  ;;  %vm2242_vm8 = vweird.f32 %v3264_v39  ;;  %v3266_v59 = vpop.eup %3265 }
 0xe55   :  { %vm2243_vm12 = vmor %vm2241_vm11, %vm2242_vm8 }
 0xe56   :  { %v2238_v13 = vsub.f32 1.0, %v2237_v10 }
 0xe58   :  { %v2239_v15 = vmul.f32 %v3264_v39, %v2238_v13 }
 0xe5a   :  { %v2240_v17 = vadd.f32 %v3264_v39, %v2239_v15 }
 0xe5c   :  { %v2244_v18 = vsel %vm2243_vm12, %v3264_v39, %v2240_v17 }
 0xe5d   :  { %v2249_v60 = vsel %vm2246_vm13, %v2248_v11, %v2244_v18 }
 0xe5e   :  { %v2279_v61 = vmul.f32 %v3266_v59, %v2249_v60  ;;  %v2278_v62 = vmul.f32 %v2249_v60, %v4442_v53 }
 0xe60   :  { %2281 = vrot.lane.b32.xlu2 %v2279_v61, %s3455_s1 }
 0xeb4   :  { %v2256_v50 = vpop.permute.xlu0 %2255 }
 0xeb5   :  { %v2257_v1 = vrot.slane %v2256_v50, 2 }
 0xeb7   :  { %v3112_v24 = vmul.f32 -1.442695, %v2257_v1 }
 0xeba   :  { %v2282_v63 = vpop.permute.xlu2 %2281 }
 0xebb   :  { %v4469_v0 = vadd.f32 %v2282_v63, %v2278_v62 }
 0xebd   :  { %3267 = vtanh.f32 %v4469_v0 }
 0xebe   :  { %3269 = vpow2.f32 %v3112_v24 }
 0xec3   :  { %v3268_v19 = vpop.eup %3267 }
 0xec4   :  { %2287 = vrot.lane.b32.xlu1 %v3268_v19, %s3455_s1  ;;  %v3270_v35 = vpop.eup %3269 }
 0xec5   :  { %v2262_v36 = vadd.f32 1.0, %v3270_v35 }
 0xec7   :  { %3271 = vrcp.f32 %v2262_v36  ;;  %v2274_v28 = vand.u32 2147483648, %v2262_v36  ;;  %vm2268_vm15 = vweird.f32 %v2262_v36  ;;  %v2272_v40 = vand.u32 2147483647, %v2262_v36 }
 0xec9   :  { %v2275_v21 = vor.u32 1.1754944e-38, %v2274_v28  ;;  %vm2273_vm2 = vcmp.eq.f32.partialorder %v2272_v40, 8.507059e+37 }
 0xecd   :  { %v3272_v37 = vpop.eup %3271 }
 0xece   :  { %v2264_v38 = vmul.f32 %v3272_v37, %v2262_v36  ;;  %vm2269_vm14 = vweird.f32 %v3272_v37 }
 0xecf   :  { %vm2270_vm1 = vmor %vm2268_vm15, %vm2269_vm14 }
 0xed0   :  { %v2265_v25 = vsub.f32 1.0, %v2264_v38 }
 0xed2   :  { %v2266_v26 = vmul.f32 %v3272_v37, %v2265_v25 }
 0xed4   :  { %v2267_v53 = vadd.f32 %v3272_v37, %v2266_v26 }
 0xed6   :  { %v2271_v41 = vsel %vm2270_vm1, %v3272_v37, %v2267_v53 }
 0xed7   :  { %v2276_v30 = vsel %vm2273_vm2, %v2275_v21, %v2271_v41 }
 0xf36   :  { %v2288_v42 = vpop.permute.xlu1 %2287 }
 0xf37   :  { %v2290_v27 = vmul.f32 %v2288_v42, %v2276_v30 }
 0xf39   :  { %3113 = vmatmul.msk.f32.vlgmr.msrb.gmra.mxu0 %vm334_vm10, %v2290_v27  ;;  %3114 = vmatmul.msk.f32.vlgmr.msrb.gmra.mxu1 %vm334_vm10, %v2290_v27 }
 0xf3a   :  { %2759 = vmatpush.msrb.mxu0 %v4313_v52  ;;  %2779 = vmatpush.msrb.mxu1 %v4311_v51 }
 0xf3c   :  { %2760 = vmatpush.msrb.mxu0 %v4320_v54  ;;  %2780 = vmatpush.msrb.mxu1 %v4315_v29 }
 0xf3e   :  { %2761 = vmatpush.msrb.mxu0 %v4324_v56  ;;  %2781 = vmatpush.msrb.mxu1 %v4322_v55 }
 0xf40   :  { %2762 = vmatpush.msrb.mxu0 %v4332_v58  ;;  %2782 = vmatpush.msrb.mxu1 %v4330_v57 }
 0xf42   :  { %2763 = vmatpush.msrb.mxu0 %v4340_v12  ;;  %2783 = vmatpush.msrb.mxu1 %v4338_v3 }
 0xf44   :  { %2764 = vmatpush.msrb.mxu0 %v4348_v23  ;;  %2784 = vmatpush.msrb.mxu1 %v4346_v22 }
 0xf46   :  { %2765 = vmatpush.msrb.mxu0 %v4357_v31  ;;  %2785 = vmatpush.msrb.mxu1 %v4355_v20 }
 0xf48   :  { %2766 = vmatpush.msrb.mxu0 %v4365_v34  ;;  %2786 = vmatpush.msrb.mxu1 %v4363_v32 }
 0xfb6   :  { %v2336_v44 = vpop.f32.mrf.mxu1  ;;  %v2316_v49 = vpop.f32.mrf.mxu0 }
 0xfb7   :  { %v2341_v45 = vrot.slane %v2336_v44, 6 }
 0xfb9   :  { %v2342_v48 = vsel %vm219_vm0, %v2316_v49, %v2341_v45 }
 0xfba   :  { %v2344_v2 = vadd.f32 %v2342_v48, %v2295_v47 }
 0xfbc   :  { %2368 = vrot.lane.b32.xlu0 %v2344_v2, %s3455_s1  ;;  %v3115_v4 = vmul.f32 -1.442695, %v2344_v2  ;;  %v2365_v33 = vrot.slane %v2344_v2, 2 }
 0xfbe   :  { %3273 = vpow2.f32 %v3115_v4 }
 0xfc4   :  { %v3274_v7 = vpop.eup %3273 }
 0xfc5   :  { %v2348_v5 = vadd.f32 1.0, %v3274_v7 }
 0xfc7   :  { %3275 = vrcp.f32 %v2348_v5  ;;  %v2360_v9 = vand.u32 2147483648, %v2348_v5  ;;  %v2358_v13 = vand.u32 2147483647, %v2348_v5  ;;  %vm2354_vm4 = vweird.f32 %v2348_v5 }
 0xfc8   :  { %3277 = vtanh.f32 %v2365_v33 }
 0xfc9   :  { %v2361_v15 = vor.u32 1.1754944e-38, %v2360_v9  ;;  %vm2359_vm6 = vcmp.eq.f32.partialorder %v2358_v13, 8.507059e+37 }
 0xfcd   :  { %v3276_v6 = vpop.eup %3275 }
 0xfce   :  { %v2350_v8 = vmul.f32 %v3276_v6, %v2348_v5  ;;  %vm2355_vm3 = vweird.f32 %v3276_v6  ;;  %v3278_v17 = vpop.eup %3277 }
 0xfcf   :  { %vm2356_vm5 = vmor %vm2354_vm4, %vm2355_vm3 }
 0xfd0   :  { %v2351_v39 = vsub.f32 1.0, %v2350_v8 }
 0xfd2   :  { %v2352_v10 = vmul.f32 %v3276_v6, %v2351_v39 }
 0xfd4   :  { %v2353_v14 = vadd.f32 %v3276_v6, %v2352_v10 }
 0xfd6   :  { %v2357_v16 = vsel %vm2356_vm5, %v3276_v6, %v2353_v14 }
 0xfd7   :  { %v2362_v11 = vsel %vm2359_vm6, %v2361_v15, %v2357_v16 }
 0xfd8   :  { %v2392_v18 = vmul.f32 %v3278_v17, %v2362_v11  ;;  %v2391_v59 = vmul.f32 %v2362_v11, %v4469_v0 }
 0xfda   :  { %2394 = vrot.lane.b32.xlu2 %v2392_v18, %s3455_s1 }
0x102e   :  { %v2369_v63 = vpop.permute.xlu0 %2368 }
0x102f   :  { %v2370_v19 = vrot.slane %v2369_v63, 2 }
0x1031   :  { %v3116_v50 = vmul.f32 -1.442695, %v2370_v19  ;;  %v2519_v19 = vld [vmem:[#allocation2 + $0x10] sm:$0xf] }
0x1034   :  { %v2395_v60 = vpop.permute.xlu2 %2394 }
0x1035   :  { %v4495_v61 = vadd.f32 %v2395_v60, %v2391_v59 }
0x1037   :  { %3279 = vtanh.f32 %v4495_v61 }
0x1038   :  { %3281 = vpow2.f32 %v3116_v50 }
0x103d   :  { %v3280_v62 = vpop.eup %3279 }
0x103e   :  { %2400 = vrot.lane.b32.xlu1 %v3280_v62, %s3455_s1  ;;  %v3282_v1 = vpop.eup %3281 }
0x103f   :  { %v2375_v24 = vadd.f32 1.0, %v3282_v1 }
0x1041   :  { %3283 = vrcp.f32 %v2375_v24  ;;  %v2387_v25 = vand.u32 2147483648, %v2375_v24  ;;  %vm2381_vm8 = vweird.f32 %v2375_v24  ;;  %v2385_v26 = vand.u32 2147483647, %v2375_v24 }
0x1043   :  { %v2388_v28 = vor.u32 1.1754944e-38, %v2387_v25  ;;  %vm2386_vm12 = vcmp.eq.f32.partialorder %v2385_v26, 8.507059e+37 }
0x1047   :  { %v3284_v35 = vpop.eup %3283 }
0x1048   :  { %v2377_v36 = vmul.f32 %v3284_v35, %v2375_v24  ;;  %vm2382_vm7 = vweird.f32 %v3284_v35 }
0x1049   :  { %vm2383_vm11 = vmor %vm2381_vm8, %vm2382_vm7 }
0x104a   :  { %v2378_v37 = vsub.f32 1.0, %v2377_v36 }
0x104c   :  { %v2379_v38 = vmul.f32 %v3284_v35, %v2378_v37 }
0x104e   :  { %v2380_v0 = vadd.f32 %v3284_v35, %v2379_v38 }
0x1050   :  { %v2384_v53 = vsel %vm2383_vm11, %v3284_v35, %v2380_v0 }
0x1051   :  { %v2389_v40 = vsel %vm2386_vm12, %v2388_v28, %v2384_v53 }
0x10b0   :  { %v2401_v41 = vpop.permute.xlu1 %2400 }
0x10b1   :  { %v2403_v21 = vmul.f32 %v2401_v41, %v2389_v40 }
0x10b3   :  { %3117 = vmatmul.msk.f32.vlgmr.msrb.gmra.mxu2 %vm334_vm10, %v2403_v21  ;;  %3118 = vmatmul.msk.f32.vlgmr.msrb.gmra.mxu3 %vm334_vm10, %v2403_v21 }
0x10b4   :  { %2872 = vmatpush.msrb.mxu2 %v4313_v52  ;;  %2892 = vmatpush.msrb.mxu3 %v4311_v51  ;;  %v2407_v51 = vld [vmem:[#allocation3 + $0x10] sm:$0xf] }
0x10b6   :  { %2873 = vmatpush.msrb.mxu2 %v4320_v54  ;;  %2893 = vmatpush.msrb.mxu3 %v4315_v29  ;;  %v2406_v54 = vld [vmem:[#allocation2 + $0xc] sm:$0xf] }
0x10b8   :  { %2874 = vmatpush.msrb.mxu2 %v4324_v56  ;;  %2894 = vmatpush.msrb.mxu3 %v4322_v55  ;;  %v2408_v56 = vadd.f32 %v2407_v51, %v2406_v54 }
0x10ba   :  { %2875 = vmatpush.msrb.mxu2 %v4332_v58  ;;  %2895 = vmatpush.msrb.mxu3 %v4330_v57 }
0x10bc   :  { %2876 = vmatpush.msrb.mxu2 %v4340_v12  ;;  %2896 = vmatpush.msrb.mxu3 %v4338_v3 }
0x10be   :  { %2877 = vmatpush.msrb.mxu2 %v4348_v23  ;;  %2897 = vmatpush.msrb.mxu3 %v4346_v22 }
0x10c0   :  { %2878 = vmatpush.msrb.mxu2 %v4357_v31  ;;  %2898 = vmatpush.msrb.mxu3 %v4355_v20 }
0x10c2   :  { %2879 = vmatpush.msrb.mxu2 %v4365_v34  ;;  %2899 = vmatpush.msrb.mxu3 %v4363_v32 }
0x1136   :  { %v2449_v52 = vpop.f32.mrf.mxu3  ;;  %v2429_v55 = vpop.f32.mrf.mxu2 }
0x1137   :  { %v2454_v29 = vrot.slane %v2449_v52, 6 }
0x1139   :  { %v2455_v57 = vsel %vm219_vm0, %v2429_v55, %v2454_v29 }
0x113a   :  { %v2457_v58 = vadd.f32 %v2455_v57, %v2408_v56 }
0x113c   :  { %2481 = vrot.lane.b32.xlu0 %v2457_v58, %s3455_s1  ;;  %v3119_v3 = vmul.f32 -1.442695, %v2457_v58  ;;  %v2478_v20 = vrot.slane %v2457_v58, 2 }
0x113e   :  { %3285 = vpow2.f32 %v3119_v3 }
0x1144   :  { %v3286_v12 = vpop.eup %3285 }
0x1145   :  { %v2461_v22 = vadd.f32 1.0, %v3286_v12 }
0x1147   :  { %3287 = vrcp.f32 %v2461_v22  ;;  %v2473_v34 = vand.u32 2147483648, %v2461_v22  ;;  %v2471_v42 = vand.u32 2147483647, %v2461_v22  ;;  %vm2467_vm14 = vweird.f32 %v2461_v22 }
0x1148   :  { %3289 = vtanh.f32 %v2478_v20 }
0x1149   :  { %v2474_v43 = vor.u32 1.1754944e-38, %v2473_v34  ;;  %vm2472_vm1 = vcmp.eq.f32.partialorder %v2471_v42, 8.507059e+37 }
0x114d   :  { %v3288_v23 = vpop.eup %3287 }
0x114e   :  { %v2463_v31 = vmul.f32 %v3288_v23, %v2461_v22  ;;  %vm2468_vm13 = vweird.f32 %v3288_v23  ;;  %v3290_v45 = vpop.eup %3289 }
0x114f   :  { %vm2469_vm15 = vmor %vm2467_vm14, %vm2468_vm13 }
0x1150   :  { %v2464_v32 = vsub.f32 1.0, %v2463_v31 }
0x1152   :  { %v2465_v30 = vmul.f32 %v3288_v23, %v2464_v32 }
0x1154   :  { %v2466_v27 = vadd.f32 %v3288_v23, %v2465_v30 }
0x1156   :  { %v2470_v44 = vsel %vm2469_vm15, %v3288_v23, %v2466_v27 }
0x1157   :  { %v2475_v46 = vsel %vm2472_vm1, %v2474_v43, %v2470_v44 }
0x1158   :  { %v2505_v49 = vmul.f32 %v3290_v45, %v2475_v46  ;;  %v2504_v47 = vmul.f32 %v2475_v46, %v4495_v61  ;;  %v2520_v61 = vld [vmem:[#allocation3 + $0xc] sm:$0xf] }
0x1159   :  { %v2521_v1 = vadd.f32 %v2520_v61, %v2519_v19 }
0x115a   :  { %2507 = vrot.lane.b32.xlu2 %v2505_v49, %s3455_s1 }
0x11ae   :  { %v2482_v7 = vpop.permute.xlu0 %2481 }
0x11af   :  { %v2483_v5 = vrot.slane %v2482_v7, 2 }
0x11b1   :  { %v3120_v6 = vmul.f32 -1.442695, %v2483_v5  ;;  %v2632_v5 = vld [vmem:[#allocation2 + $0x14] sm:$0xf] }
0x11b4   :  { %v2508_v48 = vpop.permute.xlu2 %2507 }
0x11b5   :  { %v2510_v2 = vadd.f32 %v2508_v48, %v2504_v47 }
0x11b7   :  { %3291 = vtanh.f32 %v2510_v2 }
0x11b8   :  { %3293 = vpow2.f32 %v3120_v6 }
0x11bd   :  { %v3292_v4 = vpop.eup %3291 }
0x11be   :  { %2513 = vrot.lane.b32.xlu1 %v3292_v4, %s3455_s1  ;;  %v3294_v33 = vpop.eup %3293 }
0x11bf   :  { %v2488_v8 = vadd.f32 1.0, %v3294_v33 }
0x11c1   :  { %3295 = vrcp.f32 %v2488_v8  ;;  %v2500_v15 = vand.u32 2147483648, %v2488_v8  ;;  %vm2494_vm3 = vweird.f32 %v2488_v8  ;;  %v2498_v16 = vand.u32 2147483647, %v2488_v8 }
0x11c3   :  { %v2501_v11 = vor.u32 1.1754944e-38, %v2500_v15  ;;  %vm2499_vm5 = vcmp.eq.f32.partialorder %v2498_v16, 8.507059e+37 }
0x11c7   :  { %v3296_v39 = vpop.eup %3295 }
0x11c8   :  { %v2490_v9 = vmul.f32 %v3296_v39, %v2488_v8  ;;  %vm2495_vm2 = vweird.f32 %v3296_v39 }
0x11c9   :  { %vm2496_vm4 = vmor %vm2494_vm3, %vm2495_vm2 }
0x11ca   :  { %v2491_v10 = vsub.f32 1.0, %v2490_v9 }
0x11cc   :  { %v2492_v13 = vmul.f32 %v3296_v39, %v2491_v10 }
0x11ce   :  { %v2493_v14 = vadd.f32 %v3296_v39, %v2492_v13 }
0x11d0   :  { %v2497_v17 = vsel %vm2496_vm4, %v3296_v39, %v2493_v14 }
0x11d1   :  { %v2502_v18 = vsel %vm2499_vm5, %v2501_v11, %v2497_v17 }
0x1230   :  { %v2514_v59 = vpop.permute.xlu1 %2513 }
0x1231   :  { %v2516_v60 = vmul.f32 %v2514_v59, %v2502_v18 }
0x1233   :  { %3121 = vmatmul.msk.f32.vlgmr.msra.gmra.mxu0 %vm334_vm10, %v2516_v60  ;;  %3122 = vmatmul.msk.f32.vlgmr.msra.gmra.mxu1 %vm334_vm10, %v2516_v60 }
0x12b0   :  { %v2562_v62 = vpop.f32.mrf.mxu1  ;;  %v2542_v50 = vpop.f32.mrf.mxu0 }
0x12b1   :  { %v2567_v63 = vrot.slane %v2562_v62, 6 }
0x12b3   :  { %v2568_v24 = vsel %vm219_vm0, %v2542_v50, %v2567_v63 }
0x12b4   :  { %v2570_v35 = vadd.f32 %v2568_v24, %v2521_v1 }
0x12b6   :  { %2594 = vrot.lane.b32.xlu0 %v2570_v35, %s3455_s1  ;;  %v3123_v36 = vmul.f32 -1.442695, %v2570_v35  ;;  %v2591_v25 = vrot.slane %v2570_v35, 2 }
0x12b8   :  { %3297 = vpow2.f32 %v3123_v36 }
0x12be   :  { %v3298_v37 = vpop.eup %3297 }
0x12bf   :  { %v2574_v38 = vadd.f32 1.0, %v3298_v37 }
0x12c1   :  { %3299 = vrcp.f32 %v2574_v38  ;;  %v2586_v28 = vand.u32 2147483648, %v2574_v38  ;;  %v2584_v41 = vand.u32 2147483647, %v2574_v38  ;;  %vm2580_vm7 = vweird.f32 %v2574_v38 }
0x12c2   :  { %3301 = vtanh.f32 %v2591_v25 }
0x12c3   :  { %v2587_v51 = vor.u32 1.1754944e-38, %v2586_v28  ;;  %vm2585_vm11 = vcmp.eq.f32.partialorder %v2584_v41, 8.507059e+37 }
0x12c7   :  { %v3300_v0 = vpop.eup %3299 }
0x12c8   :  { %v2576_v26 = vmul.f32 %v3300_v0, %v2574_v38  ;;  %vm2581_vm6 = vweird.f32 %v3300_v0  ;;  %v3302_v29 = vpop.eup %3301 }
0x12c9   :  { %vm2582_vm8 = vmor %vm2580_vm7, %vm2581_vm6 }
0x12ca   :  { %v2577_v53 = vsub.f32 1.0, %v2576_v26 }
0x12cc   :  { %v2578_v40 = vmul.f32 %v3300_v0, %v2577_v53 }
0x12ce   :  { %v2579_v21 = vadd.f32 %v3300_v0, %v2578_v40 }
0x12d0   :  { %v2583_v52 = vsel %vm2582_vm8, %v3300_v0, %v2579_v21 }
0x12d1   :  { %v2588_v54 = vsel %vm2585_vm11, %v2587_v51, %v2583_v52 }
0x12d2   :  { %v2618_v55 = vmul.f32 %v3302_v29, %v2588_v54  ;;  %v2617_v56 = vmul.f32 %v2588_v54, %v2510_v2  ;;  %v2633_v2 = vld [vmem:[#allocation3 + $0x8] sm:$0xf] }
0x12d3   :  { %v2634_v33 = vadd.f32 %v2633_v2, %v2632_v5 }
0x12d4   :  { %2620 = vrot.lane.b32.xlu2 %v2618_v55, %s3455_s1 }
0x1328   :  { %v2595_v12 = vpop.permute.xlu0 %2594 }
0x1329   :  { %v2596_v22 = vrot.slane %v2595_v12, 2 }
0x132b   :  { %v3124_v23 = vmul.f32 -1.442695, %v2596_v22  ;;  %v2745_v22 = vld [vmem:[#allocation2 + $0x18] sm:$0xf] }
0x132e   :  { %v2621_v57 = vpop.permute.xlu2 %2620 }
0x132f   :  { %v2623_v58 = vadd.f32 %v2621_v57, %v2617_v56 }
0x1331   :  { %3303 = vtanh.f32 %v2623_v58 }
0x1332   :  { %3305 = vpow2.f32 %v3124_v23 }
0x1337   :  { %v3304_v3 = vpop.eup %3303 }
0x1338   :  { %2626 = vrot.lane.b32.xlu1 %v3304_v3, %s3455_s1  ;;  %v3306_v20 = vpop.eup %3305 }
0x1339   :  { %v2601_v31 = vadd.f32 1.0, %v3306_v20 }
0x133b   :  { %3307 = vrcp.f32 %v2601_v31  ;;  %v2613_v43 = vand.u32 2147483648, %v2601_v31  ;;  %vm2607_vm13 = vweird.f32 %v2601_v31  ;;  %v2611_v44 = vand.u32 2147483647, %v2601_v31 }
0x133d   :  { %v2614_v46 = vor.u32 1.1754944e-38, %v2613_v43  ;;  %vm2612_vm15 = vcmp.eq.f32.partialorder %v2611_v44, 8.507059e+37 }
0x1341   :  { %v3308_v32 = vpop.eup %3307 }
0x1342   :  { %v2603_v34 = vmul.f32 %v3308_v32, %v2601_v31  ;;  %vm2608_vm12 = vweird.f32 %v3308_v32 }
0x1343   :  { %vm2609_vm14 = vmor %vm2607_vm13, %vm2608_vm12 }
0x1344   :  { %v2604_v30 = vsub.f32 1.0, %v2603_v34 }
0x1346   :  { %v2605_v42 = vmul.f32 %v3308_v32, %v2604_v30 }
0x1348   :  { %v2606_v27 = vadd.f32 %v3308_v32, %v2605_v42 }
0x134a   :  { %v2610_v45 = vsel %vm2609_vm14, %v3308_v32, %v2606_v27 }
0x134b   :  { %v2615_v49 = vsel %vm2612_vm15, %v2614_v46, %v2610_v45 }
0x13aa   :  { %v2627_v47 = vpop.permute.xlu1 %2626 }
0x13ab   :  { %v2629_v48 = vmul.f32 %v2627_v47, %v2615_v49 }
0x13ad   :  { %3125 = vmatmul.msk.f32.vlgmr.msra.gmra.mxu2 %vm334_vm10, %v2629_v48  ;;  %3126 = vmatmul.msk.f32.vlgmr.msra.gmra.mxu3 %vm334_vm10, %v2629_v48 }
0x1430   :  { %v2675_v4 = vpop.f32.mrf.mxu3  ;;  %v2655_v6 = vpop.f32.mrf.mxu2 }
0x1431   :  { %v2680_v7 = vrot.slane %v2675_v4, 6 }
0x1433   :  { %v2681_v8 = vsel %vm219_vm0, %v2655_v6, %v2680_v7 }
0x1434   :  { %v2683_v39 = vadd.f32 %v2681_v8, %v2634_v33 }
0x1436   :  { %2707 = vrot.lane.b32.xlu0 %v2683_v39, %s3455_s1  ;;  %v3127_v9 = vmul.f32 -1.442695, %v2683_v39  ;;  %v2704_v15 = vrot.slane %v2683_v39, 2 }
0x1438   :  { %3309 = vpow2.f32 %v3127_v9 }
0x143e   :  { %v3310_v10 = vpop.eup %3309 }
0x143f   :  { %v2687_v13 = vadd.f32 1.0, %v3310_v10 }
0x1441   :  { %3311 = vrcp.f32 %v2687_v13  ;;  %v2699_v11 = vand.u32 2147483648, %v2687_v13  ;;  %v2697_v59 = vand.u32 2147483647, %v2687_v13  ;;  %vm2693_vm2 = vweird.f32 %v2687_v13 }
0x1442   :  { %3313 = vtanh.f32 %v2704_v15 }
0x1443   :  { %v2700_v61 = vor.u32 1.1754944e-38, %v2699_v11  ;;  %vm2698_vm4 = vcmp.eq.f32.partialorder %v2697_v59, 8.507059e+37 }
0x1447   :  { %v3312_v14 = vpop.eup %3311 }
0x1448   :  { %v2689_v16 = vmul.f32 %v3312_v14, %v2687_v13  ;;  %vm2694_vm1 = vweird.f32 %v3312_v14  ;;  %v3314_v63 = vpop.eup %3313 }
0x1449   :  { %vm2695_vm3 = vmor %vm2693_vm2, %vm2694_vm1 }
0x144a   :  { %v2690_v17 = vsub.f32 1.0, %v2689_v16 }
0x144c   :  { %v2691_v18 = vmul.f32 %v3312_v14, %v2690_v17 }
0x144e   :  { %v2692_v60 = vadd.f32 %v3312_v14, %v2691_v18 }
0x1450   :  { %v2696_v62 = vsel %vm2695_vm3, %v3312_v14, %v2692_v60 }
0x1451   :  { %v2701_v19 = vsel %vm2698_vm4, %v2700_v61, %v2696_v62 }
0x1452   :  { %v2731_v50 = vmul.f32 %v3314_v63, %v2701_v19  ;;  %v2730_v1 = vmul.f32 %v2701_v19, %v2623_v58  ;;  %v2746_v58 = vld [vmem:[#allocation3 + $0x4] sm:$0xf] }
0x1453   :  { %v2747_v20 = vadd.f32 %v2746_v58, %v2745_v22 }
0x1454   :  { %2733 = vrot.lane.b32.xlu2 %v2731_v50, %s3455_s1 }
0x14a8   :  { %v2708_v37 = vpop.permute.xlu0 %2707 }
0x14a9   :  { %v2709_v38 = vrot.slane %v2708_v37, 2 }
0x14ab   :  { %v3128_v0 = vmul.f32 -1.442695, %v2709_v38  ;;  %v2859_v38 = vld [vmem:[#allocation3] sm:$0xf] }
0x14ae   :  { %v2734_v24 = vpop.permute.xlu2 %2733 }
0x14af   :  { %v2736_v35 = vadd.f32 %v2734_v24, %v2730_v1 }
0x14b1   :  { %3315 = vtanh.f32 %v2736_v35 }
0x14b2   :  { %3317 = vpow2.f32 %v3128_v0 }
0x14b7   :  { %v3316_v36 = vpop.eup %3315 }
0x14b8   :  { %2739 = vrot.lane.b32.xlu1 %v3316_v36, %s3455_s1  ;;  %v3318_v25 = vpop.eup %3317 }
0x14b9   :  { %v2714_v26 = vadd.f32 1.0, %v3318_v25 }
0x14bb   :  { %3319 = vrcp.f32 %v2714_v26  ;;  %v2726_v51 = vand.u32 2147483648, %v2714_v26  ;;  %vm2720_vm6 = vweird.f32 %v2714_v26  ;;  %v2724_v52 = vand.u32 2147483647, %v2714_v26 }
0x14bd   :  { %v2727_v54 = vor.u32 1.1754944e-38, %v2726_v51  ;;  %vm2725_vm8 = vcmp.eq.f32.partialorder %v2724_v52, 8.507059e+37 }
0x14c1   :  { %v3320_v53 = vpop.eup %3319 }
0x14c2   :  { %v2716_v28 = vmul.f32 %v3320_v53, %v2714_v26  ;;  %vm2721_vm5 = vweird.f32 %v3320_v53 }
0x14c3   :  { %vm2722_vm7 = vmor %vm2720_vm6, %vm2721_vm5  ;;  %vm2984_vm6 = vcmask 261120  }
0x14c4   :  { %v2717_v40 = vsub.f32 1.0, %v2716_v28 }
0x14c6   :  { %v2718_v41 = vmul.f32 %v3320_v53, %v2717_v40 }
0x14c8   :  { %v2719_v21 = vadd.f32 %v3320_v53, %v2718_v41 }
0x14ca   :  { %v2723_v29 = vsel %vm2722_vm7, %v3320_v53, %v2719_v21 }
0x14cb   :  { %v2728_v55 = vsel %vm2725_vm8, %v2727_v54, %v2723_v29 }
0x152a   :  { %v2740_v56 = vpop.permute.xlu1 %2739 }
0x152b   :  { %v2742_v57 = vmul.f32 %v2740_v56, %v2728_v55 }
0x152d   :  { %3129 = vmatmul.msk.f32.vlgmr.msrb.gmra.mxu0 %vm334_vm10, %v2742_v57  ;;  %3130 = vmatmul.msk.f32.vlgmr.msrb.gmra.mxu1 %vm334_vm10, %v2742_v57 }
0x15aa   :  { %v2788_v3 = vpop.f32.mrf.mxu1  ;;  %v2768_v23 = vpop.f32.mrf.mxu0 }
0x15ab   :  { %v2793_v12 = vrot.slane %v2788_v3, 6 }
0x15ad   :  { %v2794_v31 = vsel %vm219_vm0, %v2768_v23, %v2793_v12 }
0x15ae   :  { %v2796_v32 = vadd.f32 %v2794_v31, %v2747_v20  ;;  %v2980_v20 = vld [vmem:[#allocation5] sm:$0x3]  ;;  %v2978_v31 = vld [vmem:[%s4589_s9 + $0x38] sm:$0xff] }
0x15af   :  { %2999 = vmatpush.msra.mxu0 %v2978_v31 }
0x15b0   :  { %2820 = vrot.lane.b32.xlu0 %v2796_v32, %s3455_s1  ;;  %v3131_v34 = vmul.f32 -1.442695, %v2796_v32  ;;  %v2817_v43 = vrot.slane %v2796_v32, 2  ;;  %v2977_v32 = vld [vmem:[%s4589_s9 + $0x30] sm:$0xff] }
0x15b1   :  { %3000 = vmatpush.msra.mxu0 %v2977_v32 }
0x15b2   :  { %3321 = vpow2.f32 %v3131_v34  ;;  %v2976_v34 = vld [vmem:[%s4589_s9 + $0x28] sm:$0xff] }
0x15b3   :  { %3001 = vmatpush.msra.mxu0 %v2976_v34 }
0x15b8   :  { %v3322_v30 = vpop.eup %3321 }
0x15b9   :  { %v2800_v42 = vadd.f32 1.0, %v3322_v30  ;;  %v2975_v30 = vld [vmem:[%s4589_s9 + $0x20] sm:$0xff] }
0x15ba   :  { %3002 = vmatpush.msra.mxu0 %v2975_v30 }
0x15bb   :  { %3323 = vrcp.f32 %v2800_v42  ;;  %v2812_v46 = vand.u32 2147483648, %v2800_v42  ;;  %v2810_v47 = vand.u32 2147483647, %v2800_v42  ;;  %vm2806_vm12 = vweird.f32 %v2800_v42 }
0x15bc   :  { %3325 = vtanh.f32 %v2817_v43 }
0x15bd   :  { %v2813_v2 = vor.u32 1.1754944e-38, %v2812_v46  ;;  %vm2811_vm14 = vcmp.eq.f32.partialorder %v2810_v47, 8.507059e+37 }
0x15c1   :  { %v3324_v27 = vpop.eup %3323 }
0x15c2   :  { %v2802_v44 = vmul.f32 %v3324_v27, %v2800_v42  ;;  %vm2807_vm11 = vweird.f32 %v3324_v27  ;;  %v3326_v7 = vpop.eup %3325 }
0x15c3   :  { %vm2808_vm13 = vmor %vm2806_vm12, %vm2807_vm11 }
0x15c4   :  { %v2803_v45 = vsub.f32 1.0, %v2802_v44 }
0x15c6   :  { %v2804_v49 = vmul.f32 %v3324_v27, %v2803_v45 }
0x15c8   :  { %v2805_v48 = vadd.f32 %v3324_v27, %v2804_v49 }
0x15ca   :  { %v2809_v4 = vsel %vm2808_vm13, %v3324_v27, %v2805_v48  ;;  %vm3036_vm13 = vcmask 1024  }
0x15cb   :  { %v2814_v5 = vsel %vm2811_vm14, %v2813_v2, %v2809_v4  ;;  %v2974_v4 = vld [vmem:[%s4589_s9 + $0x18] sm:$0xff] }
0x15cc   :  { %v2844_v6 = vmul.f32 %v3326_v7, %v2814_v5  ;;  %v2843_v33 = vmul.f32 %v2814_v5, %v2736_v35  ;;  %v2858_v35 = vld [vmem:[#allocation2 + $0x1c] sm:$0xf]  ;;  %v2973_v7 = vld [vmem:[%s4589_s9 + $0x10] sm:$0xff]  ;;  %3022 = vmatpush.msra.mxu1 %v2974_v4  ;;  %v2972_v5 = vld [vmem:[%s4589_s9 + $0x8] sm:$0xff] }
0x15cd   :  { %v2860_v25 = vadd.f32 %v2859_v38, %v2858_v35 }
0x15ce   :  { %2846 = vrot.lane.b32.xlu2 %v2844_v6, %s3455_s1  ;;  %3023 = vmatpush.msra.mxu1 %v2973_v7  ;;  %v2971_v6 = vld [vmem:[%s4589_s9] sm:$0xff] }
0x15d0   :  { %3024 = vmatpush.msra.mxu1 %v2972_v5 }
0x15d2   :  { %3025 = vmatpush.msra.mxu1 %v2971_v6 }
0x1622   :  { %v2821_v10 = vpop.permute.xlu0 %2820 }
0x1623   :  { %v2822_v13 = vrot.slane %v2821_v10, 2 }
0x1625   :  { %v3132_v14 = vmul.f32 -1.442695, %v2822_v13 }
0x1628   :  { %v2847_v8 = vpop.permute.xlu2 %2846 }
0x1629   :  { %v4539_v39 = vadd.f32 %v2847_v8, %v2843_v33 }
0x162b   :  { %3327 = vtanh.f32 %v4539_v39 }
0x162c   :  { %3329 = vpow2.f32 %v3132_v14 }
0x1631   :  { %v3328_v9 = vpop.eup %3327 }
0x1632   :  { %2852 = vrot.lane.b32.xlu1 %v3328_v9, %s3455_s1  ;;  %v3330_v15 = vpop.eup %3329 }
0x1633   :  { %v2827_v16 = vadd.f32 1.0, %v3330_v15 }
0x1635   :  { %3331 = vrcp.f32 %v2827_v16  ;;  %v2839_v61 = vand.u32 2147483648, %v2827_v16  ;;  %vm2833_vm1 = vweird.f32 %v2827_v16  ;;  %v2837_v62 = vand.u32 2147483647, %v2827_v16 }
0x1637   :  { %v2840_v19 = vor.u32 1.1754944e-38, %v2839_v61  ;;  %vm2838_vm3 = vcmp.eq.f32.partialorder %v2837_v62, 8.507059e+37 }
0x163b   :  { %v3332_v17 = vpop.eup %3331 }
0x163c   :  { %v2829_v11 = vmul.f32 %v3332_v17, %v2827_v16  ;;  %vm2834_vm15 = vweird.f32 %v3332_v17 }
0x163d   :  { %vm2835_vm2 = vmor %vm2833_vm1, %vm2834_vm15 }
0x163e   :  { %v2830_v18 = vsub.f32 1.0, %v2829_v11 }
0x1640   :  { %v2831_v59 = vmul.f32 %v3332_v17, %v2830_v18 }
0x1642   :  { %v2832_v60 = vadd.f32 %v3332_v17, %v2831_v59 }
0x1644   :  { %v2836_v63 = vsel %vm2835_vm2, %v3332_v17, %v2832_v60  ;;  %v3152_v60 = vld [vmem:[#allocation6] ss:$0 sm:$0xff] }
0x1645   :  { %v2841_v50 = vsel %vm2838_vm3, %v2840_v19, %v2836_v63 }
0x16a4   :  { %v2853_v1 = vpop.permute.xlu1 %2852 }
0x16a5   :  { %v2855_v24 = vmul.f32 %v2853_v1, %v2841_v50 }
0x16a7   :  { %3133 = vmatmul.msk.f32.vlgmr.msrb.gmra.mxu2 %vm334_vm10, %v2855_v24  ;;  %3134 = vmatmul.msk.f32.vlgmr.msrb.gmra.mxu3 %vm334_vm10, %v2855_v24 }
0x172a   :  { %v2901_v36 = vpop.f32.mrf.mxu3  ;;  %v2881_v0 = vpop.f32.mrf.mxu2 }
0x172b   :  { %v2906_v37 = vrot.slane %v2901_v36, 6 }
0x172d   :  { %v2907_v26 = vsel %vm219_vm0, %v2881_v0, %v2906_v37 }
0x172e   :  { %v2909_v53 = vadd.f32 %v2907_v26, %v2860_v25 }
0x1730   :  { %2933 = vrot.lane.b32.xlu0 %v2909_v53, %s3455_s1  ;;  %v3135_v28 = vmul.f32 -1.442695, %v2909_v53  ;;  %v2930_v51 = vrot.slane %v2909_v53, 2 }
0x1732   :  { %3333 = vpow2.f32 %v3135_v28 }
0x1738   :  { %v3334_v40 = vpop.eup %3333 }
0x1739   :  { %v2913_v41 = vadd.f32 1.0, %v3334_v40 }
0x173b   :  { %3335 = vrcp.f32 %v2913_v41  ;;  %v2925_v54 = vand.u32 2147483648, %v2913_v41  ;;  %v2923_v56 = vand.u32 2147483647, %v2913_v41  ;;  %vm2919_vm4 = vweird.f32 %v2913_v41 }
0x173c   :  { %3337 = vtanh.f32 %v2930_v51 }
0x173d   :  { %v2926_v58 = vor.u32 1.1754944e-38, %v2925_v54  ;;  %vm2924_vm5 = vcmp.eq.f32.partialorder %v2923_v56, 8.507059e+37 }
0x1741   :  { %v3336_v21 = vpop.eup %3335 }
0x1742   :  { %v2915_v52 = vmul.f32 %v3336_v21, %v2913_v41  ;;  %vm2920_vm10 = vweird.f32 %v3336_v21  ;;  %v3338_v12 = vpop.eup %3337 }
0x1743   :  { %vm2921_vm0 = vmor %vm2919_vm4, %vm2920_vm10 }
0x1744   :  { %v2916_v29 = vsub.f32 1.0, %v2915_v52 }
0x1746   :  { %v2917_v55 = vmul.f32 %v3336_v21, %v2916_v29 }
0x1748   :  { %v2918_v57 = vadd.f32 %v3336_v21, %v2917_v55 }
0x174a   :  { %v2922_v3 = vsel %vm2921_vm0, %v3336_v21, %v2918_v57 }
0x174b   :  { %v2927_v22 = vsel %vm2924_vm5, %v2926_v58, %v2922_v3 }
0x174c   :  { %v2957_v23 = vmul.f32 %v3338_v12, %v2927_v22  ;;  %v2956_v42 = vmul.f32 %v2927_v22, %v4539_v39 }
0x174e   :  { %2959 = vrot.lane.b32.xlu2 %v2957_v23, %s3455_s1 }
0x1756   :  { %2982 = vrot.lane.b32.xlu2 %v2980_v20, %s3456_s7 }
0x17a2   :  { %v2934_v46 = vpop.permute.xlu0 %2933 }
0x17a3   :  { %v2935_v49 = vrot.slane %v2934_v46, 2 }
0x17a5   :  { %v3136_v47 = vmul.f32 -1.442695, %v2935_v49 }
0x17a8   :  { %v2960_v27 = vpop.permute.xlu2 %2959 }
0x17a9   :  { %v2962_v43 = vadd.f32 %v2960_v27, %v2956_v42 }
0x17ab   :  { %3339 = vtanh.f32 %v2962_v43 }
0x17ac   :  { %3341 = vpow2.f32 %v3136_v47 }
0x17b0   :  { %v2983_v44 = vpop.permute.xlu2 %2982 }
0x17b1   :  { %v3340_v45 = vpop.eup %3339  ;;  %3137 = vmatmul.msk.f32.vlgmr.msra.gmra.mxu0 %vm2984_vm6, %v2983_v44 }
0x17b2   :  { %2965 = vrot.lane.b32.xlu1 %v3340_v45, %s3455_s1  ;;  %v3342_v48 = vpop.eup %3341 }
0x17b3   :  { %v2940_v2 = vadd.f32 1.0, %v3342_v48 }
0x17b5   :  { %3343 = vrcp.f32 %v2940_v2  ;;  %v2952_v13 = vand.u32 2147483648, %v2940_v2  ;;  %vm2946_vm8 = vweird.f32 %v2940_v2  ;;  %v2950_v14 = vand.u32 2147483647, %v2940_v2 }
0x17b7   :  { %v2953_v16 = vor.u32 1.1754944e-38, %v2952_v13  ;;  %vm2951_vm12 = vcmp.eq.f32.partialorder %v2950_v14, 8.507059e+37 }
0x17bb   :  { %v3344_v33 = vpop.eup %3343 }
0x17bc   :  { %v2942_v8 = vmul.f32 %v3344_v33, %v2940_v2  ;;  %vm2947_vm7 = vweird.f32 %v3344_v33 }
0x17bd   :  { %vm2948_vm11 = vmor %vm2946_vm8, %vm2947_vm7 }
0x17be   :  { %v2943_v39 = vsub.f32 1.0, %v2942_v8 }
0x17c0   :  { %v2944_v9 = vmul.f32 %v3344_v33, %v2943_v39 }
0x17c2   :  { %v2945_v10 = vadd.f32 %v3344_v33, %v2944_v9 }
0x17c4   :  { %v2949_v15 = vsel %vm2948_vm11, %v3344_v33, %v2945_v10 }
0x17c5   :  { %v2954_v17 = vsel %vm2951_vm12, %v2953_v16, %v2949_v15 }
0x1824   :  { %v2966_v11 = vpop.permute.xlu1 %2965 }
0x1825   :  { %v2968_v18 = vmul.f32 %v2966_v11, %v2954_v17 }
0x1827   :  { %2970 = vst.msk [vmem:[#allocation5 + $0xe] sm:$0x3] %vm443_vm9, %v2968_v18 }
0x182e   :  { %v2979_v59 = vld [vmem:[#allocation5 + $0xe] sm:$0x3]  ;;  %v3004_v61 = vpop.f32.mrf.mxu0 }
0x182f   :  { %3138 = vmatmul.msk.f32.vlgmr.msra.gmra.mxu1 %vm2984_vm6, %v2979_v59 }
0x18ac   :  { %v3027_v62 = vpop.f32.mrf.mxu1 }
0x18ad   :  { %v3028_v63 = vadd.f32 %v3027_v62, %v3004_v61 }
0x18af   :  { %v3034_v19 = vadd.f32 %v3152_v60, %v3028_v63 }
0x18b1   :  { %v3035_v50 = vmul.f32 100.0, %v3034_v19 }
0x18b3   :  { %3037 = vst.msk [vmem:[%s4591_s11] sm:$0x3] %vm3036_vm13, %v3035_v50 }
0x18b4   :  { %3042 = vsyncpa [#allocation8], 1 }
0x18b5   :  { %3043 = vsyncpa [#allocation10], 1 }
0x18b6   :  { %3044 = vsyncpa [#allocation13], 1 }

</bundles_post_ra>
